<compile_context>
chip_gen: v6e
topology: v6e:2x2x1
jax: 0.10.0
libtpu: 0.0.40
codegen_flags: <defaults>
</compile_context>

<pallas_src>
import functools
import math

import numpy as np
import jax
import jax.numpy as jnp
from jax import lax
from jax.experimental import pallas as pl
from jax.experimental.pallas import tpu as pltpu


def _round_up(x, m):
    return (x + m - 1) // m * m


# ----------------------------------------------------------------------------
# Parameter / buffer construction (equivalent of CME.__init__)
# ----------------------------------------------------------------------------
def make_cme_buffers(tau_min, tau_max, n_taus, max_fn_evals):
    # TODO(synk): the real module selects CME params from iltcme.json; we have
    # no file access, so synthesize deterministic params with the same shapes.
    n = max_fn_evals - 1                      # so that n + 1 <= max_fn_evals
    c = 1.0
    k = np.arange(1, n + 1, dtype=np.float64)
    a = ((-1.0) ** k) * 0.5 / k
    b = 0.3 / k
    omega = 0.5
    mu1 = 1.0

    tau_stars = np.geomspace(tau_min, tau_max, n_taus)                        # (n_taus,)
    eta = (np.concatenate([[c], a]) + 1j * np.concatenate([[0.0], b])) * mu1  # (n+1,)
    beta = (np.ones(n + 1) + 1j * np.arange(n + 1) * omega) * mu1             # (n+1,)
    s = np.outer(1.0 / tau_stars, beta)                                       # (n_taus, n+1)
    return tau_stars, eta, s, n               # fn_evals = n


# ----------------------------------------------------------------------------
# Pallas kernel: one block of rows_per_blk packed rows (= rows*R seq steps)
# per grid iteration.  The complex CME state F is carried lane-flattened and
# split real/imag in vregs through the loop; the resident output blocks
# fr_ref/fi_ref hold it across the "arbitrary" sequence axis.
# ----------------------------------------------------------------------------
def _cme_kernel(fa_ref, nsr_ref, nsi_ref, wr_ref, wi_ref, fr0_ref, fi0_ref,
                til_ref, fr_ref, fi_ref,
                *, r_pack, n_taus, row_w, rows_per_blk, unroll):
    t_blk = pl.program_id(1)          # sequence-block index (recurrence axis)

    # Initialize the resident state F from the provided initial value.
    @pl.when(t_blk == 0)
    def _():
        fr_ref[...] = fr0_ref[...]
        fi_ref[...] = fi0_ref[...]

    b_blk, LP = fr_ref.shape

    # Hoisted loop invariants (JAX does not CSE broadcast_in_dim in loops).
    nsr = jnp.broadcast_to(nsr_ref[...], (b_blk, LP))   # -Re(s), lane-flattened
    nsi = jnp.broadcast_to(nsi_ref[...], (b_blk, LP))   # -Im(s)
    wr = wr_ref[...]                                    # (LP, n_taus):  eta_r * scale
    wi = wi_ref[...]                                    # (LP, n_taus): -eta_i * scale
    # TODO(synk): Re(s)=1/tau is constant across K (beta_real = 1), so exp(zr)
    # could be computed n_taus-wide and replicated across K; skipped (EUP has slack).

    def row_step(r, carry):
        Fr, Fi = carry
        fa_row = fa_ref[r]            # (b_blk, 2R): lanes [0:R]=fs, [R:2R]=alphas
        parts = []
        for p in range(r_pack):       # static unroll over the packed phases
            f = fa_row[:, p:p + 1]                    # (b_blk, 1)
            a = fa_row[:, r_pack + p:r_pack + p + 1]  # (b_blk, 1)

            # z = -s * alpha (complex, split real/imag)
            zr = a * nsr
            zi = a * nsi

            # hh = exp(z)
            er = jnp.exp(zr)
            hhr = er * jnp.cos(zi)
            hhi = er * jnp.sin(zi)

            # ih = exprel(z) = (exp(z) - 1) / z ; series branch for small |z|.
            num_r = hhr - 1.0
            num_i = hhi
            d = zr * zr + zi * zi
            small = d < 1e-6
            d_safe = jnp.where(small, 1.0, d)
            # Reciprocal on the EUP (VALU is the binding slot) + one Newton step.
            r0 = pl.reciprocal(d_safe, approx=True)
            inv = r0 * (2.0 - d_safe * r0)
            ihr = jnp.where(small, 1.0 + 0.5 * zr, (num_r * zr + num_i * zi) * inv)
            ihi = jnp.where(small, 0.5 * zi, (num_i * zr - num_r * zi) * inv)

            # b = fs * ih ; pad lanes (nsr=nsi=0) are never read downstream.
            br = f * ihr
            bi = f * ihi

            # F <- F * hh + b   (complex multiply-accumulate; state stays in vregs)
            Fr, Fi = (Fr * hhr - Fi * hhi + br,
                      Fr * hhi + Fi * hhr + bi)

            # Re(eta . F) * scale for this step: one MXU matmul pair -> (b_blk, n_taus)
            parts.append(jnp.dot(Fr, wr, preferred_element_type=jnp.float32) +
                         jnp.dot(Fi, wi, preferred_element_type=jnp.float32))

        pad = row_w - r_pack * n_taus
        if pad:   # fallback (R == 1, n_taus not a divisor of 128): zero filler lanes
            parts.append(jnp.zeros((b_blk, pad), jnp.float32))
        # One lane-dense (b_blk, row_w) store per packed row -> unmasked vst + dense DMA.
        til_ref[r] = parts[0] if len(parts) == 1 else jnp.concatenate(parts, axis=-1)
        return Fr, Fi

    Fr, Fi = lax.fori_loop(0, rows_per_blk, row_step,
                           (fr_ref[...], fi_ref[...]), unroll=unroll)
    fr_ref[...] = Fr
    fi_ref[...] = Fi


# ----------------------------------------------------------------------------
# Wrapper (glue: packing, lane-dense flattening, pallas_call, unpacking)
# ----------------------------------------------------------------------------
def cme_forward(fs, alphas, s, eta, tau_stars, g, fn_evals, F=None,
                *, batch_first=False):
    """fs, alphas: (seq, batch, feat). Returns (til_fs, F) like CME.forward."""
    fs = jnp.asarray(fs, jnp.float32)
    if batch_first:
        fs = jnp.swapaxes(fs, 0, 1)
    if alphas is None:
        alphas = jnp.ones_like(fs)
    else:
        alphas = jnp.asarray(alphas, jnp.float32)
        if batch_first:
            alphas = jnp.swapaxes(alphas, 0, 1)

    seq, nb, nf = fs.shape
    B = nb * nf
    s = np.asarray(s)
    eta = np.asarray(eta)
    tau_stars = np.asarray(tau_stars, np.float64)
    n_taus, K = s.shape
    L = n_taus * K
    LP = _round_up(L, 128)            # lane-dense flattened (n_taus, K) axis

    # ---- til row packing: R consecutive steps share one lane-dense row ----
    R = 128 // math.gcd(n_taus, 128)
    ROW = R * n_taus
    if R > 16 or ROW > 512:           # fallback for awkward n_taus
        R, ROW = 1, _round_up(n_taus, 128)

    # ---- TPU generation: megacore split + VMEM budget ----
    kind = ""
    try:
        kind = jax.devices()[0].device_kind.lower()
    except Exception:
        pass
    is_v7 = ("v7" in kind) or ("tpu7" in kind) or ("ironwood" in kind)
    num_cores = 2 if is_v7 else 1
    vmem_budget = (48 if is_v7 else 96) * 1024 * 1024   # v7x: 64 MiB physical

    # ---- batch blocking: b_blk = 8 keeps every (b_blk, LP) temp ~1 vreg ----
    b_blk = 8
    B_pad = _round_up(B, b_blk * num_cores)   # guarantees num_b >= 2 on v7x
    num_b = B_pad // b_blk

    # ---- sequence blocking under an explicit, full VMEM accounting ----
    def vmem_bytes(shape):
        sh = list(shape)
        sh[-1] = _round_up(sh[-1], 128)
        if len(sh) >= 2:
            sh[-2] = _round_up(sh[-2], 8)
        return int(np.prod(sh)) * 4

    # All inputs/outputs are double-buffered by the pipeline (constant-index blocks
    # too; pl.Buffered(1) would halve that but the total is only a few hundred KiB,
    # so it is counted rather than risked).
    const_bytes = 2 * (2 * vmem_bytes((1, LP))            # nsr, nsi
                       + 2 * vmem_bytes((LP, n_taus))      # Wr, Wi
                       + 2 * vmem_bytes((b_blk, LP))       # Fr0, Fi0 inputs
                       + 2 * vmem_bytes((b_blk, LP)))      # Fr, Fi outputs
    per_row = 2 * (vmem_bytes((1, b_blk, 2 * R))           # fa block (double-buffered)
                   + vmem_bytes((1, b_blk, ROW)))          # til block (double-buffered)
    avail = vmem_budget - const_bytes - (8 << 20)          # headroom for scratch
    rows_needed = -(-seq // R)
    rows_cap = max(1, 4096 // R)                           # <= 4096 seq steps / block
    rows_blk = int(max(1, min(rows_needed, avail // per_row, rows_cap)))
    seq_blk = rows_blk * R
    seq_pad = _round_up(seq, seq_blk)
    rows_total = seq_pad // R
    num_t = rows_total // rows_blk
    unroll = int(max(1, min(max(1, 8 // R), rows_blk)))
    vmem_limit = int(min(vmem_budget, const_bytes + rows_blk * per_row + (16 << 20)))

    # ---- pack fs/alphas: R steps per lane row -> (rows_total, B_pad, 2R) ----
    # Padding with fs = alpha = 0 gives hh = 1, b = 0 -> F is unchanged on pad steps.
    fs2 = jnp.pad(fs.reshape(seq, B), ((0, seq_pad - seq), (0, B_pad - B)))
    al2 = jnp.pad(alphas.reshape(seq, B), ((0, seq_pad - seq), (0, B_pad - B)))
    fs_r = jnp.transpose(fs2.reshape(rows_total, R, B_pad), (0, 2, 1))
    al_r = jnp.transpose(al2.reshape(rows_total, R, B_pad), (0, 2, 1))
    fa = jnp.concatenate([fs_r, al_r], axis=-1)            # (rows_total, B_pad, 2R)

    # ---- host-side constants ----
    ns = (-s).reshape(L)
    nsr = np.zeros((1, LP), np.float32); nsr[0, :L] = ns.real
    nsi = np.zeros((1, LP), np.float32); nsi[0, :L] = ns.imag

    scale = (tau_stars / fn_evals) ** g / tau_stars                  # (n_taus,)
    Wr = np.zeros((LP, n_taus), np.float32)
    Wi = np.zeros((LP, n_taus), np.float32)
    for t in range(n_taus):
        Wr[t * K:(t + 1) * K, t] = eta.real * scale[t]
        Wi[t * K:(t + 1) * K, t] = -eta.imag * scale[t]

    if F is None:
        Fr0 = jnp.zeros((B_pad, LP), jnp.float32)
        Fi0 = jnp.zeros((B_pad, LP), jnp.float32)
    else:
        Fc = jnp.asarray(F).reshape(B, L)
        Fr0 = jnp.zeros((B_pad, LP), jnp.float32).at[:B, :L].set(
            jnp.real(Fc).astype(jnp.float32))
        Fi0 = jnp.zeros((B_pad, LP), jnp.float32).at[:B, :L].set(
            jnp.imag(Fc).astype(jnp.float32))

    kernel = functools.partial(_cme_kernel, r_pack=R, n_taus=n_taus, row_w=ROW,
                               rows_per_blk=rows_blk, unroll=unroll)

    til, Fr, Fi = pl.pallas_call(
        kernel,
        out_shape=(
            jax.ShapeDtypeStruct((rows_total, B_pad, ROW), jnp.float32),
            jax.ShapeDtypeStruct((B_pad, LP), jnp.float32),
            jax.ShapeDtypeStruct((B_pad, LP), jnp.float32),
        ),
        grid_spec=pltpu.PrefetchScalarGridSpec(
            num_scalar_prefetch=0,
            grid=(num_b, num_t),
            in_specs=[
                pl.BlockSpec((rows_blk, b_blk, 2 * R), lambda b, t: (t, b, 0)),  # fs/alpha
                pl.BlockSpec((1, LP), lambda b, t: (0, 0)),                      # -Re(s)
                pl.BlockSpec((1, LP), lambda b, t: (0, 0)),                      # -Im(s)
                pl.BlockSpec((LP, n_taus), lambda b, t: (0, 0)),                 # Wr
                pl.BlockSpec((LP, n_taus), lambda b, t: (0, 0)),                 # Wi
                pl.BlockSpec((b_blk, LP), lambda b, t: (b, 0)),                  # Fr init
                pl.BlockSpec((b_blk, LP), lambda b, t: (b, 0)),                  # Fi init
            ],
            out_specs=[
                pl.BlockSpec((rows_blk, b_blk, ROW), lambda b, t: (t, b, 0)),    # til rows
                pl.BlockSpec((b_blk, LP), lambda b, t: (b, 0)),                  # Fr (resident)
                pl.BlockSpec((b_blk, LP), lambda b, t: (b, 0)),                  # Fi (resident)
            ],
        ),
        compiler_params=pltpu.CompilerParams(
            # batch axis is embarrassingly parallel (megacore on v7x);
            # the sequence axis is a true recurrence.
            dimension_semantics=("parallel", "arbitrary"),
            vmem_limit_bytes=vmem_limit),
        # State is aliased input -> output (no duplicate (B, LP) HBM copies).
        input_output_aliases={5: 1, 6: 2},
    )(fa, jnp.asarray(nsr), jnp.asarray(nsi), jnp.asarray(Wr), jnp.asarray(Wi),
      Fr0, Fi0)

    # ---- unpack: (rows, B, R, n_taus) -> (seq, nb, nf, n_taus) ----
    til = til[:, :, :R * n_taus].reshape(rows_total, B_pad, R, n_taus)
    til = jnp.swapaxes(til, 1, 2).reshape(seq_pad, B_pad, n_taus)
    til_fs = til[:seq, :B].reshape(seq, nb, nf, n_taus)
    F_out = (Fr[:B, :L] + 1j * Fi[:B, :L]).reshape(nb, nf, n_taus, K)
    if batch_first:
        til_fs = jnp.swapaxes(til_fs, 0, 1)
    return til_fs, F_out


# ----------------------------------------------------------------------------
# NumPy float64/complex128 reference (mirrors the PyTorch forward)
# ----------------------------------------------------------------------------
def cme_ref_np(fs, alphas, s, eta, tau_stars, g, fn_evals):
    fs = np.asarray(fs, np.float64)
    alphas = np.asarray(alphas, np.float64)
    seq, nb, nf = fs.shape
    n_taus, K = s.shape
    F = np.zeros((nb, nf, n_taus, K), np.complex128)
    sma = s[None, None, None] * alphas[..., None, None]
    hh = np.exp(-sma)
    z = -sma
    safe_z = np.where(np.abs(z) < 1e-12, 1.0, z)
    ih = np.where(np.abs(z) < 1e-12, 1.0 + z / 2, (np.exp(z) - 1.0) / safe_z)
    b = fs[..., None, None] * ih
    tils = []
    for i in range(seq):
        F = F * hh[i] + b[i]
        til = np.sum(eta * F, axis=-1).real / tau_stars
        til = til * (tau_stars / fn_evals) ** g
        tils.append(til)
    return np.stack(tils), F


# ----------------------------------------------------------------------------
if __name__ == "__main__":
    tau_min, tau_max, n_taus = 0.1, 10.0, 16
    max_fn_evals, g = 8, 1
    seq, batch, feat = 8, 2, 4

    tau_stars, eta, s, fn_evals = make_cme_buffers(tau_min, tau_max, n_taus, max_fn_evals)

    key = jax.random.PRNGKey(0)
    k1, k2 = jax.random.split(key)
    fs = jax.random.normal(k1, (seq, batch, feat), jnp.float32)
    alphas = jax.random.uniform(k2, (seq, batch, feat), jnp.float32,
                                minval=0.5, maxval=1.5)

    til_fs, F = cme_forward(fs, alphas, s, eta, tau_stars, g, fn_evals)
    jax.block_until_ready((til_fs, F))

    # Correctness check against the float64/complex128 reference.
    til_ref, F_ref = cme_ref_np(np.asarray(fs), np.asarray(alphas),
                                s, eta, tau_stars, g, fn_evals)
    np.testing.assert_allclose(np.asarray(til_fs), til_ref, rtol=5e-3, atol=1e-3)
    np.testing.assert_allclose(np.asarray(jnp.real(F)), F_ref.real, rtol=5e-3, atol=1e-3)
    np.testing.assert_allclose(np.asarray(jnp.imag(F)), F_ref.imag, rtol=5e-3, atol=1e-3)

    print("KERNEL_OK")
</pallas_src>

<mosaic_0001>
module attributes {stable_mosaic.version = 11 : i64} {
  func.func @_cme_kernel(%arg0: i32, %arg1: i32, %arg2: memref<1x8x16xf32, #tpu.memory_space<vmem>>, %arg3: memref<1x128xf32, #tpu.memory_space<vmem>>, %arg4: memref<1x128xf32, #tpu.memory_space<vmem>>, %arg5: memref<128x16xf32, #tpu.memory_space<vmem>>, %arg6: memref<128x16xf32, #tpu.memory_space<vmem>>, %arg7: memref<8x128xf32, #tpu.memory_space<vmem>>, %arg8: memref<8x128xf32, #tpu.memory_space<vmem>>, %arg9: memref<1x8x128xf32, #tpu.memory_space<vmem>>, %arg10: memref<8x128xf32, #tpu.memory_space<vmem>>, %arg11: memref<8x128xf32, #tpu.memory_space<vmem>>) attributes {dimension_semantics = [#tpu.dimension_semantics<parallel>, #tpu.dimension_semantics<arbitrary>], iteration_bounds = array<i64: 1, 1>, scalar_prefetch = 0 : i64, scratch_operands = 0 : i64, tpu.core_type = #tpu.core_type<tc>, window_params = [{transform_indices = @transform_0, window_bounds = array<i64: 1, 8, 16>}, {pipeline_mode = #tpu.pipeline_mode<synchronous>, transform_indices = @transform_1, window_bounds = array<i64: 1, 128>}, {pipeline_mode = #tpu.pipeline_mode<synchronous>, transform_indices = @transform_2, window_bounds = array<i64: 1, 128>}, {pipeline_mode = #tpu.pipeline_mode<synchronous>, transform_indices = @transform_3, window_bounds = array<i64: 128, 16>}, {pipeline_mode = #tpu.pipeline_mode<synchronous>, transform_indices = @transform_4, window_bounds = array<i64: 128, 16>}, {transform_indices = @transform_5, window_bounds = array<i64: 8, 128>}, {transform_indices = @transform_6, window_bounds = array<i64: 8, 128>}, {transform_indices = @transform_7, window_bounds = array<i64: 1, 8, 128>}, {transform_indices = @transform_8, window_bounds = array<i64: 8, 128>}, {transform_indices = @transform_9, window_bounds = array<i64: 8, 128>}]} {
    %c0_i32 = arith.constant 0 : i32
    %0 = arith.cmpi eq, %arg1, %c0_i32 : i32
    %1 = arith.extui %0 : i1 to i32
    %c0_i32_0 = arith.constant 0 : i32
    %2 = arith.cmpi ne, %1, %c0_i32_0 : i32
    scf.if %2 {
      %c0_92 = arith.constant 0 : index
      %c0_93 = arith.constant 0 : index
      %471 = vector.load %arg7[%c0_92, %c0_93] : memref<8x128xf32, #tpu.memory_space<vmem>>, vector<8x128xf32>
      %c0_94 = arith.constant 0 : index
      %c0_95 = arith.constant 0 : index
      %472 = vector.load %arg10[%c0_94, %c0_95] : memref<8x128xf32, #tpu.memory_space<vmem>>, vector<8x128xf32>
      tpu.vector_store %arg10[%c0_94, %c0_95], %471 {strides = array<i32>} : memref<8x128xf32, #tpu.memory_space<vmem>>, vector<8x128xf32>,
      %c0_96 = arith.constant 0 : index
      %c0_97 = arith.constant 0 : index
      %473 = vector.load %arg8[%c0_96, %c0_97] : memref<8x128xf32, #tpu.memory_space<vmem>>, vector<8x128xf32>
      %c0_98 = arith.constant 0 : index
      %c0_99 = arith.constant 0 : index
      %474 = vector.load %arg11[%c0_98, %c0_99] : memref<8x128xf32, #tpu.memory_space<vmem>>, vector<8x128xf32>
      tpu.vector_store %arg11[%c0_98, %c0_99], %473 {strides = array<i32>} : memref<8x128xf32, #tpu.memory_space<vmem>>, vector<8x128xf32>,
    } else {
    }
    %c0 = arith.constant 0 : index
    %c0_1 = arith.constant 0 : index
    %3 = vector.load %arg3[%c0, %c0_1] : memref<1x128xf32, #tpu.memory_space<vmem>>, vector<1x128xf32>
    %4 = vector.shape_cast %3 : vector<1x128xf32> to vector<1x128xf32>
    %5 = vector.broadcast %4 : vector<1x128xf32> to vector<8x128xf32>
    %c0_2 = arith.constant 0 : index
    %c0_3 = arith.constant 0 : index
    %6 = vector.load %arg4[%c0_2, %c0_3] : memref<1x128xf32, #tpu.memory_space<vmem>>, vector<1x128xf32>
    %7 = vector.shape_cast %6 : vector<1x128xf32> to vector<1x128xf32>
    %8 = vector.broadcast %7 : vector<1x128xf32> to vector<8x128xf32>
    %c0_4 = arith.constant 0 : index
    %c0_5 = arith.constant 0 : index
    %9 = vector.load %arg5[%c0_4, %c0_5] : memref<128x16xf32, #tpu.memory_space<vmem>>, vector<128x16xf32>
    %c0_6 = arith.constant 0 : index
    %c0_7 = arith.constant 0 : index
    %10 = vector.load %arg6[%c0_6, %c0_7] : memref<128x16xf32, #tpu.memory_space<vmem>>, vector<128x16xf32>
    %c0_8 = arith.constant 0 : index
    %c0_9 = arith.constant 0 : index
    %11 = vector.load %arg10[%c0_8, %c0_9] : memref<8x128xf32, #tpu.memory_space<vmem>>, vector<8x128xf32>
    %c0_10 = arith.constant 0 : index
    %c0_11 = arith.constant 0 : index
    %12 = vector.load %arg11[%c0_10, %c0_11] : memref<8x128xf32, #tpu.memory_space<vmem>>, vector<8x128xf32>
    %c0_i32_12 = arith.constant 0 : i32
    %13 = arith.index_cast %c0_i32_12 : i32 to index
    %c0_13 = arith.constant 0 : index
    %c0_14 = arith.constant 0 : index
    %14 = vector.load %arg2[%13, %c0_13, %c0_14] : memref<1x8x16xf32, #tpu.memory_space<vmem>>, vector<1x8x16xf32>
    %15 = vector.shape_cast %14 : vector<1x8x16xf32> to vector<8x16xf32>
    %16 = vector.extract_strided_slice %15 {offsets = [0, 0], sizes = [8, 1], strides = [1, 1]} : vector<8x16xf32> to vector<8x1xf32>
    %17 = vector.extract_strided_slice %15 {offsets = [0, 8], sizes = [8, 1], strides = [1, 1]} : vector<8x16xf32> to vector<8x1xf32>
    %18 = vector.broadcast %17 : vector<8x1xf32> to vector<8x128xf32>
    %19 = arith.mulf %18, %5 : vector<8x128xf32>
    %20 = vector.broadcast %17 : vector<8x1xf32> to vector<8x128xf32>
    %21 = arith.mulf %20, %8 : vector<8x128xf32>
    %22 = math.exp %19 : vector<8x128xf32>
    %23 = math.cos %21 : vector<8x128xf32>
    %24 = arith.mulf %22, %23 : vector<8x128xf32>
    %25 = math.sin %21 : vector<8x128xf32>
    %26 = arith.mulf %22, %25 : vector<8x128xf32>
    %cst = arith.constant 1.000000e+00 : f32
    %27 = vector.broadcast %cst : f32 to vector<8x128xf32>
    %28 = arith.subf %24, %27 : vector<8x128xf32>
    %29 = arith.mulf %19, %19 : vector<8x128xf32>
    %30 = arith.mulf %21, %21 : vector<8x128xf32>
    %31 = arith.addf %29, %30 : vector<8x128xf32>
    %cst_15 = arith.constant 9.99999997E-7 : f32
    %32 = vector.broadcast %cst_15 : f32 to vector<8x128xf32>
    %33 = arith.cmpf olt, %31, %32 : vector<8x128xf32>
    %cst_16 = arith.constant 1.000000e+00 : f32
    %34 = vector.broadcast %cst_16 : f32 to vector<8x128xf32>
    %35 = arith.select %33, %34, %31 : vector<8x128xi1>, vector<8x128xf32>
    %36 = tpu.reciprocal %35 {approx = true} : vector<8x128xf32> -> vector<8x128xf32>
    %37 = arith.mulf %35, %36 : vector<8x128xf32>
    %cst_17 = arith.constant 2.000000e+00 : f32
    %38 = vector.broadcast %cst_17 : f32 to vector<8x128xf32>
    %39 = arith.subf %38, %37 : vector<8x128xf32>
    %40 = arith.mulf %36, %39 : vector<8x128xf32>
    %cst_18 = arith.constant 5.000000e-01 : f32
    %41 = vector.broadcast %cst_18 : f32 to vector<8x128xf32>
    %42 = arith.mulf %41, %19 : vector<8x128xf32>
    %cst_19 = arith.constant 1.000000e+00 : f32
    %43 = vector.broadcast %cst_19 : f32 to vector<8x128xf32>
    %44 = arith.addf %43, %42 : vector<8x128xf32>
    %45 = arith.mulf %28, %19 : vector<8x128xf32>
    %46 = arith.mulf %26, %21 : vector<8x128xf32>
    %47 = arith.addf %45, %46 : vector<8x128xf32>
    %48 = arith.mulf %47, %40 : vector<8x128xf32>
    %49 = arith.select %33, %44, %48 : vector<8x128xi1>, vector<8x128xf32>
    %cst_20 = arith.constant 5.000000e-01 : f32
    %50 = vector.broadcast %cst_20 : f32 to vector<8x128xf32>
    %51 = arith.mulf %50, %21 : vector<8x128xf32>
    %52 = arith.mulf %26, %19 : vector<8x128xf32>
    %53 = arith.mulf %28, %21 : vector<8x128xf32>
    %54 = arith.subf %52, %53 : vector<8x128xf32>
    %55 = arith.mulf %54, %40 : vector<8x128xf32>
    %56 = arith.select %33, %51, %55 : vector<8x128xi1>, vector<8x128xf32>
    %57 = vector.broadcast %16 : vector<8x1xf32> to vector<8x128xf32>
    %58 = arith.mulf %57, %49 : vector<8x128xf32>
    %59 = vector.broadcast %16 : vector<8x1xf32> to vector<8x128xf32>
    %60 = arith.mulf %59, %56 : vector<8x128xf32>
    %61 = arith.mulf %11, %24 : vector<8x128xf32>
    %62 = arith.mulf %12, %26 : vector<8x128xf32>
    %63 = arith.subf %61, %62 : vector<8x128xf32>
    %64 = arith.addf %63, %58 : vector<8x128xf32>
    %65 = arith.mulf %11, %26 : vector<8x128xf32>
    %66 = arith.mulf %12, %24 : vector<8x128xf32>
    %67 = arith.addf %65, %66 : vector<8x128xf32>
    %68 = arith.addf %67, %60 : vector<8x128xf32>
    %cst_21 = arith.constant dense<0.000000e+00> : vector<8x16xf32>
    %69 = tpu.matmul %64, %9, %cst_21 {dimension_numbers = #tpu.dot_dimension_numbers<[1], [0], [0], [1], [0, 0, 1, 1], [], []>} : vector<8x128xf32>, vector<128x16xf32>, vector<8x16xf32> -> vector<8x16xf32>
    %cst_22 = arith.constant dense<0.000000e+00> : vector<8x16xf32>
    %70 = tpu.matmul %68, %10, %cst_22 {dimension_numbers = #tpu.dot_dimension_numbers<[1], [0], [0], [1], [0, 0, 1, 1], [], []>} : vector<8x128xf32>, vector<128x16xf32>, vector<8x16xf32> -> vector<8x16xf32>
    %71 = arith.addf %69, %70 : vector<8x16xf32>
    %72 = vector.extract_strided_slice %15 {offsets = [0, 1], sizes = [8, 1], strides = [1, 1]} : vector<8x16xf32> to vector<8x1xf32>
    %73 = vector.extract_strided_slice %15 {offsets = [0, 9], sizes = [8, 1], strides = [1, 1]} : vector<8x16xf32> to vector<8x1xf32>
    %74 = vector.broadcast %73 : vector<8x1xf32> to vector<8x128xf32>
    %75 = arith.mulf %74, %5 : vector<8x128xf32>
    %76 = vector.broadcast %73 : vector<8x1xf32> to vector<8x128xf32>
    %77 = arith.mulf %76, %8 : vector<8x128xf32>
    %78 = math.exp %75 : vector<8x128xf32>
    %79 = math.cos %77 : vector<8x128xf32>
    %80 = arith.mulf %78, %79 : vector<8x128xf32>
    %81 = math.sin %77 : vector<8x128xf32>
    %82 = arith.mulf %78, %81 : vector<8x128xf32>
    %cst_23 = arith.constant 1.000000e+00 : f32
    %83 = vector.broadcast %cst_23 : f32 to vector<8x128xf32>
    %84 = arith.subf %80, %83 : vector<8x128xf32>
    %85 = arith.mulf %75, %75 : vector<8x128xf32>
    %86 = arith.mulf %77, %77 : vector<8x128xf32>
    %87 = arith.addf %85, %86 : vector<8x128xf32>
    %cst_24 = arith.constant 9.99999997E-7 : f32
    %88 = vector.broadcast %cst_24 : f32 to vector<8x128xf32>
    %89 = arith.cmpf olt, %87, %88 : vector<8x128xf32>
    %cst_25 = arith.constant 1.000000e+00 : f32
    %90 = vector.broadcast %cst_25 : f32 to vector<8x128xf32>
    %91 = arith.select %89, %90, %87 : vector<8x128xi1>, vector<8x128xf32>
    %92 = tpu.reciprocal %91 {approx = true} : vector<8x128xf32> -> vector<8x128xf32>
    %93 = arith.mulf %91, %92 : vector<8x128xf32>
    %cst_26 = arith.constant 2.000000e+00 : f32
    %94 = vector.broadcast %cst_26 : f32 to vector<8x128xf32>
    %95 = arith.subf %94, %93 : vector<8x128xf32>
    %96 = arith.mulf %92, %95 : vector<8x128xf32>
    %cst_27 = arith.constant 5.000000e-01 : f32
    %97 = vector.broadcast %cst_27 : f32 to vector<8x128xf32>
    %98 = arith.mulf %97, %75 : vector<8x128xf32>
    %cst_28 = arith.constant 1.000000e+00 : f32
    %99 = vector.broadcast %cst_28 : f32 to vector<8x128xf32>
    %100 = arith.addf %99, %98 : vector<8x128xf32>
    %101 = arith.mulf %84, %75 : vector<8x128xf32>
    %102 = arith.mulf %82, %77 : vector<8x128xf32>
    %103 = arith.addf %101, %102 : vector<8x128xf32>
    %104 = arith.mulf %103, %96 : vector<8x128xf32>
    %105 = arith.select %89, %100, %104 : vector<8x128xi1>, vector<8x128xf32>
    %cst_29 = arith.constant 5.000000e-01 : f32
    %106 = vector.broadcast %cst_29 : f32 to vector<8x128xf32>
    %107 = arith.mulf %106, %77 : vector<8x128xf32>
    %108 = arith.mulf %82, %75 : vector<8x128xf32>
    %109 = arith.mulf %84, %77 : vector<8x128xf32>
    %110 = arith.subf %108, %109 : vector<8x128xf32>
    %111 = arith.mulf %110, %96 : vector<8x128xf32>
    %112 = arith.select %89, %107, %111 : vector<8x128xi1>, vector<8x128xf32>
    %113 = vector.broadcast %72 : vector<8x1xf32> to vector<8x128xf32>
    %114 = arith.mulf %113, %105 : vector<8x128xf32>
    %115 = vector.broadcast %72 : vector<8x1xf32> to vector<8x128xf32>
    %116 = arith.mulf %115, %112 : vector<8x128xf32>
    %117 = arith.mulf %64, %80 : vector<8x128xf32>
    %118 = arith.mulf %68, %82 : vector<8x128xf32>
    %119 = arith.subf %117, %118 : vector<8x128xf32>
    %120 = arith.addf %119, %114 : vector<8x128xf32>
    %121 = arith.mulf %64, %82 : vector<8x128xf32>
    %122 = arith.mulf %68, %80 : vector<8x128xf32>
    %123 = arith.addf %121, %122 : vector<8x128xf32>
    %124 = arith.addf %123, %116 : vector<8x128xf32>
    %cst_30 = arith.constant dense<0.000000e+00> : vector<8x16xf32>
    %125 = tpu.matmul %120, %9, %cst_30 {dimension_numbers = #tpu.dot_dimension_numbers<[1], [0], [0], [1], [0, 0, 1, 1], [], []>} : vector<8x128xf32>, vector<128x16xf32>, vector<8x16xf32> -> vector<8x16xf32>
    %cst_31 = arith.constant dense<0.000000e+00> : vector<8x16xf32>
    %126 = tpu.matmul %124, %10, %cst_31 {dimension_numbers = #tpu.dot_dimension_numbers<[1], [0], [0], [1], [0, 0, 1, 1], [], []>} : vector<8x128xf32>, vector<128x16xf32>, vector<8x16xf32> -> vector<8x16xf32>
    %127 = arith.addf %125, %126 : vector<8x16xf32>
    %128 = vector.extract_strided_slice %15 {offsets = [0, 2], sizes = [8, 1], strides = [1, 1]} : vector<8x16xf32> to vector<8x1xf32>
    %129 = vector.extract_strided_slice %15 {offsets = [0, 10], sizes = [8, 1], strides = [1, 1]} : vector<8x16xf32> to vector<8x1xf32>
    %130 = vector.broadcast %129 : vector<8x1xf32> to vector<8x128xf32>
    %131 = arith.mulf %130, %5 : vector<8x128xf32>
    %132 = vector.broadcast %129 : vector<8x1xf32> to vector<8x128xf32>
    %133 = arith.mulf %132, %8 : vector<8x128xf32>
    %134 = math.exp %131 : vector<8x128xf32>
    %135 = math.cos %133 : vector<8x128xf32>
    %136 = arith.mulf %134, %135 : vector<8x128xf32>
    %137 = math.sin %133 : vector<8x128xf32>
    %138 = arith.mulf %134, %137 : vector<8x128xf32>
    %cst_32 = arith.constant 1.000000e+00 : f32
    %139 = vector.broadcast %cst_32 : f32 to vector<8x128xf32>
    %140 = arith.subf %136, %139 : vector<8x128xf32>
    %141 = arith.mulf %131, %131 : vector<8x128xf32>
    %142 = arith.mulf %133, %133 : vector<8x128xf32>
    %143 = arith.addf %141, %142 : vector<8x128xf32>
    %cst_33 = arith.constant 9.99999997E-7 : f32
    %144 = vector.broadcast %cst_33 : f32 to vector<8x128xf32>
    %145 = arith.cmpf olt, %143, %144 : vector<8x128xf32>
    %cst_34 = arith.constant 1.000000e+00 : f32
    %146 = vector.broadcast %cst_34 : f32 to vector<8x128xf32>
    %147 = arith.select %145, %146, %143 : vector<8x128xi1>, vector<8x128xf32>
    %148 = tpu.reciprocal %147 {approx = true} : vector<8x128xf32> -> vector<8x128xf32>
    %149 = arith.mulf %147, %148 : vector<8x128xf32>
    %cst_35 = arith.constant 2.000000e+00 : f32
    %150 = vector.broadcast %cst_35 : f32 to vector<8x128xf32>
    %151 = arith.subf %150, %149 : vector<8x128xf32>
    %152 = arith.mulf %148, %151 : vector<8x128xf32>
    %cst_36 = arith.constant 5.000000e-01 : f32
    %153 = vector.broadcast %cst_36 : f32 to vector<8x128xf32>
    %154 = arith.mulf %153, %131 : vector<8x128xf32>
    %cst_37 = arith.constant 1.000000e+00 : f32
    %155 = vector.broadcast %cst_37 : f32 to vector<8x128xf32>
    %156 = arith.addf %155, %154 : vector<8x128xf32>
    %157 = arith.mulf %140, %131 : vector<8x128xf32>
    %158 = arith.mulf %138, %133 : vector<8x128xf32>
    %159 = arith.addf %157, %158 : vector<8x128xf32>
    %160 = arith.mulf %159, %152 : vector<8x128xf32>
    %161 = arith.select %145, %156, %160 : vector<8x128xi1>, vector<8x128xf32>
    %cst_38 = arith.constant 5.000000e-01 : f32
    %162 = vector.broadcast %cst_38 : f32 to vector<8x128xf32>
    %163 = arith.mulf %162, %133 : vector<8x128xf32>
    %164 = arith.mulf %138, %131 : vector<8x128xf32>
    %165 = arith.mulf %140, %133 : vector<8x128xf32>
    %166 = arith.subf %164, %165 : vector<8x128xf32>
    %167 = arith.mulf %166, %152 : vector<8x128xf32>
    %168 = arith.select %145, %163, %167 : vector<8x128xi1>, vector<8x128xf32>
    %169 = vector.broadcast %128 : vector<8x1xf32> to vector<8x128xf32>
    %170 = arith.mulf %169, %161 : vector<8x128xf32>
    %171 = vector.broadcast %128 : vector<8x1xf32> to vector<8x128xf32>
    %172 = arith.mulf %171, %168 : vector<8x128xf32>
    %173 = arith.mulf %120, %136 : vector<8x128xf32>
    %174 = arith.mulf %124, %138 : vector<8x128xf32>
    %175 = arith.subf %173, %174 : vector<8x128xf32>
    %176 = arith.addf %175, %170 : vector<8x128xf32>
    %177 = arith.mulf %120, %138 : vector<8x128xf32>
    %178 = arith.mulf %124, %136 : vector<8x128xf32>
    %179 = arith.addf %177, %178 : vector<8x128xf32>
    %180 = arith.addf %179, %172 : vector<8x128xf32>
    %cst_39 = arith.constant dense<0.000000e+00> : vector<8x16xf32>
    %181 = tpu.matmul %176, %9, %cst_39 {dimension_numbers = #tpu.dot_dimension_numbers<[1], [0], [0], [1], [0, 0, 1, 1], [], []>} : vector<8x128xf32>, vector<128x16xf32>, vector<8x16xf32> -> vector<8x16xf32>
    %cst_40 = arith.constant dense<0.000000e+00> : vector<8x16xf32>
    %182 = tpu.matmul %180, %10, %cst_40 {dimension_numbers = #tpu.dot_dimension_numbers<[1], [0], [0], [1], [0, 0, 1, 1], [], []>} : vector<8x128xf32>, vector<128x16xf32>, vector<8x16xf32> -> vector<8x16xf32>
    %183 = arith.addf %181, %182 : vector<8x16xf32>
    %184 = vector.extract_strided_slice %15 {offsets = [0, 3], sizes = [8, 1], strides = [1, 1]} : vector<8x16xf32> to vector<8x1xf32>
    %185 = vector.extract_strided_slice %15 {offsets = [0, 11], sizes = [8, 1], strides = [1, 1]} : vector<8x16xf32> to vector<8x1xf32>
    %186 = vector.broadcast %185 : vector<8x1xf32> to vector<8x128xf32>
    %187 = arith.mulf %186, %5 : vector<8x128xf32>
    %188 = vector.broadcast %185 : vector<8x1xf32> to vector<8x128xf32>
    %189 = arith.mulf %188, %8 : vector<8x128xf32>
    %190 = math.exp %187 : vector<8x128xf32>
    %191 = math.cos %189 : vector<8x128xf32>
    %192 = arith.mulf %190, %191 : vector<8x128xf32>
    %193 = math.sin %189 : vector<8x128xf32>
    %194 = arith.mulf %190, %193 : vector<8x128xf32>
    %cst_41 = arith.constant 1.000000e+00 : f32
    %195 = vector.broadcast %cst_41 : f32 to vector<8x128xf32>
    %196 = arith.subf %192, %195 : vector<8x128xf32>
    %197 = arith.mulf %187, %187 : vector<8x128xf32>
    %198 = arith.mulf %189, %189 : vector<8x128xf32>
    %199 = arith.addf %197, %198 : vector<8x128xf32>
    %cst_42 = arith.constant 9.99999997E-7 : f32
    %200 = vector.broadcast %cst_42 : f32 to vector<8x128xf32>
    %201 = arith.cmpf olt, %199, %200 : vector<8x128xf32>
    %cst_43 = arith.constant 1.000000e+00 : f32
    %202 = vector.broadcast %cst_43 : f32 to vector<8x128xf32>
    %203 = arith.select %201, %202, %199 : vector<8x128xi1>, vector<8x128xf32>
    %204 = tpu.reciprocal %203 {approx = true} : vector<8x128xf32> -> vector<8x128xf32>
    %205 = arith.mulf %203, %204 : vector<8x128xf32>
    %cst_44 = arith.constant 2.000000e+00 : f32
    %206 = vector.broadcast %cst_44 : f32 to vector<8x128xf32>
    %207 = arith.subf %206, %205 : vector<8x128xf32>
    %208 = arith.mulf %204, %207 : vector<8x128xf32>
    %cst_45 = arith.constant 5.000000e-01 : f32
    %209 = vector.broadcast %cst_45 : f32 to vector<8x128xf32>
    %210 = arith.mulf %209, %187 : vector<8x128xf32>
    %cst_46 = arith.constant 1.000000e+00 : f32
    %211 = vector.broadcast %cst_46 : f32 to vector<8x128xf32>
    %212 = arith.addf %211, %210 : vector<8x128xf32>
    %213 = arith.mulf %196, %187 : vector<8x128xf32>
    %214 = arith.mulf %194, %189 : vector<8x128xf32>
    %215 = arith.addf %213, %214 : vector<8x128xf32>
    %216 = arith.mulf %215, %208 : vector<8x128xf32>
    %217 = arith.select %201, %212, %216 : vector<8x128xi1>, vector<8x128xf32>
    %cst_47 = arith.constant 5.000000e-01 : f32
    %218 = vector.broadcast %cst_47 : f32 to vector<8x128xf32>
    %219 = arith.mulf %218, %189 : vector<8x128xf32>
    %220 = arith.mulf %194, %187 : vector<8x128xf32>
    %221 = arith.mulf %196, %189 : vector<8x128xf32>
    %222 = arith.subf %220, %221 : vector<8x128xf32>
    %223 = arith.mulf %222, %208 : vector<8x128xf32>
    %224 = arith.select %201, %219, %223 : vector<8x128xi1>, vector<8x128xf32>
    %225 = vector.broadcast %184 : vector<8x1xf32> to vector<8x128xf32>
    %226 = arith.mulf %225, %217 : vector<8x128xf32>
    %227 = vector.broadcast %184 : vector<8x1xf32> to vector<8x128xf32>
    %228 = arith.mulf %227, %224 : vector<8x128xf32>
    %229 = arith.mulf %176, %192 : vector<8x128xf32>
    %230 = arith.mulf %180, %194 : vector<8x128xf32>
    %231 = arith.subf %229, %230 : vector<8x128xf32>
    %232 = arith.addf %231, %226 : vector<8x128xf32>
    %233 = arith.mulf %176, %194 : vector<8x128xf32>
    %234 = arith.mulf %180, %192 : vector<8x128xf32>
    %235 = arith.addf %233, %234 : vector<8x128xf32>
    %236 = arith.addf %235, %228 : vector<8x128xf32>
    %cst_48 = arith.constant dense<0.000000e+00> : vector<8x16xf32>
    %237 = tpu.matmul %232, %9, %cst_48 {dimension_numbers = #tpu.dot_dimension_numbers<[1], [0], [0], [1], [0, 0, 1, 1], [], []>} : vector<8x128xf32>, vector<128x16xf32>, vector<8x16xf32> -> vector<8x16xf32>
    %cst_49 = arith.constant dense<0.000000e+00> : vector<8x16xf32>
    %238 = tpu.matmul %236, %10, %cst_49 {dimension_numbers = #tpu.dot_dimension_numbers<[1], [0], [0], [1], [0, 0, 1, 1], [], []>} : vector<8x128xf32>, vector<128x16xf32>, vector<8x16xf32> -> vector<8x16xf32>
    %239 = arith.addf %237, %238 : vector<8x16xf32>
    %240 = vector.extract_strided_slice %15 {offsets = [0, 4], sizes = [8, 1], strides = [1, 1]} : vector<8x16xf32> to vector<8x1xf32>
    %241 = vector.extract_strided_slice %15 {offsets = [0, 12], sizes = [8, 1], strides = [1, 1]} : vector<8x16xf32> to vector<8x1xf32>
    %242 = vector.broadcast %241 : vector<8x1xf32> to vector<8x128xf32>
    %243 = arith.mulf %242, %5 : vector<8x128xf32>
    %244 = vector.broadcast %241 : vector<8x1xf32> to vector<8x128xf32>
    %245 = arith.mulf %244, %8 : vector<8x128xf32>
    %246 = math.exp %243 : vector<8x128xf32>
    %247 = math.cos %245 : vector<8x128xf32>
    %248 = arith.mulf %246, %247 : vector<8x128xf32>
    %249 = math.sin %245 : vector<8x128xf32>
    %250 = arith.mulf %246, %249 : vector<8x128xf32>
    %cst_50 = arith.constant 1.000000e+00 : f32
    %251 = vector.broadcast %cst_50 : f32 to vector<8x128xf32>
    %252 = arith.subf %248, %251 : vector<8x128xf32>
    %253 = arith.mulf %243, %243 : vector<8x128xf32>
    %254 = arith.mulf %245, %245 : vector<8x128xf32>
    %255 = arith.addf %253, %254 : vector<8x128xf32>
    %cst_51 = arith.constant 9.99999997E-7 : f32
    %256 = vector.broadcast %cst_51 : f32 to vector<8x128xf32>
    %257 = arith.cmpf olt, %255, %256 : vector<8x128xf32>
    %cst_52 = arith.constant 1.000000e+00 : f32
    %258 = vector.broadcast %cst_52 : f32 to vector<8x128xf32>
    %259 = arith.select %257, %258, %255 : vector<8x128xi1>, vector<8x128xf32>
    %260 = tpu.reciprocal %259 {approx = true} : vector<8x128xf32> -> vector<8x128xf32>
    %261 = arith.mulf %259, %260 : vector<8x128xf32>
    %cst_53 = arith.constant 2.000000e+00 : f32
    %262 = vector.broadcast %cst_53 : f32 to vector<8x128xf32>
    %263 = arith.subf %262, %261 : vector<8x128xf32>
    %264 = arith.mulf %260, %263 : vector<8x128xf32>
    %cst_54 = arith.constant 5.000000e-01 : f32
    %265 = vector.broadcast %cst_54 : f32 to vector<8x128xf32>
    %266 = arith.mulf %265, %243 : vector<8x128xf32>
    %cst_55 = arith.constant 1.000000e+00 : f32
    %267 = vector.broadcast %cst_55 : f32 to vector<8x128xf32>
    %268 = arith.addf %267, %266 : vector<8x128xf32>
    %269 = arith.mulf %252, %243 : vector<8x128xf32>
    %270 = arith.mulf %250, %245 : vector<8x128xf32>
    %271 = arith.addf %269, %270 : vector<8x128xf32>
    %272 = arith.mulf %271, %264 : vector<8x128xf32>
    %273 = arith.select %257, %268, %272 : vector<8x128xi1>, vector<8x128xf32>
    %cst_56 = arith.constant 5.000000e-01 : f32
    %274 = vector.broadcast %cst_56 : f32 to vector<8x128xf32>
    %275 = arith.mulf %274, %245 : vector<8x128xf32>
    %276 = arith.mulf %250, %243 : vector<8x128xf32>
    %277 = arith.mulf %252, %245 : vector<8x128xf32>
    %278 = arith.subf %276, %277 : vector<8x128xf32>
    %279 = arith.mulf %278, %264 : vector<8x128xf32>
    %280 = arith.select %257, %275, %279 : vector<8x128xi1>, vector<8x128xf32>
    %281 = vector.broadcast %240 : vector<8x1xf32> to vector<8x128xf32>
    %282 = arith.mulf %281, %273 : vector<8x128xf32>
    %283 = vector.broadcast %240 : vector<8x1xf32> to vector<8x128xf32>
    %284 = arith.mulf %283, %280 : vector<8x128xf32>
    %285 = arith.mulf %232, %248 : vector<8x128xf32>
    %286 = arith.mulf %236, %250 : vector<8x128xf32>
    %287 = arith.subf %285, %286 : vector<8x128xf32>
    %288 = arith.addf %287, %282 : vector<8x128xf32>
    %289 = arith.mulf %232, %250 : vector<8x128xf32>
    %290 = arith.mulf %236, %248 : vector<8x128xf32>
    %291 = arith.addf %289, %290 : vector<8x128xf32>
    %292 = arith.addf %291, %284 : vector<8x128xf32>
    %cst_57 = arith.constant dense<0.000000e+00> : vector<8x16xf32>
    %293 = tpu.matmul %288, %9, %cst_57 {dimension_numbers = #tpu.dot_dimension_numbers<[1], [0], [0], [1], [0, 0, 1, 1], [], []>} : vector<8x128xf32>, vector<128x16xf32>, vector<8x16xf32> -> vector<8x16xf32>
    %cst_58 = arith.constant dense<0.000000e+00> : vector<8x16xf32>
    %294 = tpu.matmul %292, %10, %cst_58 {dimension_numbers = #tpu.dot_dimension_numbers<[1], [0], [0], [1], [0, 0, 1, 1], [], []>} : vector<8x128xf32>, vector<128x16xf32>, vector<8x16xf32> -> vector<8x16xf32>
    %295 = arith.addf %293, %294 : vector<8x16xf32>
    %296 = vector.extract_strided_slice %15 {offsets = [0, 5], sizes = [8, 1], strides = [1, 1]} : vector<8x16xf32> to vector<8x1xf32>
    %297 = vector.extract_strided_slice %15 {offsets = [0, 13], sizes = [8, 1], strides = [1, 1]} : vector<8x16xf32> to vector<8x1xf32>
    %298 = vector.broadcast %297 : vector<8x1xf32> to vector<8x128xf32>
    %299 = arith.mulf %298, %5 : vector<8x128xf32>
    %300 = vector.broadcast %297 : vector<8x1xf32> to vector<8x128xf32>
    %301 = arith.mulf %300, %8 : vector<8x128xf32>
    %302 = math.exp %299 : vector<8x128xf32>
    %303 = math.cos %301 : vector<8x128xf32>
    %304 = arith.mulf %302, %303 : vector<8x128xf32>
    %305 = math.sin %301 : vector<8x128xf32>
    %306 = arith.mulf %302, %305 : vector<8x128xf32>
    %cst_59 = arith.constant 1.000000e+00 : f32
    %307 = vector.broadcast %cst_59 : f32 to vector<8x128xf32>
    %308 = arith.subf %304, %307 : vector<8x128xf32>
    %309 = arith.mulf %299, %299 : vector<8x128xf32>
    %310 = arith.mulf %301, %301 : vector<8x128xf32>
    %311 = arith.addf %309, %310 : vector<8x128xf32>
    %cst_60 = arith.constant 9.99999997E-7 : f32
    %312 = vector.broadcast %cst_60 : f32 to vector<8x128xf32>
    %313 = arith.cmpf olt, %311, %312 : vector<8x128xf32>
    %cst_61 = arith.constant 1.000000e+00 : f32
    %314 = vector.broadcast %cst_61 : f32 to vector<8x128xf32>
    %315 = arith.select %313, %314, %311 : vector<8x128xi1>, vector<8x128xf32>
    %316 = tpu.reciprocal %315 {approx = true} : vector<8x128xf32> -> vector<8x128xf32>
    %317 = arith.mulf %315, %316 : vector<8x128xf32>
    %cst_62 = arith.constant 2.000000e+00 : f32
    %318 = vector.broadcast %cst_62 : f32 to vector<8x128xf32>
    %319 = arith.subf %318, %317 : vector<8x128xf32>
    %320 = arith.mulf %316, %319 : vector<8x128xf32>
    %cst_63 = arith.constant 5.000000e-01 : f32
    %321 = vector.broadcast %cst_63 : f32 to vector<8x128xf32>
    %322 = arith.mulf %321, %299 : vector<8x128xf32>
    %cst_64 = arith.constant 1.000000e+00 : f32
    %323 = vector.broadcast %cst_64 : f32 to vector<8x128xf32>
    %324 = arith.addf %323, %322 : vector<8x128xf32>
    %325 = arith.mulf %308, %299 : vector<8x128xf32>
    %326 = arith.mulf %306, %301 : vector<8x128xf32>
    %327 = arith.addf %325, %326 : vector<8x128xf32>
    %328 = arith.mulf %327, %320 : vector<8x128xf32>
    %329 = arith.select %313, %324, %328 : vector<8x128xi1>, vector<8x128xf32>
    %cst_65 = arith.constant 5.000000e-01 : f32
    %330 = vector.broadcast %cst_65 : f32 to vector<8x128xf32>
    %331 = arith.mulf %330, %301 : vector<8x128xf32>
    %332 = arith.mulf %306, %299 : vector<8x128xf32>
    %333 = arith.mulf %308, %301 : vector<8x128xf32>
    %334 = arith.subf %332, %333 : vector<8x128xf32>
    %335 = arith.mulf %334, %320 : vector<8x128xf32>
    %336 = arith.select %313, %331, %335 : vector<8x128xi1>, vector<8x128xf32>
    %337 = vector.broadcast %296 : vector<8x1xf32> to vector<8x128xf32>
    %338 = arith.mulf %337, %329 : vector<8x128xf32>
    %339 = vector.broadcast %296 : vector<8x1xf32> to vector<8x128xf32>
    %340 = arith.mulf %339, %336 : vector<8x128xf32>
    %341 = arith.mulf %288, %304 : vector<8x128xf32>
    %342 = arith.mulf %292, %306 : vector<8x128xf32>
    %343 = arith.subf %341, %342 : vector<8x128xf32>
    %344 = arith.addf %343, %338 : vector<8x128xf32>
    %345 = arith.mulf %288, %306 : vector<8x128xf32>
    %346 = arith.mulf %292, %304 : vector<8x128xf32>
    %347 = arith.addf %345, %346 : vector<8x128xf32>
    %348 = arith.addf %347, %340 : vector<8x128xf32>
    %cst_66 = arith.constant dense<0.000000e+00> : vector<8x16xf32>
    %349 = tpu.matmul %344, %9, %cst_66 {dimension_numbers = #tpu.dot_dimension_numbers<[1], [0], [0], [1], [0, 0, 1, 1], [], []>} : vector<8x128xf32>, vector<128x16xf32>, vector<8x16xf32> -> vector<8x16xf32>
    %cst_67 = arith.constant dense<0.000000e+00> : vector<8x16xf32>
    %350 = tpu.matmul %348, %10, %cst_67 {dimension_numbers = #tpu.dot_dimension_numbers<[1], [0], [0], [1], [0, 0, 1, 1], [], []>} : vector<8x128xf32>, vector<128x16xf32>, vector<8x16xf32> -> vector<8x16xf32>
    %351 = arith.addf %349, %350 : vector<8x16xf32>
    %352 = vector.extract_strided_slice %15 {offsets = [0, 6], sizes = [8, 1], strides = [1, 1]} : vector<8x16xf32> to vector<8x1xf32>
    %353 = vector.extract_strided_slice %15 {offsets = [0, 14], sizes = [8, 1], strides = [1, 1]} : vector<8x16xf32> to vector<8x1xf32>
    %354 = vector.broadcast %353 : vector<8x1xf32> to vector<8x128xf32>
    %355 = arith.mulf %354, %5 : vector<8x128xf32>
    %356 = vector.broadcast %353 : vector<8x1xf32> to vector<8x128xf32>
    %357 = arith.mulf %356, %8 : vector<8x128xf32>
    %358 = math.exp %355 : vector<8x128xf32>
    %359 = math.cos %357 : vector<8x128xf32>
    %360 = arith.mulf %358, %359 : vector<8x128xf32>
    %361 = math.sin %357 : vector<8x128xf32>
    %362 = arith.mulf %358, %361 : vector<8x128xf32>
    %cst_68 = arith.constant 1.000000e+00 : f32
    %363 = vector.broadcast %cst_68 : f32 to vector<8x128xf32>
    %364 = arith.subf %360, %363 : vector<8x128xf32>
    %365 = arith.mulf %355, %355 : vector<8x128xf32>
    %366 = arith.mulf %357, %357 : vector<8x128xf32>
    %367 = arith.addf %365, %366 : vector<8x128xf32>
    %cst_69 = arith.constant 9.99999997E-7 : f32
    %368 = vector.broadcast %cst_69 : f32 to vector<8x128xf32>
    %369 = arith.cmpf olt, %367, %368 : vector<8x128xf32>
    %cst_70 = arith.constant 1.000000e+00 : f32
    %370 = vector.broadcast %cst_70 : f32 to vector<8x128xf32>
    %371 = arith.select %369, %370, %367 : vector<8x128xi1>, vector<8x128xf32>
    %372 = tpu.reciprocal %371 {approx = true} : vector<8x128xf32> -> vector<8x128xf32>
    %373 = arith.mulf %371, %372 : vector<8x128xf32>
    %cst_71 = arith.constant 2.000000e+00 : f32
    %374 = vector.broadcast %cst_71 : f32 to vector<8x128xf32>
    %375 = arith.subf %374, %373 : vector<8x128xf32>
    %376 = arith.mulf %372, %375 : vector<8x128xf32>
    %cst_72 = arith.constant 5.000000e-01 : f32
    %377 = vector.broadcast %cst_72 : f32 to vector<8x128xf32>
    %378 = arith.mulf %377, %355 : vector<8x128xf32>
    %cst_73 = arith.constant 1.000000e+00 : f32
    %379 = vector.broadcast %cst_73 : f32 to vector<8x128xf32>
    %380 = arith.addf %379, %378 : vector<8x128xf32>
    %381 = arith.mulf %364, %355 : vector<8x128xf32>
    %382 = arith.mulf %362, %357 : vector<8x128xf32>
    %383 = arith.addf %381, %382 : vector<8x128xf32>
    %384 = arith.mulf %383, %376 : vector<8x128xf32>
    %385 = arith.select %369, %380, %384 : vector<8x128xi1>, vector<8x128xf32>
    %cst_74 = arith.constant 5.000000e-01 : f32
    %386 = vector.broadcast %cst_74 : f32 to vector<8x128xf32>
    %387 = arith.mulf %386, %357 : vector<8x128xf32>
    %388 = arith.mulf %362, %355 : vector<8x128xf32>
    %389 = arith.mulf %364, %357 : vector<8x128xf32>
    %390 = arith.subf %388, %389 : vector<8x128xf32>
    %391 = arith.mulf %390, %376 : vector<8x128xf32>
    %392 = arith.select %369, %387, %391 : vector<8x128xi1>, vector<8x128xf32>
    %393 = vector.broadcast %352 : vector<8x1xf32> to vector<8x128xf32>
    %394 = arith.mulf %393, %385 : vector<8x128xf32>
    %395 = vector.broadcast %352 : vector<8x1xf32> to vector<8x128xf32>
    %396 = arith.mulf %395, %392 : vector<8x128xf32>
    %397 = arith.mulf %344, %360 : vector<8x128xf32>
    %398 = arith.mulf %348, %362 : vector<8x128xf32>
    %399 = arith.subf %397, %398 : vector<8x128xf32>
    %400 = arith.addf %399, %394 : vector<8x128xf32>
    %401 = arith.mulf %344, %362 : vector<8x128xf32>
    %402 = arith.mulf %348, %360 : vector<8x128xf32>
    %403 = arith.addf %401, %402 : vector<8x128xf32>
    %404 = arith.addf %403, %396 : vector<8x128xf32>
    %cst_75 = arith.constant dense<0.000000e+00> : vector<8x16xf32>
    %405 = tpu.matmul %400, %9, %cst_75 {dimension_numbers = #tpu.dot_dimension_numbers<[1], [0], [0], [1], [0, 0, 1, 1], [], []>} : vector<8x128xf32>, vector<128x16xf32>, vector<8x16xf32> -> vector<8x16xf32>
    %cst_76 = arith.constant dense<0.000000e+00> : vector<8x16xf32>
    %406 = tpu.matmul %404, %10, %cst_76 {dimension_numbers = #tpu.dot_dimension_numbers<[1], [0], [0], [1], [0, 0, 1, 1], [], []>} : vector<8x128xf32>, vector<128x16xf32>, vector<8x16xf32> -> vector<8x16xf32>
    %407 = arith.addf %405, %406 : vector<8x16xf32>
    %408 = vector.extract_strided_slice %15 {offsets = [0, 7], sizes = [8, 1], strides = [1, 1]} : vector<8x16xf32> to vector<8x1xf32>
    %409 = vector.extract_strided_slice %15 {offsets = [0, 15], sizes = [8, 1], strides = [1, 1]} : vector<8x16xf32> to vector<8x1xf32>
    %410 = vector.broadcast %409 : vector<8x1xf32> to vector<8x128xf32>
    %411 = arith.mulf %410, %5 : vector<8x128xf32>
    %412 = vector.broadcast %409 : vector<8x1xf32> to vector<8x128xf32>
    %413 = arith.mulf %412, %8 : vector<8x128xf32>
    %414 = math.exp %411 : vector<8x128xf32>
    %415 = math.cos %413 : vector<8x128xf32>
    %416 = arith.mulf %414, %415 : vector<8x128xf32>
    %417 = math.sin %413 : vector<8x128xf32>
    %418 = arith.mulf %414, %417 : vector<8x128xf32>
    %cst_77 = arith.constant 1.000000e+00 : f32
    %419 = vector.broadcast %cst_77 : f32 to vector<8x128xf32>
    %420 = arith.subf %416, %419 : vector<8x128xf32>
    %421 = arith.mulf %411, %411 : vector<8x128xf32>
    %422 = arith.mulf %413, %413 : vector<8x128xf32>
    %423 = arith.addf %421, %422 : vector<8x128xf32>
    %cst_78 = arith.constant 9.99999997E-7 : f32
    %424 = vector.broadcast %cst_78 : f32 to vector<8x128xf32>
    %425 = arith.cmpf olt, %423, %424 : vector<8x128xf32>
    %cst_79 = arith.constant 1.000000e+00 : f32
    %426 = vector.broadcast %cst_79 : f32 to vector<8x128xf32>
    %427 = arith.select %425, %426, %423 : vector<8x128xi1>, vector<8x128xf32>
    %428 = tpu.reciprocal %427 {approx = true} : vector<8x128xf32> -> vector<8x128xf32>
    %429 = arith.mulf %427, %428 : vector<8x128xf32>
    %cst_80 = arith.constant 2.000000e+00 : f32
    %430 = vector.broadcast %cst_80 : f32 to vector<8x128xf32>
    %431 = arith.subf %430, %429 : vector<8x128xf32>
    %432 = arith.mulf %428, %431 : vector<8x128xf32>
    %cst_81 = arith.constant 5.000000e-01 : f32
    %433 = vector.broadcast %cst_81 : f32 to vector<8x128xf32>
    %434 = arith.mulf %433, %411 : vector<8x128xf32>
    %cst_82 = arith.constant 1.000000e+00 : f32
    %435 = vector.broadcast %cst_82 : f32 to vector<8x128xf32>
    %436 = arith.addf %435, %434 : vector<8x128xf32>
    %437 = arith.mulf %420, %411 : vector<8x128xf32>
    %438 = arith.mulf %418, %413 : vector<8x128xf32>
    %439 = arith.addf %437, %438 : vector<8x128xf32>
    %440 = arith.mulf %439, %432 : vector<8x128xf32>
    %441 = arith.select %425, %436, %440 : vector<8x128xi1>, vector<8x128xf32>
    %cst_83 = arith.constant 5.000000e-01 : f32
    %442 = vector.broadcast %cst_83 : f32 to vector<8x128xf32>
    %443 = arith.mulf %442, %413 : vector<8x128xf32>
    %444 = arith.mulf %418, %411 : vector<8x128xf32>
    %445 = arith.mulf %420, %413 : vector<8x128xf32>
    %446 = arith.subf %444, %445 : vector<8x128xf32>
    %447 = arith.mulf %446, %432 : vector<8x128xf32>
    %448 = arith.select %425, %443, %447 : vector<8x128xi1>, vector<8x128xf32>
    %449 = vector.broadcast %408 : vector<8x1xf32> to vector<8x128xf32>
    %450 = arith.mulf %449, %441 : vector<8x128xf32>
    %451 = vector.broadcast %408 : vector<8x1xf32> to vector<8x128xf32>
    %452 = arith.mulf %451, %448 : vector<8x128xf32>
    %453 = arith.mulf %400, %416 : vector<8x128xf32>
    %454 = arith.mulf %404, %418 : vector<8x128xf32>
    %455 = arith.subf %453, %454 : vector<8x128xf32>
    %456 = arith.addf %455, %450 : vector<8x128xf32>
    %457 = arith.mulf %400, %418 : vector<8x128xf32>
    %458 = arith.mulf %404, %416 : vector<8x128xf32>
    %459 = arith.addf %457, %458 : vector<8x128xf32>
    %460 = arith.addf %459, %452 : vector<8x128xf32>
    %cst_84 = arith.constant dense<0.000000e+00> : vector<8x16xf32>
    %461 = tpu.matmul %456, %9, %cst_84 {dimension_numbers = #tpu.dot_dimension_numbers<[1], [0], [0], [1], [0, 0, 1, 1], [], []>} : vector<8x128xf32>, vector<128x16xf32>, vector<8x16xf32> -> vector<8x16xf32>
    %cst_85 = arith.constant dense<0.000000e+00> : vector<8x16xf32>
    %462 = tpu.matmul %460, %10, %cst_85 {dimension_numbers = #tpu.dot_dimension_numbers<[1], [0], [0], [1], [0, 0, 1, 1], [], []>} : vector<8x128xf32>, vector<128x16xf32>, vector<8x16xf32> -> vector<8x16xf32>
    %463 = arith.addf %461, %462 : vector<8x16xf32>
    %464 = tpu.concatenate %71, %127, %183, %239, %295, %351, %407, %463 in 1 : vector<8x16xf32>, vector<8x16xf32>, vector<8x16xf32>, vector<8x16xf32>, vector<8x16xf32>, vector<8x16xf32>, vector<8x16xf32>, vector<8x16xf32> -> vector<8x128xf32>
    %465 = arith.index_cast %c0_i32_12 : i32 to index
    %c0_86 = arith.constant 0 : index
    %c0_87 = arith.constant 0 : index
    %466 = vector.load %arg9[%465, %c0_86, %c0_87] : memref<1x8x128xf32, #tpu.memory_space<vmem>>, vector<1x8x128xf32>
    %467 = vector.shape_cast %466 : vector<1x8x128xf32> to vector<8x128xf32>
    %468 = vector.shape_cast %464 : vector<8x128xf32> to vector<1x8x128xf32>
    tpu.vector_store %arg9[%465, %c0_86, %c0_87], %468 {strides = array<i32>} : memref<1x8x128xf32, #tpu.memory_space<vmem>>, vector<1x8x128xf32>,
    %c1_i32 = arith.constant 1 : i32
    %c0_88 = arith.constant 0 : index
    %c0_89 = arith.constant 0 : index
    %469 = vector.load %arg10[%c0_88, %c0_89] : memref<8x128xf32, #tpu.memory_space<vmem>>, vector<8x128xf32>
    tpu.vector_store %arg10[%c0_88, %c0_89], %456 {strides = array<i32>} : memref<8x128xf32, #tpu.memory_space<vmem>>, vector<8x128xf32>,
    %c0_90 = arith.constant 0 : index
    %c0_91 = arith.constant 0 : index
    %470 = vector.load %arg11[%c0_90, %c0_91] : memref<8x128xf32, #tpu.memory_space<vmem>>, vector<8x128xf32>
    tpu.vector_store %arg11[%c0_90, %c0_91], %460 {strides = array<i32>} : memref<8x128xf32, #tpu.memory_space<vmem>>, vector<8x128xf32>,
    return
  }
  func.func @transform_0(%arg0: i32, %arg1: i32) -> (i32, i32, i32) {
    %c0_i32 = arith.constant 0 : i32
    %c0_i32_0 = arith.constant 0 : i32
    return %arg1, %arg0, %c0_i32 : i32, i32, i32
  }
  func.func @transform_1(%arg0: i32, %arg1: i32) -> (i32, i32) {
    %c0_i32 = arith.constant 0 : i32
    %c0_i32_0 = arith.constant 0 : i32
    %c0_i32_1 = arith.constant 0 : i32
    return %c0_i32, %c0_i32_0 : i32, i32
  }
  func.func @transform_2(%arg0: i32, %arg1: i32) -> (i32, i32) {
    %c0_i32 = arith.constant 0 : i32
    %c0_i32_0 = arith.constant 0 : i32
    %c0_i32_1 = arith.constant 0 : i32
    return %c0_i32, %c0_i32_0 : i32, i32
  }
  func.func @transform_3(%arg0: i32, %arg1: i32) -> (i32, i32) {
    %c0_i32 = arith.constant 0 : i32
    %c0_i32_0 = arith.constant 0 : i32
    %c0_i32_1 = arith.constant 0 : i32
    return %c0_i32, %c0_i32_0 : i32, i32
  }
  func.func @transform_4(%arg0: i32, %arg1: i32) -> (i32, i32) {
    %c0_i32 = arith.constant 0 : i32
    %c0_i32_0 = arith.constant 0 : i32
    %c0_i32_1 = arith.constant 0 : i32
    return %c0_i32, %c0_i32_0 : i32, i32
  }
  func.func @transform_5(%arg0: i32, %arg1: i32) -> (i32, i32) {
    %c0_i32 = arith.constant 0 : i32
    %c0_i32_0 = arith.constant 0 : i32
    return %arg0, %c0_i32 : i32, i32
  }
  func.func @transform_6(%arg0: i32, %arg1: i32) -> (i32, i32) {
    %c0_i32 = arith.constant 0 : i32
    %c0_i32_0 = arith.constant 0 : i32
    return %arg0, %c0_i32 : i32, i32
  }
  func.func @transform_7(%arg0: i32, %arg1: i32) -> (i32, i32, i32) {
    %c0_i32 = arith.constant 0 : i32
    %c0_i32_0 = arith.constant 0 : i32
    return %arg1, %arg0, %c0_i32 : i32, i32, i32
  }
  func.func @transform_8(%arg0: i32, %arg1: i32) -> (i32, i32) {
    %c0_i32 = arith.constant 0 : i32
    %c0_i32_0 = arith.constant 0 : i32
    return %arg0, %c0_i32 : i32, i32
  }
  func.func @transform_9(%arg0: i32, %arg1: i32) -> (i32, i32) {
    %c0_i32 = arith.constant 0 : i32
    %c0_i32_0 = arith.constant 0 : i32
    return %arg0, %c0_i32 : i32, i32
  }
}

</mosaic_0001>

<bundles_post_ra>
// kernel: tpu_custom_call.1
= control target key start
LH: loop header
LB: loop body
LE: loop exit
PB: predicated region body
PF: predicated region fallthrough
CT: control target
= control target key end

     0   :  { %15 = vsyncpa [#allocation3], 0  ;;  %s7006_s0 = inlined_call_operand.vmem [shape: f32[1,8,16], index: 0, kind: input, shape index: {}]   ;;  %s7007_s1 = inlined_call_operand.vmem [shape: f32[1,128], index: 1, kind: input, shape index: {}]   ;;  %s7008_s2 = inlined_call_operand.vmem [shape: f32[1,128], index: 2, kind: input, shape index: {}]   ;;  %s7009_s3 = inlined_call_operand.vmem [shape: f32[128,16], index: 3, kind: input, shape index: {}]   ;;  %s7010_s4 = inlined_call_operand.vmem [shape: f32[128,16], index: 4, kind: input, shape index: {}]   ;;  %s7011_s5 = inlined_call_operand.hbm [shape: f32[8,128], index: 5, kind: input, shape index: {}, may-alias: {5,8}]   ;;  %s7012_s6 = inlined_call_operand.hbm [shape: f32[8,128], index: 6, kind: input, shape index: {}, may-alias: {6,9}]   ;;  %s7013_s7 = inlined_call_operand.hbm [shape: f32[1,8,128], index: 7, kind: output, shape index: {0}]   ;;  %s7014_s8 = inlined_call_operand.hbm [shape: f32[8,128], index: 8, kind: output, shape index: {1}, may-alias: {5,8}]   ;;  %s7015_s9 = inlined_call_operand.hbm [shape: f32[8,128], index: 9, kind: output, shape index: {2}, may-alias: {6,9}]  }
   0x1   :  { %16 = vsyncpa [#allocation6], 0 }
   0x2   :  { %17 = vsyncpa [#allocation4], 0 }
   0x3   :  { %18 = vsyncpa [#allocation9], 0  ;;  %s4565_s30 = smov [#allocation2]   ;;  %s4566_s11 = smov [#allocation5]  }
   0x4   :  { %s35_s10 = sshll.u32 %s4565_s30, 4  ;;  %s45_s12 = sshll.u32 %s4566_s11, 4  ;;  %s36_s10 = int_to_ptr.vmem [resolvable:$true] %s35_s10  ;;  %s46_s12 = int_to_ptr.vmem [resolvable:$true] %s45_s12 }
   0x5   :  { %s4465_s13 = scalar_lea.vmem %s36_s10, 128  ;;  %p4470_p1 = scmp.lt.s32.totalorder %s36_s10, %s36_s10 }
   0x6   :  { %p4466_p0 = scmp.ne.s32.totalorder %s36_s10, %s4465_s13  ;;  %p4471_p2 = scmp.lt.s32.totalorder %s4465_s13, %s4465_s13 }
   0x8   :  { %p4472_p3 = por %p4471_p2, %p4470_p1 }
   0xa   :  { %p4473_p4 = pnand %p4472_p3, %p4466_p0 }
   0xc   :  { %4476 = shalt.err (!%p4473_p4)
}
   0xd   :  { %38 = dma.hbm_to_vmem [thread:$0]  %s7011_s5, 128, %s36_s10, [#allocation3]  }
   0xe   :  { %s4485_s16 = scalar_lea.vmem %s46_s12, 128  ;;  %p4490_p6 = scmp.lt.s32.totalorder %s46_s12, %s46_s12 }
   0xf   :  { %p4486_p5 = scmp.ne.s32.totalorder %s46_s12, %s4485_s16  ;;  %p4491_p7 = scmp.lt.s32.totalorder %s4485_s16, %s4485_s16 }
  0x11   :  { %p4492_p8 = por %p4491_p7, %p4490_p6 }
  0x13   :  { %p4493_p9 = pnand %p4492_p8, %p4486_p5 }
  0x15   :  { %4496 = shalt.err (!%p4493_p9)
}
  0x16   :  { %48 = dma.hbm_to_vmem [thread:$0]  %s7012_s6, 128, %s46_s12, [#allocation6]  }
  0x17   :  { %4557 = dma.done.wait [#allocation3], 128  }
  0x18   :  { %4558 = vsyncadd [#allocation3], 4294967168 }
  0x19   :  { %4559 = dma.done.wait [#allocation6], 128  }
  0x1a   :  { %4560 = vsyncadd [#allocation6], 4294967168  ;;  %v4567_v0 = vmov 10   ;;  %v4568_v1 = vmov 8   ;;  %v111_v2 = vld [vmem:[%s7006_s0] sm:$0xff]  ;;  %v4569_v3 = vmov 0  }
  0x1b   :  { %4329 = vset.pattern.permute.xlu1 %v4567_v0  ;;  %4327 = vset.pattern.permute.xlu0 %v4568_v1  ;;  %v4570_v4 = vmov 9   ;;  %v4571_v5 = vmov 11   ;;  %v4572_v6 = vmov 1   ;;  %v4573_v7 = vmov 12   ;;  %v4663_v17 = vld [vmem:[%s7008_s2] ss:$0 sm:$0xff] }
  0x1c   :  { %902 = vperm.xlu1 %4329, %v111_v2   ;;  %114 = vperm.xlu0 %4327, %v111_v2   ;;  %v4574_v8 = vmov 13   ;;  %v4575_v9 = vmov 2   ;;  %v4576_v10 = vmov 15   ;;  %v4577_v11 = vmov 3   ;;  %v4671_v20 = vld [vmem:[%s7007_s1] ss:$0 sm:$0xff] }
  0x1d   :  { %v4578_v12 = vmov 6   ;;  %v4579_v13 = vmov 14   ;;  %v4580_v14 = vmov 7   ;;  %v4581_v15 = vmov 4   ;;  %s4593_s11 = smov 48   ;;  %s4594_s12 = smov 64  }
  0x1e   :  { %v4582_v16 = vmov 5   ;;  %v7031_v42 = vmov 683565275   ;;  %v7026_v44 = vmov 2475754826   ;;  %s4595_s13 = smov 80  }
  0x1f   :  { %v7024_v48 = vmov 2131351028   ;;  %v7022_v51 = vmov 2102212464   ;;  %v7020_v54 = vmov 920167782  }
  0x20   :  { %4330 = vset.pattern.permute.xlu1 %v4569_v3  ;;  %4328 = vset.pattern.permute.xlu0 %v4570_v4  ;;  %v7018_v57 = vmov 1326507024   ;;  %s4596_s14 = smov 96   ;;  %s4597_s15 = smov [#allocation8]  }
  0x21   :  { %354 = vperm.xlu1 %4330, %v111_v2   ;;  %508 = vperm.xlu0 %4328, %v111_v2   ;;  %s3326_s16 = sshll.u32 %s4597_s15, 4  ;;  %s3327_s16 = int_to_ptr.vmem [resolvable:$true] %s3326_s16 }
  0x22   :  { %s4497_s17 = scalar_lea.vmem %s3327_s16, 128  ;;  %p4502_p11 = scmp.lt.s32.totalorder %s3327_s16, %s3327_s16 }
  0x23   :  { %p4498_p10 = scmp.ne.s32.totalorder %s3327_s16, %s4497_s17  ;;  %p4503_p12 = scmp.lt.s32.totalorder %s4497_s17, %s4497_s17 }
  0x25   :  { %4331 = vset.pattern.permute.xlu1 %v4571_v5  ;;  %4332 = vset.pattern.permute.xlu0 %v4572_v6  ;;  %p4504_p13 = por %p4503_p12, %p4502_p11 }
  0x26   :  { %1296 = vperm.xlu1 %4331, %v111_v2   ;;  %748 = vperm.xlu0 %4332, %v111_v2  }
  0x27   :  { %p4505_p0 = pnand %p4504_p13, %p4498_p10 }
  0x2a   :  { %4333 = vset.pattern.permute.xlu1 %v4573_v7  ;;  %4335 = vset.pattern.permute.xlu0 %v4574_v8 }
  0x2b   :  { %1690 = vperm.xlu1 %4333, %v111_v2   ;;  %2084 = vperm.xlu0 %4335, %v111_v2  }
  0x2f   :  { %4334 = vset.pattern.permute.xlu1 %v4575_v9  ;;  %4338 = vset.pattern.permute.xlu0 %v4576_v10 }
  0x30   :  { %1142 = vperm.xlu1 %4334, %v111_v2   ;;  %2872 = vperm.xlu0 %4338, %v111_v2  }
  0x34   :  { %4336 = vset.pattern.permute.xlu1 %v4577_v11  ;;  %4341 = vset.pattern.permute.xlu0 %v4578_v12 }
  0x35   :  { %1536 = vperm.xlu1 %4336, %v111_v2   ;;  %2718 = vperm.xlu0 %4341, %v111_v2  }
  0x39   :  { %4337 = vset.pattern.permute.xlu1 %v4579_v13  ;;  %4343 = vset.pattern.permute.xlu0 %v4580_v14 }
  0x3a   :  { %2478 = vperm.xlu1 %4337, %v111_v2  }
  0x3e   :  { %4339 = vset.pattern.permute.xlu1 %v4581_v15 }
  0x3f   :  { %1930 = vperm.xlu1 %4339, %v111_v2  }
  0x43   :  { %4340 = vset.pattern.permute.xlu1 %v4582_v16 }
  0x44   :  { %2324 = vperm.xlu1 %4340, %v111_v2  }
  0x48   :  { %4342 = vset.pattern.permute.xlu1 %v4580_v14 }
  0x49   :  { %3112 = vperm.xlu1 %4342, %v111_v2  }
  0x97   :  { %v115_v18 = vpop.permute.xlu0 %114  ;;  %v4691_v33 = vpop.permute.xlu1 %902 }
  0x98   :  { %v4666_v19 = vmul.f32 %v4663_v17, %v115_v18  ;;  %v4676_v23 = vmul.f32 %v4671_v20, %v115_v18  ;;  %v4697_v38 = vmul.f32 %v4663_v17, %v4691_v33 }
  0x9a   :  { %v124_v21 = vand.u32 2139095040, %v4666_v19  ;;  %v121_v22 = vand.u32 2147483647, %v4666_v19  ;;  %v331_v30 = vmul.f32 %v4676_v23, %v4676_v23  ;;  %v332_v31 = vmul.f32 %v4666_v19, %v4666_v19 }
  0x9b   :  { %vm123_vm12 = vcmp.lt.s32.totalorder %v4666_v19, 0 }
  0x9c   :  { %v125_v24 = vshrl.u32 %v124_v21, 23  ;;  %v4678_v25 = vpop.permute.xlu0 %508  ;;  %v128_v28 = vand.u32 8388607, %v121_v22  ;;  %v4693_v37 = vadd.f32 %v332_v31, %v331_v30  ;;  %vm4814_vm15 = vcmp.le.f32.partialorder %v121_v22, 0.7853982 }
  0x9d   :  { %v4682_v27 = vmul.f32 %v4663_v17, %v4678_v25 }
  0x9e   :  { %v3355_v26 = vadd.s32 4294967169, %v125_v24  ;;  %v129_v34 = vor.u32 8388608, %v128_v28  ;;  %vm334_vm1 = vcmp.lt.f32.partialorder %v4693_v37, 1e-06  ;;  %v912_v24 = vand.u32 2139095040, %v4697_v38 }
  0x9f   :  { %v518_v32 = vand.u32 2139095040, %v4682_v27  ;;  %v515_v4 = vand.u32 2147483647, %v4682_v27  ;;  %v4723_v28 = vsel %vm334_vm1, 1.0, %v4693_v37 }
  0xa0   :  { %v131_v29 = vadd.s32 1, %v3355_v26  ;;  %v169_v46 = vshll.u32 %v129_v34, 8  ;;  %4344 = vrcp.f32 %v4723_v28 }
  0xa1   :  { %v519_v39 = vshrl.u32 %v518_v32, 23 }
  0xa2   :  { %vm132_vm0 = vcmp.gt.s32.totalorder %v131_v29, 0 }
  0xa3   :  { %v133_v35 = vsel %vm132_vm0, %v131_v29, 0  ;;  %v3364_v59 = vadd.s32 4294967169, %v519_v39  ;;  %v522_v29 = vand.u32 8388607, %v515_v4  ;;  %v4732_v39 = vmul.f32 %v4671_v20, %v4678_v25 }
  0xa4   :  { %v135_v36 = vand.u32 31, %v133_v35  ;;  %v134_v41 = vshrl.u32 %v133_v35, 5 }
  0xa5   :  { %v525_v8 = vadd.s32 1, %v3364_v59 }
  0xa6   :  { %v136_v40 = vsub.s32 32, %v135_v36  ;;  %v138_v43 = vshll.u32 %v7031_v42, %v135_v36  ;;  %v141_v45 = vshll.u32 %v7026_v44, %v135_v36  ;;  %v144_v50 = vshll.u32 %v7024_v48, %v135_v36 }
  0xa7   :  { %v147_v53 = vshll.u32 %v7022_v51, %v135_v36  ;;  %v150_v56 = vshll.u32 %v7020_v54, %v135_v36  ;;  %vm153_vm2 = vcmp.lt.s32.totalorder %v134_v41, 1  ;;  %vm156_vm3 = vcmp.lt.s32.totalorder %v134_v41, 4 }
  0xa8   :  { %v139_v47 = vshrl.u32 %v7026_v44, %v136_v40  ;;  %v142_v49 = vshrl.u32 %v7024_v48, %v136_v40  ;;  %v145_v52 = vshrl.u32 %v7022_v51, %v136_v40  ;;  %v148_v55 = vshrl.u32 %v7020_v54, %v136_v40 }
  0xa9   :  { %v151_v58 = vshrl.u32 %v7018_v57, %v136_v40  ;;  %v137_v5 = vshrl.u32 %v7031_v42, %v136_v40  ;;  %vm155_vm4 = vcmp.lt.s32.totalorder %v134_v41, 3  ;;  %vm154_vm5 = vcmp.lt.s32.totalorder %v134_v41, 2  ;;  %v4734_v40 = vpop.permute.xlu1 %354 }
  0xaa   :  { %v140_v60 = vor.u32 %v139_v47, %v138_v43  ;;  %v143_v61 = vor.u32 %v142_v49, %v141_v45  ;;  %v146_v62 = vor.u32 %v145_v52, %v144_v50  ;;  %v149_v63 = vor.u32 %v148_v55, %v147_v53 }
  0xab   :  { %v152_v0 = vor.u32 %v151_v58, %v150_v56  ;;  %vm526_vm6 = vcmp.gt.s32.totalorder %v525_v8, 0  ;;  %v913_v36 = vshrl.u32 %v912_v24, 23  ;;  %v523_v45 = vor.u32 8388608, %v522_v29 }
  0xac   :  { %v158_v1 = vsel %vm156_vm3, %v146_v62, 2102212464  ;;  %v161_v2 = vsel %vm153_vm2, %v140_v60, %v143_v61  ;;  %v165_v3 = vsel %vm153_vm2, %v143_v61, %v146_v62  ;;  %v162_v6 = vsel %vm156_vm3, %v149_v63, 920167782 }
  0xad   :  { %v166_v7 = vsel %vm156_vm3, %v152_v0, 1326507024  ;;  %v163_v9 = vsel %vm155_vm4, %v146_v62, %v162_v6  ;;  %v157_v11 = vsel %vm153_vm2, %v137_v5, %v140_v60  ;;  %v159_v12 = vsel %vm155_vm4, %v143_v61, %v158_v1  ;;  %v4750_v0 = vpop.permute.xlu1 %1296 }
  0xae   :  { %v167_v10 = vsel %vm155_vm4, %v149_v63, %v166_v7  ;;  %v164_v13 = vsel %vm154_vm5, %v161_v2, %v163_v9  ;;  %v160_v26 = vsel %vm154_vm5, %v157_v11, %v159_v12  ;;  %v527_v30 = vsel %vm526_vm6, %v525_v8, 0 }
  0xaf   :  { %v168_v14 = vsel %vm154_vm5, %v165_v3, %v167_v10  ;;  %v4715_v18 = vmul.u32.u64.low %v169_v46, %v164_v13  ;;  %v4716_v21 = vmul.u32.u64.high %v169_v46, %v164_v13, %v4715_v18  ;;  %v176_v32 = vmul.u32 %v169_v46, %v160_v26 }
  0xb0   :  { %v4712_v15 = vmul.u32.u64.low %v169_v46, %v168_v14  ;;  %v4713_v16 = vmul.u32.u64.high %v169_v46, %v168_v14, %v4712_v15  ;;  %v528_v34 = vshrl.u32 %v527_v30, 5  ;;  %v529_v35 = vand.u32 31, %v527_v30 }
  0xb1   :  { %v179_v31 = vadd.s32 1, %v4716_v21  ;;  %v563_v8 = vshll.u32 %v523_v45, 8  ;;  %v3373_v13 = vadd.s32 4294967169, %v913_v36  ;;  %v4760_v15 = vmul.f32 %v4663_v17, %v4750_v0 }
  0xb2   :  { %vm178_vm7 = vc.u32 %v4713_v16, %v4715_v18  ;;  %v530_v47 = vsub.s32 32, %v529_v35  ;;  %v532_v49 = vshll.u32 %v7031_v42, %v529_v35  ;;  %v535_v46 = vshll.u32 %v7026_v44, %v529_v35 }
  0xb3   :  { %v180_v41 = vsel %vm178_vm7, %v179_v31, %v4716_v21  ;;  %v538_v50 = vshll.u32 %v7024_v48, %v529_v35  ;;  %v541_v52 = vshll.u32 %v7022_v51, %v529_v35  ;;  %v544_v25 = vshll.u32 %v7020_v54, %v529_v35 }
  0xb4   :  { %v181_v43 = vadd.s32 %v180_v41, %v176_v32  ;;  %v533_v55 = vshrl.u32 %v7026_v44, %v530_v47  ;;  %v536_v56 = vshrl.u32 %v7024_v48, %v530_v47  ;;  %vm547_vm8 = vcmp.lt.s32.totalorder %v528_v34, 1 }
  0xb5   :  { %v539_v58 = vshrl.u32 %v7022_v51, %v530_v47  ;;  %v542_v59 = vshrl.u32 %v7020_v54, %v530_v47  ;;  %v545_v60 = vshrl.u32 %v7018_v57, %v530_v47  ;;  %vm549_vm9 = vcmp.lt.s32.totalorder %v528_v34, 3 }
  0xb6   :  { %v182_v53 = vadd.s32 536870912, %v181_v43  ;;  %v534_v62 = vor.u32 %v533_v55, %v532_v49  ;;  %v537_v63 = vor.u32 %v536_v56, %v535_v46  ;;  %vm550_vm10 = vcmp.lt.s32.totalorder %v528_v34, 4  ;;  %v4781_v49 = vpop.eup %4344 }
  0xb7   :  { %v531_v1 = vshrl.u32 %v7031_v42, %v530_v47  ;;  %v540_v2 = vor.u32 %v539_v58, %v538_v50  ;;  %v543_v3 = vor.u32 %v542_v59, %v541_v52  ;;  %v546_v5 = vor.u32 %v545_v60, %v544_v25  ;;  %v4794_v58 = vpop.permute.xlu1 %1690 }
  0xb8   :  { %v4748_v61 = vshrl.u32 %v182_v53, 30  ;;  %vm548_vm11 = vcmp.lt.s32.totalorder %v528_v34, 2  ;;  %v555_v7 = vsel %vm547_vm8, %v534_v62, %v537_v63  ;;  %v4769_v31 = vmul.f32 %v4671_v20, %v4691_v33 }
  0xb9   :  { %v552_v9 = vsel %vm550_vm10, %v540_v2, 2102212464  ;;  %v556_v10 = vsel %vm550_vm10, %v543_v3, 920167782  ;;  %v559_v11 = vsel %vm547_vm8, %v537_v63, %v540_v2  ;;  %v560_v12 = vsel %vm550_vm10, %v546_v5, 1326507024 }
  0xba   :  { %v184_v6 = vshll.u32 %v4748_v61, 30  ;;  %v557_v21 = vsel %vm549_vm9, %v540_v2, %v556_v10  ;;  %v551_v24 = vsel %vm547_vm8, %v531_v1, %v534_v62  ;;  %v553_v26 = vsel %vm549_vm9, %v537_v63, %v552_v9 }
  0xbb   :  { %v558_v29 = vsel %vm548_vm11, %v555_v7, %v557_v21  ;;  %v561_v30 = vsel %vm549_vm9, %v543_v3, %v560_v12  ;;  %v119_v32 = vmul.f32 1.442695, %v4676_v23  ;;  %v554_v33 = vsel %vm548_vm11, %v551_v24, %v553_v26 }
  0xbc   :  { %v4756_v14 = vsub.s32 %v181_v43, %v184_v6  ;;  %v562_v36 = vsel %vm548_vm11, %v559_v11, %v561_v30  ;;  %v4777_v45 = vmul.u32.u64.low %v563_v8, %v558_v29  ;;  %v4778_v47 = vmul.u32.u64.high %v563_v8, %v558_v29, %v4777_v45 }
  0xbd   :  { %v4774_v41 = vmul.u32.u64.low %v563_v8, %v562_v36  ;;  %v4775_v43 = vmul.u32.u64.high %v563_v8, %v562_v36, %v4774_v41  ;;  %v725_v50 = vmul.f32 %v4732_v39, %v4732_v39  ;;  %v726_v52 = vmul.f32 %v4682_v27, %v4682_v27 }
  0xbe   :  { %v187_v35 = vsub.s32 0, %v4756_v14  ;;  %v919_v25 = vadd.s32 1, %v3373_v13  ;;  %v1306_v53 = vand.u32 2139095040, %v4760_v15  ;;  %v4791_v55 = vmul.f32 1.442695, %v4769_v31 }
  0xbf   :  { %4346 = vpow2.f32 %v119_v32  ;;  %v513_v34 = vmul.f32 1.442695, %v4732_v39  ;;  %v4798_v59 = vmul.f32 0.5, %v4676_v23  ;;  %v570_v60 = vmul.u32 %v563_v8, %v554_v33 }
  0xc0   :  { %v3356_v46 = vmin.u32 %v187_v35, %v4756_v14  ;;  %vm572_vm13 = vc.u32 %v4775_v43, %v4777_v45  ;;  %v573_v63 = vadd.s32 1, %v4778_v47  ;;  %v4803_v1 = vadd.f32 %v726_v52, %v725_v50 }
  0xc1   :  { %v4806_v2 = vmul.f32 0.5, %v4666_v19  ;;  %v1307_v3 = vshrl.u32 %v1306_v53, 23  ;;  %v4810_v5 = vmul.f32 %v4663_v17, %v4794_v58  ;;  %vm920_vm14 = vcmp.gt.s32.totalorder %v919_v25, 0 }
  0xc2   :  { %v189_v56 = vclz %v3356_v46  ;;  %v4820_v7 = vmul.f32 %v4781_v49, %v4723_v28  ;;  %v574_v8 = vsel %vm572_vm13, %v573_v63, %v4778_v47  ;;  %v921_v9 = vsel %vm920_vm14, %v919_v25, 0 }
  0xc3   :  { %v177_v10 = vadd.s32 %v4715_v18, %v4713_v16  ;;  %v207_v12 = vsub.s32 4, %v4748_v61  ;;  %v575_v13 = vadd.s32 %v574_v8, %v570_v60  ;;  %vm728_vm2 = vcmp.lt.f32.partialorder %v4803_v1, 1e-06 }
  0xc4   :  { %v3357_v62 = vadd.s32 4294967294, %v189_v56  ;;  %v923_v24 = vand.u32 31, %v921_v9  ;;  %4348 = vpow2.f32 %v513_v34  ;;  %v4827_v26 = vadd.s32 4294967169, %v1307_v3 }
  0xc5   :  { %v1700_v28 = vand.u32 2139095040, %v4810_v5  ;;  %v576_v29 = vadd.s32 536870912, %v575_v13  ;;  %v208_v18 = vsel %vm123_vm12, %v207_v12, %v4748_v61  ;;  %v338_v36 = vsub.f32 2.0, %v4820_v7 }
  0xc6   :  { %vm3358_vm0 = vcmp.lt.s32.totalorder %v3357_v62, 0  ;;  %v924_v16 = vsub.s32 32, %v923_v24  ;;  %v4840_v47 = vsel %vm728_vm2, 1.0, %v4803_v1  ;;  %v4843_v50 = vshrl.u32 %v921_v9, 5 }
  0xc7   :  { %v192_v11 = vsel %vm3358_vm0, 0, %v3357_v62  ;;  %v4835_v41 = vshrl.u32 %v576_v29, 30  ;;  %v926_v25 = vshll.u32 %v7031_v42, %v923_v24  ;;  %v929_v61 = vshll.u32 %v7026_v44, %v923_v24 }
  0xc8   :  { %v193_v21 = vsub.s32 32, %v192_v11  ;;  %v197_v22 = vsub.s32 4294967266, %v192_v11  ;;  %v194_v30 = vshll.u32 %v4756_v14, %v192_v11  ;;  %v7016_v14 = vand.u32 2147483647, %v4697_v38 }
  0xc9   :  { %v578_v52 = vshll.u32 %v4835_v41, 30  ;;  %v935_v53 = vshll.u32 %v7022_v51, %v923_v24  ;;  %v927_v34 = vshrl.u32 %v7026_v44, %v924_v16  ;;  %v930_v60 = vshrl.u32 %v7024_v48, %v924_v16 }
  0xca   :  { %v195_v32 = vshrl.u32 %v177_v10, %v193_v21  ;;  %v198_v35 = vadd.s32 127, %v197_v22  ;;  %v936_v62 = vshrl.u32 %v7020_v54, %v924_v16  ;;  %v210_v63 = vsel %vm4814_vm15, 0, %v208_v18 }
  0xcb   :  { %v4854_v3 = vsub.s32 %v575_v13, %v578_v52  ;;  %v932_v8 = vshll.u32 %v7024_v48, %v923_v24  ;;  %v933_v9 = vshrl.u32 %v7022_v51, %v924_v16  ;;  %4350 = vrcp.f32 %v4840_v47 }
  0xcc   :  { %v196_v46 = vor.u32 %v195_v32, %v194_v30  ;;  %v199_v33 = vshll.u32 %v198_v35, 23  ;;  %v4858_v10 = vpop.eup %4346  ;;  %v916_v21 = vand.u32 8388607, %v7016_v14  ;;  %v937_v29 = vor.u32 %v936_v62, %v935_v53 }
  0xcd   :  { %v581_v22 = vsub.s32 0, %v4854_v3  ;;  %v938_v30 = vshll.u32 %v7020_v54, %v923_v24  ;;  %v939_v13 = vshrl.u32 %v7018_v57, %v924_v16  ;;  %v928_v35 = vor.u32 %v927_v34, %v926_v25 }
  0xce   :  { %v200_v56 = vor.u32 4788187, %v199_v33  ;;  %v203_v12 = vcvt.s32.f32 %v196_v46  ;;  %v931_v18 = vor.u32 %v930_v60, %v929_v61  ;;  %vm944_vm3 = vcmp.lt.s32.totalorder %v4843_v50, 4 }
  0xcf   :  { %v3365_v33 = vmin.u32 %v581_v22, %v4854_v3  ;;  %v925_v46 = vshrl.u32 %v7031_v42, %v924_v16  ;;  %v934_v52 = vor.u32 %v933_v9, %v932_v8  ;;  %vm941_vm4 = vcmp.lt.s32.totalorder %v4843_v50, 1 }
  0xd0   :  { %v201_v11 = vand.u32 2147483647, %v200_v56  ;;  %v4870_v14 = vand.u32 3, %v210_v63  ;;  %v1701_v53 = vshrl.u32 %v1700_v28, 23  ;;  %vm943_vm5 = vcmp.lt.s32.totalorder %v4843_v50, 3 }
  0xd1   :  { %v583_v24 = vclz %v3365_v33  ;;  %v940_v62 = vor.u32 %v939_v13, %v938_v30  ;;  %v946_v25 = vsel %vm944_vm3, %v934_v52, 2102212464  ;;  %v950_v61 = vsel %vm944_vm3, %v937_v29, 920167782  ;;  %v4877_v34 = vpop.eup %4348 }
  0xd2   :  { %v204_v32 = vmul.f32 %v203_v12, %v201_v11  ;;  %v917_v60 = vor.u32 8388608, %v916_v21  ;;  %vm942_vm6 = vcmp.lt.s32.totalorder %v4843_v50, 2  ;;  %v949_v28 = vsel %vm941_vm4, %v928_v35, %v931_v18 }
  0xd3   :  { %v571_v9 = vadd.s32 %v4777_v45, %v4775_v43  ;;  %v3366_v11 = vadd.s32 4294967294, %v583_v24  ;;  %v945_v12 = vsel %vm941_vm4, %v925_v46, %v928_v35  ;;  %v947_v21 = vsel %vm943_vm5, %v931_v18, %v946_v25 }
  0xd4   :  { %v205_v56 = vxor.u32 2147483648, %v204_v32  ;;  %v951_v22 = vsel %vm943_vm5, %v934_v52, %v950_v61  ;;  %v953_v30 = vsel %vm941_vm4, %v931_v18, %v934_v52  ;;  %v954_v43 = vsel %vm944_vm3, %v940_v62, 1326507024 }
  0xd5   :  { %vm3367_vm7 = vcmp.lt.s32.totalorder %v3366_v11, 0  ;;  %v952_v6 = vsel %vm942_vm6, %v949_v28, %v951_v22  ;;  %v601_v13 = vsub.s32 4, %v4835_v41  ;;  %v957_v35 = vshll.u32 %v917_v60, 8 }
  0xd6   :  { %v206_v16 = vsel %vm123_vm12, %v205_v56, %v204_v32  ;;  %v586_v45 = vsel %vm3367_vm7, 0, %v3366_v11  ;;  %v955_v32 = vsel %vm943_vm5, %v937_v29, %v954_v43  ;;  %v948_v18 = vsel %vm942_vm6, %v945_v12, %v947_v21 }
  0xd7   :  { %v209_v8 = vsel %vm4814_vm15, %v4666_v19, %v206_v16  ;;  %v587_v33 = vsub.s32 32, %v586_v45  ;;  %v591_v46 = vsub.s32 4294967266, %v586_v45  ;;  %v956_v52 = vsel %vm942_vm6, %v953_v30, %v955_v32 }
  0xd8   :  { %4352 = vcosq.f32 %v209_v8  ;;  %v4908_v56 = vmul.u32.u64.low %v957_v35, %v956_v52  ;;  %v4909_v24 = vmul.u32.u64.high %v957_v35, %v956_v52, %v4908_v56  ;;  %v4915_v61 = vpop.eup %4350  ;;  %v318_v16 = vadd.s32 3, %v210_v63 }
  0xd9   :  { %4354 = vsinq.f32 %v209_v8  ;;  %v4911_v25 = vmul.u32.u64.low %v957_v35, %v952_v6  ;;  %v4912_v62 = vmul.u32.u64.high %v957_v35, %v952_v6, %v4911_v25  ;;  %v588_v29 = vshll.u32 %v4854_v3, %v586_v45 }
  0xda   :  { %v589_v60 = vshrl.u32 %v571_v9, %v587_v33  ;;  %v592_v28 = vadd.s32 127, %v591_v46  ;;  %v4919_v8 = vadd.f32 1.0, %v4798_v59  ;;  %v1313_v50 = vadd.s32 1, %v4827_v26 }
  0xdb   :  { %vm4924_vm8 = vcmp.le.f32.partialorder %v515_v4, 0.7853982  ;;  %vm517_vm9 = vcmp.lt.s32.totalorder %v4682_v27, 0  ;;  %v4932_v63 = vmul.f32 %v4781_v49, %v338_v36  ;;  %v964_v12 = vmul.u32 %v957_v35, %v948_v18 }
  0xdc   :  { %v590_v3 = vor.u32 %v589_v60, %v588_v29  ;;  %v593_v9 = vshll.u32 %v592_v28, 23  ;;  %v602_v59 = vsel %vm517_vm9, %v601_v13, %v4835_v41  ;;  %v734_v26 = vmul.f32 0.5, %v4732_v39 }
  0xdd   :  { %vm966_vm10 = vc.u32 %v4909_v24, %v4911_v25  ;;  %v967_v4 = vadd.s32 1, %v4912_v62  ;;  %vm215_vm11 = vcmp.lt.s32.totalorder %v4870_v14, 2  ;;  %v319_v7 = vand.u32 3, %v318_v16 }
  0xde   :  { %v4942_v21 = vadd.s32 4294967169, %v1701_v53  ;;  %v594_v49 = vor.u32 4788187, %v593_v9  ;;  %vm213_vm12 = vweird.f32 %v4666_v19  ;;  %vm216_vm13 = vcmp.eq.s32.totalorder %v4870_v14, 0 }
  0xdf   :  { %vm219_vm14 = vcmp.eq.s32.totalorder %v4870_v14, 2  ;;  %v731_v36 = vmul.f32 %v4915_v61, %v4840_v47  ;;  %v968_v41 = vsel %vm966_vm10, %v967_v4, %v4912_v62  ;;  %v597_v30 = vcvt.s32.f32 %v590_v3  ;;  %v4958_v47 = vpop.permute.xlu0 %748 }
  0xe0   :  { %v595_v22 = vand.u32 2147483647, %v594_v49  ;;  %v604_v6 = vsel %vm4924_vm8, 0, %v602_v59  ;;  %v969_v43 = vadd.s32 %v968_v41, %v964_v12  ;;  %v4952_v53 = vadd.f32 1.0, %v734_v26 }
  0xe1   :  { %v1119_v45 = vmul.f32 %v4769_v31, %v4769_v31  ;;  %v1120_v13 = vmul.f32 %v4697_v38, %v4697_v38  ;;  %vm1314_vm15 = vcmp.gt.s32.totalorder %v1313_v50, 0  ;;  %vm320_vm0 = vcmp.lt.s32.totalorder %v319_v7, 2 }
  0xe2   :  { %vm321_vm3 = vcmp.eq.s32.totalorder %v319_v7, 0  ;;  %v598_v35 = vmul.f32 %v597_v30, %v595_v22  ;;  %v970_v33 = vadd.s32 536870912, %v969_v43  ;;  %vm324_vm4 = vcmp.eq.s32.totalorder %v319_v7, 2 }
  0xe3   :  { %v712_v52 = vadd.s32 3, %v604_v6  ;;  %v732_v56 = vsub.f32 2.0, %v731_v36  ;;  %v4962_v60 = vsel %vm1314_vm15, %v1313_v50, 0  ;;  %v4966_v9 = vadd.f32 %v1120_v13, %v1119_v45  ;;  %v4990_v14 = vpop.permute.xlu0 %2084 }
  0xe4   :  { %v599_v16 = vxor.u32 2147483648, %v598_v35  ;;  %v4960_v29 = vshrl.u32 %v970_v33, 30  ;;  %v7017_v12 = vand.u32 2147483647, %v4760_v15  ;;  %v4982_v22 = vand.u32 31, %v4962_v60 }
  0xe5   :  { %v4353_v32 = vpop.eup %4352  ;;  %vm1122_vm5 = vcmp.lt.f32.partialorder %v4966_v9, 1e-06  ;;  %v4995_v11 = vand.u32 3, %v604_v6  ;;  %vm911_vm6 = vcmp.lt.s32.totalorder %v4697_v38, 0 }
  0xe6   :  { %v4355_v46 = vpop.eup %4354  ;;  %v220_v18 = vxor.u32 2147483648, %v4353_v32  ;;  %v600_v4 = vsel %vm517_vm9, %v599_v16, %v598_v35  ;;  %v972_v49 = vshll.u32 %v4960_v29, 30  ;;  %v4998_v35 = vmul.f32 0.5, %v4682_v27 }
  0xe7   :  { %v217_v62 = vxor.u32 2147483648, %v4355_v46  ;;  %v603_v41 = vsel %vm4924_vm8, %v4682_v27, %v600_v4  ;;  %v5005_v16 = vmul.f32 %v4915_v61, %v732_v56  ;;  %vm613_vm7 = vcmp.eq.s32.totalorder %v4995_v11, 2 }
  0xe8   :  { %v221_v28 = vsel %vm219_vm14, %v220_v18, %v4355_v46  ;;  %v326_v3 = vsel %vm324_vm4, %v220_v18, %v4355_v46  ;;  %4356 = vcosq.f32 %v603_v41  ;;  %v4988_v13 = vsub.s32 %v969_v43, %v972_v49  ;;  %v59_v43 = vld [vmem:[#allocation2] sm:$0xff]  ;;  %v61_v46 = vld [vmem:[#allocation5] sm:$0xff] }
  0xe9   :  { %v218_v59 = vsel %vm216_vm13, %v4353_v32, %v217_v62  ;;  %v323_v26 = vsel %vm321_vm3, %v4353_v32, %v217_v62  ;;  %4358 = vsinq.f32 %v603_v41  ;;  %v5002_v62 = vand.u32 3, %v712_v52 }
  0xea   :  { %v222_v50 = vsel %vm215_vm11, %v218_v59, %v221_v28  ;;  %v327_v36 = vsel %vm320_vm0, %v323_v26, %v326_v3  ;;  %v975_v33 = vsub.s32 0, %v4988_v13  ;;  %v5015_v28 = vsel %vm1122_vm5, 1.0, %v4966_v9 }
  0xeb   :  { %v223_v30 = vsel %vm213_vm12, nan, %v222_v50  ;;  %v328_v45 = vsel %vm213_vm12, nan, %v327_v36  ;;  %v5019_v3 = vand.u32 8388607, %v7017_v12  ;;  %v5022_v52 = vsub.s32 32, %v4982_v22 }
  0xec   :  { %v224_v7 = vmul.f32 %v4858_v10, %v223_v30  ;;  %v329_v32 = vmul.f32 %v4858_v10, %v328_v45  ;;  %v5009_v10 = vmul.f32 %v4663_v17, %v4990_v14  ;;  %v3374_v6 = vmin.u32 %v975_v33, %v4988_v13 }
  0xed   :  { %v995_v50 = vsub.s32 4, %v4960_v29  ;;  %vm718_vm8 = vcmp.eq.s32.totalorder %v5002_v62, 2  ;;  %vm610_vm9 = vcmp.eq.s32.totalorder %v4995_v11, 0  ;;  %vm715_vm10 = vcmp.eq.s32.totalorder %v5002_v62, 0 }
  0xee   :  { %v3363_v18 = vadd.f32 -1.0, %v224_v7  ;;  %v343_v56 = vmul.f32 %v329_v32, %v4666_v19  ;;  %v348_v17 = vmul.f32 %v329_v32, %v4676_v23  ;;  %v359_v26 = vmul.f32 %v224_v7, %v59_v43 }
  0xef   :  { %v360_v4 = vmul.f32 %v329_v32, %v61_v46  ;;  %v977_v49 = vclz %v3374_v6  ;;  %v363_v30 = vmul.f32 %v329_v32, %v59_v43  ;;  %v364_v45 = vmul.f32 %v224_v7, %v61_v46 }
  0xf0   :  { %v342_v61 = vmul.f32 %v3363_v18, %v4676_v23  ;;  %v349_v59 = vmul.f32 %v3363_v18, %v4666_v19  ;;  %v965_v19 = vadd.s32 %v4911_v25, %v4909_v24  ;;  %4360 = vrcp.f32 %v5015_v28 }
  0xf1   :  { %v3375_v23 = vadd.s32 4294967294, %v977_v49  ;;  %v1311_v33 = vor.u32 8388608, %v5019_v3  ;;  %vm609_vm11 = vcmp.lt.s32.totalorder %v4995_v11, 2  ;;  %vm714_vm12 = vcmp.lt.s32.totalorder %v5002_v62, 2 }
  0xf2   :  { %v344_v36 = vadd.f32 %v343_v56, %v342_v61  ;;  %v350_v41 = vsub.f32 %v348_v17, %v349_v59  ;;  %v1320_v32 = vshll.u32 %v7031_v42, %v4982_v22  ;;  %v1321_v43 = vshrl.u32 %v7026_v44, %v5022_v52 }
  0xf3   :  { %v361_v24 = vsub.f32 %v359_v26, %v360_v4  ;;  %vm607_vm13 = vweird.f32 %v4682_v27  ;;  %vm3376_vm14 = vcmp.lt.s32.totalorder %v3375_v23, 0  ;;  %v5049_v25 = vsel %vm911_vm6, %v995_v50, %v4960_v29 }
  0xf4   :  { %v345_v18 = vmul.f32 %v344_v36, %v4932_v63  ;;  %v351_v7 = vmul.f32 %v350_v41, %v4932_v63  ;;  %v5052_v63 = vshrl.u32 %v4962_v60, 5  ;;  %v365_v61 = vadd.f32 %v364_v45, %v363_v30 }
  0xf5   :  { %v980_v56 = vsel %vm3376_vm14, 0, %v3375_v23  ;;  %v4357_v4 = vpop.eup %4356  ;;  %v1319_v49 = vshrl.u32 %v7031_v42, %v5022_v52  ;;  %v1322_v50 = vor.u32 %v1321_v43, %v1320_v32  ;;  %v1326_v23 = vshll.u32 %v7024_v48, %v4982_v22 }
  0xf6   :  { %v346_v46 = vsel %vm334_vm1, %v4919_v8, %v345_v18  ;;  %v352_v6 = vsel %vm334_vm1, %v4806_v2, %v351_v7  ;;  %v981_v26 = vsub.s32 32, %v980_v56  ;;  %v982_v29 = vshll.u32 %v4988_v13, %v980_v56  ;;  %v4359_v37 = vpop.eup %4358 }
  0xf7   :  { %v357_v17 = vmul.f32 %v4734_v40, %v346_v46  ;;  %v358_v59 = vmul.f32 %v4734_v40, %v352_v6  ;;  %v985_v60 = vsub.s32 4294967266, %v980_v56  ;;  %v1323_v8 = vshll.u32 %v7026_v44, %v4982_v22 }
  0xf8   :  { %v614_v36 = vxor.u32 2147483648, %v4357_v4  ;;  %v983_v41 = vshrl.u32 %v965_v19, %v981_v26  ;;  %v1324_v40 = vshrl.u32 %v7024_v48, %v5022_v52  ;;  %v611_v13 = vxor.u32 2147483648, %v4359_v37 }
  0xf9   :  { %v5067_v2 = vadd.f32 %v361_v24, %v357_v17  ;;  %v5071_v30 = vadd.f32 %v365_v61, %v358_v59  ;;  %v986_v45 = vadd.s32 127, %v985_v60  ;;  %v1327_v19 = vshrl.u32 %v7022_v51, %v5022_v52 }
  0xfa   :  { %v615_v18 = vsel %vm613_vm7, %v614_v36, %v4359_v37  ;;  %v720_v7 = vsel %vm718_vm8, %v614_v36, %v4359_v37  ;;  %v984_v32 = vor.u32 %v983_v41, %v982_v29  ;;  %vm1335_vm1 = vcmp.lt.s32.totalorder %v5052_v63, 1 }
  0xfb   :  { %v612_v43 = vsel %vm610_vm9, %v4357_v4, %v611_v13  ;;  %v717_v24 = vsel %vm715_vm10, %v4357_v4, %v611_v13  ;;  %v7093_v46 = vand.u32 2147483647, %v4697_v38  ;;  %v987_v61 = vshll.u32 %v986_v45, 23 }
  0xfc   :  { %v1329_v56 = vshll.u32 %v7022_v51, %v4982_v22  ;;  %v616_v17 = vsel %vm609_vm11, %v612_v43, %v615_v18  ;;  %v721_v59 = vsel %vm714_vm12, %v717_v24, %v720_v7  ;;  %v991_v26 = vcvt.s32.f32 %v984_v32 }
  0xfd   :  { %vm5088_vm15 = vcmp.le.f32.partialorder %v7093_v46, 0.7853982  ;;  %v1325_v29 = vor.u32 %v1324_v40, %v1323_v8  ;;  %v617_v4 = vsel %vm607_vm13, nan, %v616_v17  ;;  %v722_v60 = vsel %vm607_vm13, nan, %v721_v59  ;;  %v5108_v45 = vpop.eup %4360 }
  0xfe   :  { %v988_v37 = vor.u32 4788187, %v987_v61  ;;  %v1330_v36 = vshrl.u32 %v7020_v54, %v5022_v52  ;;  %v618_v41 = vmul.f32 %v4877_v34, %v617_v4  ;;  %v723_v11 = vmul.f32 %v4877_v34, %v722_v60 }
  0xff   :  { %v1328_v13 = vor.u32 %v1327_v19, %v1326_v23  ;;  %v1332_v62 = vshll.u32 %v7020_v54, %v4982_v22  ;;  %v1333_v18 = vshrl.u32 %v7018_v57, %v5022_v52  ;;  %vm1336_vm0 = vcmp.lt.s32.totalorder %v5052_v63, 2 }
 0x100   :  { %v989_v8 = vand.u32 2147483647, %v988_v37  ;;  %v1331_v40 = vor.u32 %v1330_v36, %v1329_v56  ;;  %v3372_v7 = vadd.f32 -1.0, %v618_v41  ;;  %v737_v32 = vmul.f32 %v723_v11, %v4682_v27 }
 0x101   :  { %v753_v43 = vmul.f32 %v618_v41, %v5067_v2  ;;  %vm1337_vm3 = vcmp.lt.s32.totalorder %v5052_v63, 3  ;;  %v754_v34 = vmul.f32 %v723_v11, %v5071_v30  ;;  %v757_v22 = vmul.f32 %v723_v11, %v5067_v2 }
 0x102   :  { %v758_v23 = vmul.f32 %v618_v41, %v5071_v30  ;;  %v992_v19 = vmul.f32 %v991_v26, %v989_v8  ;;  %v736_v24 = vmul.f32 %v3372_v7, %v4732_v39  ;;  %v742_v52 = vmul.f32 %v723_v11, %v4732_v39 }
 0x103   :  { %v743_v46 = vmul.f32 %v3372_v7, %v4682_v27  ;;  %vm1338_vm4 = vcmp.lt.s32.totalorder %v5052_v63, 4  ;;  %v755_v61 = vsub.f32 %v753_v43, %v754_v34  ;;  %v1334_v59 = vor.u32 %v1333_v18, %v1332_v62  ;;  %v5187_v63 = vld [vmem:[%s7009_s3 + $0x78] sm:$0xff] }
 0x104   :  { %v759_v56 = vadd.f32 %v758_v23, %v757_v22  ;;  %v993_v17 = vxor.u32 2147483648, %v992_v19  ;;  %v738_v4 = vadd.f32 %v737_v32, %v736_v24  ;;  %v1339_v37 = vsel %vm1335_vm1, %v1319_v49, %v1322_v50  ;;  %v5194_v24 = vpop.permute.xlu1 %1142 }
 0x105   :  { %v744_v60 = vsub.f32 %v742_v52, %v743_v46  ;;  %v1340_v26 = vsel %vm1338_vm4, %v1328_v13, 2102212464  ;;  %v1343_v39 = vsel %vm1335_vm1, %v1322_v50, %v1325_v29  ;;  %v1344_v41 = vsel %vm1338_vm4, %v1331_v40, 920167782 }
 0x106   :  { %v994_v36 = vsel %vm911_vm6, %v993_v17, %v992_v19  ;;  %v1341_v27 = vsel %vm1337_vm3, %v1325_v29, %v1340_v26  ;;  %v739_v11 = vmul.f32 %v738_v4, %v5005_v16  ;;  %v1347_v8 = vsel %vm1335_vm1, %v1325_v29, %v1328_v13  ;;  %v5202_v17 = vld [vmem:[%s7010_s4 + $0x70] sm:$0xff]  ;;  %v5228_v26 = vld [vmem:[%s7009_s3 + $0x68] sm:$0xff] }
 0x107   :  { %v745_v62 = vmul.f32 %v744_v60, %v5005_v16  ;;  %v997_v49 = vsel %vm5088_vm15, %v4697_v38, %v994_v36  ;;  %v1345_v18 = vsel %vm1337_vm3, %v1328_v13, %v1344_v41  ;;  %v1348_v50 = vsel %vm1338_vm4, %v1334_v59, 1326507024 }
 0x108   :  { %4362 = vcosq.f32 %v997_v49  ;;  %v1351_v7 = vshll.u32 %v1311_v33, 8  ;;  %v740_v16 = vsel %vm728_vm2, %v4952_v53, %v739_v11  ;;  %v1346_v29 = vsel %vm1336_vm0, %v1343_v39, %v1345_v18  ;;  %v5255_v18 = vld [vmem:[%s7009_s3 + $0x60] sm:$0xff] }
 0x109   :  { %v746_v32 = vsel %vm728_vm2, %v4998_v35, %v745_v62  ;;  %4364 = vsinq.f32 %v997_v49  ;;  %v751_v13 = vmul.f32 %v4958_v47, %v740_v16  ;;  %v998_v3 = vsel %vm5088_vm15, 0, %v5049_v25 }
 0x10a   :  { %v752_v43 = vmul.f32 %v4958_v47, %v746_v32  ;;  %v1349_v33 = vsel %vm1337_vm3, %v1331_v40, %v1348_v50  ;;  %v1342_v53 = vsel %vm1336_vm0, %v1339_v37, %v1341_v27  ;;  %v2094_v25 = vand.u32 2139095040, %v5009_v10  ;;  %v5182_v40 = vld [vmem:[%s7010_s4 + $0x78] sm:$0xff] }
 0x10b   :  { %v1350_v1 = vsel %vm1336_vm0, %v1347_v8, %v1349_v33  ;;  %v5167_v35 = vmul.u32.u64.low %v1351_v7, %v1346_v29  ;;  %v5168_v34 = vmul.u32.u64.high %v1351_v7, %v1346_v29, %v5167_v35  ;;  %v5171_v22 = vadd.f32 %v755_v61, %v751_v13  ;;  %v5250_v8 = vld [vmem:[%s7010_s4 + $0x60] sm:$0xff]  ;;  %v5274_v32 = vld [vmem:[%s7010_s4 + $0x58] sm:$0xff] }
 0x10c   :  { %v5173_v47 = vadd.f32 %v759_v56, %v752_v43  ;;  %v5175_v23 = vmul.u32.u64.low %v1351_v7, %v1350_v1  ;;  %v5176_v6 = vmul.u32.u64.high %v1351_v7, %v1350_v1, %v5175_v23  ;;  %4366 = vpow2.f32 %v4791_v55  ;;  %v5279_v29 = vld [vmem:[%s7009_s3 + $0x58] sm:$0xff] }
 0x10d   :  { %7096 = vst [vmem:[#allocation15_spill] sm:$0xff] %v5171_v22  ;;  %v5192_v19 = vmul.f32 %v4671_v20, %v4750_v0  ;;  %v1358_v52 = vmul.u32 %v1351_v7, %v1342_v53  ;;  %v1106_v46 = vadd.s32 3, %v998_v3  ;;  %v1361_v61 = vadd.s32 1, %v5168_v34  ;;  %v5207_v0 = vld [vmem:[%s7009_s3 + $0x70] sm:$0xff]  ;;  %7099 = vst [vmem:[#allocation18_spill] sm:$0xff] %v5279_v29 }
 0x10e   :  { %7097 = vst [vmem:[#allocation16_spill] sm:$0xff] %v5173_v47  ;;  %v7028_v56 = vmov 0.0   ;;  %v1707_v55 = vadd.s32 1, %v4942_v21  ;;  %vm1360_vm2 = vc.u32 %v5176_v6, %v5167_v35  ;;  %v5214_v59 = vand.u32 3, %v998_v3  ;;  %v5223_v21 = vld [vmem:[%s7010_s4 + $0x68] sm:$0xff]  ;;  %v5296_v23 = vld [vmem:[%s7010_s4 + $0x50] sm:$0xff] }
 0x10f   :  { %3699 = vmatprep.subr.mxu0 %v7028_v56  ;;  %3734 = vmatprep.subr.mxu1 %v7028_v56  ;;  %v1128_v4 = vmul.f32 0.5, %v4769_v31  ;;  %v2095_v60 = vshrl.u32 %v2094_v25, 23  ;;  %v1362_v37 = vsel %vm1360_vm2, %v1361_v61, %v5168_v34  ;;  %v1513_v27 = vmul.f32 %v5192_v19, %v5192_v19  ;;  %7101 = vst [vmem:[#allocation20_spill] sm:$0xff] %v5296_v23  ;;  %v5304_v61 = vld [vmem:[%s7009_s3 + $0x50] sm:$0xff] }
 0x110   :  { %3700 = vmatpush3.msra.mxu0 %v5182_v40  ;;  %3735 = vmatpush3.msra.mxu1 %v5187_v63  ;;  %v1363_v36 = vadd.s32 %v1362_v37, %v1358_v52  ;;  %v1514_v39 = vmul.f32 %v4760_v15, %v4760_v15  ;;  %v5237_v41 = vmul.f32 1.442695, %v5192_v19  ;;  %v5241_v11 = vmul.f32 %v4671_v20, %v4794_v58  ;;  %v5261_v58 = vpop.permute.xlu1 %1536 }
 0x111   :  { %3701 = vmatprep.subr.mxu0 %v7028_v56  ;;  %3736 = vmatprep.subr.mxu1 %v7028_v56  ;;  %v1107_v62 = vand.u32 3, %v1106_v46  ;;  %v1125_v49 = vmul.f32 %v5108_v45, %v5015_v28  ;;  %vm1001_vm6 = vweird.f32 %v4697_v38  ;;  %v5259_v20 = vmul.f32 0.5, %v4697_v38  ;;  %7098 = vst [vmem:[#allocation17_spill] sm:$0xff] %v5261_v58  ;;  %7102 = vst [vmem:[#allocation21_spill] sm:$0xff] %v5304_v61 }
 0x112   :  { %3702 = vmatpush3.msra.mxu0 %v5202_v17  ;;  %3737 = vmatpush3.msra.mxu1 %v5207_v0  ;;  %v1364_v28 = vadd.s32 536870912, %v1363_v36  ;;  %vm1708_vm7 = vcmp.gt.s32.totalorder %v1707_v55, 0  ;;  %vm1003_vm8 = vcmp.lt.s32.totalorder %v5214_v59, 2  ;;  %vm1004_vm9 = vcmp.eq.s32.totalorder %v5214_v59, 0 }
 0x113   :  { %3703 = vmatprep.subr.mxu0 %v7028_v56  ;;  %3738 = vmatprep.subr.mxu1 %v7028_v56  ;;  %v5267_v7 = vadd.f32 1.0, %v1128_v4  ;;  %v3400_v16 = vadd.s32 4294967169, %v2095_v60  ;;  %v5283_v33 = vadd.f32 %v1514_v39, %v1513_v27  ;;  %v5288_v53 = vsel %vm1708_vm7, %v1707_v55, 0  ;;  %v5313_v60 = vld [vmem:[%s7010_s4 + $0x48] sm:$0xff] }
 0x114   :  { %3704 = vmatpush3.msra.mxu0 %v5223_v21  ;;  %3739 = vmatpush3.msra.mxu1 %v5228_v26  ;;  %v5281_v3 = vshrl.u32 %v1364_v28, 30  ;;  %vm1007_vm10 = vcmp.eq.s32.totalorder %v5214_v59, 2  ;;  %vm1112_vm11 = vcmp.eq.s32.totalorder %v1107_v62, 2  ;;  %v1126_v34 = vsub.f32 2.0, %v1125_v49  ;;  %v5329_v28 = vld [vmem:[%s7009_s3 + $0x48] sm:$0xff] }
 0x115   :  { %v4363_v50 = vpop.eup %4362  ;;  %3705 = vmatprep.subr.mxu0 %v7028_v56  ;;  %3740 = vmatprep.subr.mxu1 %v7028_v56  ;;  %7100 = vst [vmem:[#allocation19_spill] sm:$0xff] %v5283_v33  ;;  %vm1109_vm12 = vcmp.eq.s32.totalorder %v1107_v62, 0  ;;  %vm1108_vm13 = vcmp.lt.s32.totalorder %v1107_v62, 2  ;;  %v5316_v37 = vand.u32 31, %v5288_v53  ;;  %vm1516_vm14 = vcmp.lt.f32.partialorder %v5283_v33, 1e-06  ;;  %v5323_v62 = vpop.permute.xlu1 %2478 }
 0x116   :  { %v4365_v13 = vpop.eup %4364  ;;  %v1008_v43 = vxor.u32 2147483648, %v4363_v50  ;;  %3706 = vmatpush3.msra.mxu0 %v5250_v8  ;;  %3741 = vmatpush3.msra.mxu1 %v5255_v18  ;;  %v1366_v46 = vshll.u32 %v5281_v3, 30  ;;  %7103 = vst [vmem:[#allocation22_spill] sm:$0xff] %v5323_v62  ;;  %7104 = vst [vmem:[#allocation23_spill] sm:$0xff] %v5329_v28  ;;  %vm4590_vm2 = vmmov 0  }
 0x117   :  { %v1005_v1 = vxor.u32 2147483648, %v4365_v13  ;;  %3707 = vmatprep.subr.mxu0 %v7028_v56  ;;  %3742 = vmatprep.subr.mxu1 %v7028_v56  ;;  %v1714_v12 = vshll.u32 %v7031_v42, %v5316_v37  ;;  %v5410_v42 = vld [vmem:[%s7010_s4 + $0x30] sm:$0xff] }
 0x118   :  { %v1009_v25 = vsel %vm1007_vm10, %v1008_v43, %v4365_v13  ;;  %v1114_v52 = vsel %vm1112_vm11, %v1008_v43, %v4365_v13  ;;  %3708 = vmatpush3.msra.mxu0 %v5274_v32  ;;  %3743 = vmatpush3.msra.mxu1 %v5279_v29  ;;  %v5320_v49 = vsub.s32 %v1363_v36, %v1366_v46  ;;  %v5336_v43 = vadd.s32 1, %v3400_v16 }
 0x119   :  { %v1006_v55 = vsel %vm1004_vm9, %v4363_v50, %v1005_v1  ;;  %v1111_v4 = vsel %vm1109_vm12, %v4363_v50, %v1005_v1  ;;  %3709 = vmatprep.subr.mxu0 %v7028_v56  ;;  %3744 = vmatprep.subr.mxu1 %v7028_v56  ;;  %v4367_v50 = vpop.eup %4366  ;;  %v1127_v36 = vmul.f32 %v5108_v45, %v1126_v34  ;;  %v5343_v1 = vld [vmem:[%s7010_s4 + $0x40] sm:$0xff]  ;;  %vm1395_vm12 = vweird.f32 %v4760_v15 }
 0x11a   :  { %v1010_v27 = vsel %vm1003_vm8, %v1006_v55, %v1009_v25  ;;  %v1115_v39 = vsel %vm1108_vm13, %v1111_v4, %v1114_v52  ;;  %3710 = vmatpush3.msra.mxu0 %v5296_v23  ;;  %3745 = vmatpush3.msra.mxu1 %v5304_v61  ;;  %7105 = vst [vmem:[#allocation24_spill] sm:$0xff] %v5343_v1  ;;  %v1369_v46 = vsub.s32 0, %v5320_v49  ;;  %v5351_v45 = vld [vmem:[%s7009_s3 + $0x40] sm:$0xff]  ;;  %v5361_v55 = vsel %vm1516_vm14, 1.0, %v5283_v33 }
 0x11b   :  { %v1011_v13 = vsel %vm1001_vm6, nan, %v1010_v27  ;;  %v1116_v59 = vsel %vm1001_vm6, nan, %v1115_v39  ;;  %3711 = vmatprep.subr.mxu0 %v7028_v56  ;;  %3746 = vmatprep.subr.mxu1 %v7028_v56  ;;  %7106 = vst [vmem:[#allocation25_spill] sm:$0xff] %v5351_v45  ;;  %v5356_v34 = vadd.s32 %v5167_v35, %v5176_v6  ;;  %v5366_v4 = vld [vmem:[%s7008_s2] ss:$0 sm:$0xff]  ;;  %v5375_v35 = vsub.s32 32, %v5316_v37 }
 0x11c   :  { %v1012_v25 = vmul.f32 %v4367_v50, %v1011_v13  ;;  %v1117_v52 = vmul.f32 %v4367_v50, %v1116_v59  ;;  %3712 = vmatpush3.msra.mxu0 %v5313_v60  ;;  %v5370_v27 = vmul.f32 %v5366_v4, %v5323_v62  ;;  %3747 = vmatpush3.msra.mxu1 %v5329_v28  ;;  %v5386_v13 = vld [vmem:[%s7010_s4 + $0x38] sm:$0xff]  ;;  %v7109_v62 = vmov 0.0  }
 0x11d   :  { %3713 = vmatprep.subr.mxu0 %v7028_v56  ;;  %3748 = vmatprep.subr.mxu1 %v7028_v56  ;;  %7107 = vst [vmem:[#allocation26_spill] sm:$0xff] %v5386_v13  ;;  %v5391_v59 = vld [vmem:[%s7009_s3 + $0x38] sm:$0xff]  ;;  %v3383_v48 = vmin.u32 %v1369_v46, %v5320_v49  ;;  %7110 = vst [vmem:[#allocation28_spill] sm:$0xff] %v5410_v42  ;;  %v7112_v46 = vand.u32 2147483647, %v4810_v5  ;;  %4368 = vrcp.f32 %v5361_v55  ;;  %vm2102_vm7 = vcmp.gt.s32.totalorder %v5336_v43, 0 }
 0x11e   :  { %v3381_v6 = vadd.f32 -1.0, %v1012_v25  ;;  %v1131_v39 = vmul.f32 %v1117_v52, %v4697_v38  ;;  %v5379_v50 = vmul.f32 %v1012_v25, %v5171_v22  ;;  %3714 = vmatpush3.msra.mxu0 %v5343_v1  ;;  %7108 = vst [vmem:[#allocation27_spill] sm:$0xff] %v5391_v59  ;;  %v5396_v57 = vmul.f32 %v1117_v52, %v5173_v47 }
 0x11f   :  { %v1151_v54 = vmul.f32 %v1117_v52, %v5171_v22  ;;  %v1152_v51 = vmul.f32 %v1012_v25, %v5173_v47  ;;  %3749 = vmatpush3.msra.mxu1 %v5351_v45  ;;  %v1136_v16 = vmul.f32 %v1117_v52, %v4769_v31  ;;  %3715 = vmatprep.subr.mxu0 %v7109_v62  ;;  %v5415_v25 = vld [vmem:[%s7009_s3 + $0x30] sm:$0xff]  ;;  %v5419_v58 = vand.u32 8388607, %v7112_v46  ;;  %v5455_v46 = vld [vmem:[%s7010_s4 + $0x20] sm:$0xff] }
 0x120   :  { %v1130_v44 = vmul.f32 %v3381_v6, %v4769_v31  ;;  %v1137_v56 = vmul.f32 %v3381_v6, %v4697_v38  ;;  %3750 = vmatprep.subr.mxu1 %v7109_v62  ;;  %7111 = vst [vmem:[#allocation29_spill] sm:$0xff] %v5415_v25  ;;  %v1149_v38 = vsub.f32 %v5379_v50, %v5396_v57  ;;  %v1371_v52 = vclz %v3383_v48  ;;  %v5434_v48 = vld [vmem:[%s7010_s4 + $0x28] sm:$0xff] }
 0x121   :  { %v1153_v31 = vadd.f32 %v1152_v51, %v1151_v54  ;;  %3716 = vmatpush3.msra.mxu0 %v5386_v13  ;;  %3751 = vmatpush3.msra.mxu1 %v5391_v59  ;;  %v7113_v6 = vmov 2475754826   ;;  %7114 = vst [vmem:[#allocation30_spill] sm:$0xff] %v5434_v48  ;;  %v5439_v51 = vld [vmem:[%s7009_s3 + $0x28] sm:$0xff]  ;;  %v5444_v54 = vshrl.u32 %v5288_v53, 5  ;;  %7117 = vst [vmem:[#allocation32_spill] sm:$0xff] %v5455_v46  ;;  %4370 = vpow2.f32 %v5237_v41 }
 0x122   :  { %v1715_v33 = vshrl.u32 %v7113_v6, %v5375_v35  ;;  %v1132_v22 = vadd.f32 %v1131_v39, %v1130_v44  ;;  %v1138_v47 = vsub.f32 %v1136_v16, %v1137_v56  ;;  %3717 = vmatprep.subr.mxu0 %v7109_v62  ;;  %3752 = vmatprep.subr.mxu1 %v7109_v62  ;;  %v3384_v44 = vadd.s32 4294967294, %v1371_v52  ;;  %v5460_v53 = vld [vmem:[%s7009_s3 + $0x20] sm:$0xff] }
 0x123   :  { %7115 = vst [vmem:[#allocation31_spill] sm:$0xff] %v5439_v51  ;;  %3718 = vmatpush3.msra.mxu0 %v5410_v42  ;;  %3753 = vmatpush3.msra.mxu1 %v5415_v25  ;;  %v1717_v57 = vshll.u32 %v7113_v6, %v5316_v37  ;;  %v7116_v56 = vmov 2131351028   ;;  %7118 = vst [vmem:[#allocation33_spill] sm:$0xff] %v5460_v53  ;;  %v7120_v25 = vmov 2102212464  }
 0x124   :  { %v1718_v16 = vshrl.u32 %v7116_v56, %v5375_v35  ;;  %v1133_v39 = vmul.f32 %v1132_v22, %v1127_v36  ;;  %v1139_v50 = vmul.f32 %v1138_v47, %v1127_v36  ;;  %3719 = vmatprep.subr.mxu0 %v7109_v62  ;;  %3754 = vmatprep.subr.mxu1 %v7109_v62  ;;  %vm3385_vm1 = vcmp.lt.s32.totalorder %v3384_v44, 0 }
 0x125   :  { %v1720_v22 = vshll.u32 %v7116_v56, %v5316_v37  ;;  %3720 = vmatpush3.msra.mxu0 %v5434_v48  ;;  %3755 = vmatpush3.msra.mxu1 %v5439_v51  ;;  %v7119_v47 = vmov 683565275   ;;  %v1716_v45 = vor.u32 %v1715_v33, %v1714_v12  ;;  %v1721_v42 = vshrl.u32 %v7120_v25, %v5375_v35  ;;  %v5482_v12 = vld [vmem:[%s7010_s4 + $0x18] sm:$0xff] }
 0x126   :  { %v1713_v36 = vshrl.u32 %v7119_v47, %v5375_v35  ;;  %v1134_v59 = vsel %vm1122_vm5, %v5267_v7, %v1133_v39  ;;  %v1140_v52 = vsel %vm1122_vm5, %v5259_v20, %v1139_v50  ;;  %v1374_v13 = vsel %vm3385_vm1, 0, %v3384_v44  ;;  %3721 = vmatprep.subr.mxu0 %v7109_v62  ;;  %3756 = vmatprep.subr.mxu1 %v7109_v62  ;;  %v5487_v33 = vld [vmem:[%s7009_s3 + $0x18] sm:$0xff] }
 0x127   :  { %7121 = vst [vmem:[#allocation34_spill] sm:$0xff] %v5482_v12  ;;  %7122 = vst [vmem:[#allocation35_spill] sm:$0xff] %v5487_v33  ;;  %v1723_v7 = vshll.u32 %v7120_v25, %v5316_v37  ;;  %v1145_v9 = vmul.f32 %v5194_v24, %v1134_v59  ;;  %v1146_v20 = vmul.f32 %v5194_v24, %v1140_v52  ;;  %vm1305_vm5 = vcmp.lt.s32.totalorder %v4760_v15, 0  ;;  %v5502_v59 = vld [vmem:[%s7010_s4 + $0x10] sm:$0xff] }
 0x128   :  { %v1375_v44 = vsub.s32 32, %v1374_v13  ;;  %v1376_v39 = vshll.u32 %v5320_v49, %v1374_v13  ;;  %3722 = vmatpush3.msra.mxu0 %v5455_v46  ;;  %3757 = vmatpush3.msra.mxu1 %v5460_v53  ;;  %v1379_v50 = vsub.s32 4294967266, %v1374_v13  ;;  %7123 = vst [vmem:[#allocation36_spill] sm:$0xff] %v5502_v59  ;;  %v5507_v24 = vld [vmem:[%s7009_s3 + $0x10] sm:$0xff]  ;;  %v1719_v49 = vor.u32 %v1718_v16, %v1717_v57 }
 0x129   :  { %3723 = vmatprep.subr.mxu0 %v7109_v62  ;;  %3758 = vmatprep.subr.mxu1 %v7109_v62  ;;  %7124 = vst [vmem:[#allocation37_spill] sm:$0xff] %v5507_v24  ;;  %v1722_v52 = vor.u32 %v1721_v42, %v1720_v22  ;;  %v7125_v46 = vmov 920167782   ;;  %v5511_v13 = vadd.f32 %v1149_v38, %v1145_v9  ;;  %vm1729_vm15 = vcmp.lt.s32.totalorder %v5444_v54, 1  ;;  %v5524_v42 = vld [vmem:[%s7010_s4 + $0x8] sm:$0xff] }
 0x12a   :  { %v1724_v53 = vshrl.u32 %v7125_v46, %v5375_v35  ;;  %v5513_v51 = vadd.f32 %v1153_v31, %v1146_v20  ;;  %v1377_v48 = vshrl.u32 %v5356_v34, %v1375_v44  ;;  %3724 = vmatpush3.msra.mxu0 %v5482_v12  ;;  %3759 = vmatpush3.msra.mxu1 %v5487_v33  ;;  %v1380_v1 = vadd.s32 127, %v1379_v50  ;;  %v5529_v34 = vld [vmem:[%s7009_s3 + $0x8] sm:$0xff]  ;;  %v5540_v44 = vpop.permute.xlu0 %2872 }
 0x12b   :  { %3725 = vmatprep.subr.mxu0 %v7109_v62  ;;  %3760 = vmatprep.subr.mxu1 %v7109_v62  ;;  %7126 = vst [vmem:[#allocation38_spill] sm:$0xff] %v5524_v42  ;;  %7127 = vst [vmem:[#allocation39_spill] sm:$0xff] %v5529_v34  ;;  %v1726_v31 = vshll.u32 %v7125_v46, %v5316_v37  ;;  %v7128_v57 = vmov 1326507024   ;;  %v1389_v9 = vsub.s32 4, %v5281_v3  ;;  %vm1731_vm0 = vcmp.lt.s32.totalorder %v5444_v54, 3 }
 0x12c   :  { %v1725_v38 = vor.u32 %v1724_v53, %v1723_v7  ;;  %v1727_v16 = vshrl.u32 %v7128_v57, %v5375_v35  ;;  %v1378_v22 = vor.u32 %v1377_v48, %v1376_v39  ;;  %3726 = vmatpush3.msra.mxu0 %v5502_v59  ;;  %3761 = vmatpush3.msra.mxu1 %v5507_v24  ;;  %vm1732_vm3 = vcmp.lt.s32.totalorder %v5444_v54, 4  ;;  %v5547_v37 = vld [vmem:[%s7010_s4] sm:$0xff] }
 0x12d   :  { %v1381_v20 = vshll.u32 %v1380_v1, 23  ;;  %7129 = vst [vmem:[#allocation40_spill] sm:$0xff] %v5540_v44  ;;  %3727 = vmatprep.subr.mxu0 %v7109_v62  ;;  %3762 = vmatprep.subr.mxu1 %v7109_v62  ;;  %v5552_v35 = vld [vmem:[%s7009_s3] sm:$0xff]  ;;  %vm1730_vm4 = vcmp.lt.s32.totalorder %v5444_v54, 2  ;;  %v1734_v1 = vsel %vm1732_vm3, %v1722_v52, 2102212464  ;;  %v1733_v7 = vsel %vm1729_vm15, %v1713_v36, %v1716_v45 }
 0x12e   :  { %v1728_v48 = vor.u32 %v1727_v16, %v1726_v31  ;;  %v1385_v53 = vcvt.s32.f32 %v1378_v22  ;;  %3728 = vmatpush3.msra.mxu0 %v5524_v42  ;;  %3763 = vmatpush3.msra.mxu1 %v5529_v34  ;;  %v1737_v39 = vsel %vm1729_vm15, %v1716_v45, %v1719_v49  ;;  %v1738_v50 = vsel %vm1732_vm3, %v1725_v38, 920167782  ;;  %v5573_v34 = vpop.eup %4368  ;;  %v5618_v54 = vld [vmem:[%s7007_s1] ss:$0 sm:$0xff] }
 0x12f   :  { %v1382_v31 = vor.u32 4788187, %v1381_v20  ;;  %3729 = vmatprep.subr.mxu0 %v7109_v62  ;;  %3764 = vmatprep.subr.mxu1 %v7109_v62  ;;  %v1735_v16 = vsel %vm1731_vm0, %v1719_v49, %v1734_v1  ;;  %v1739_v22 = vsel %vm1731_vm0, %v1722_v52, %v1738_v50  ;;  %v1741_v36 = vsel %vm1729_vm15, %v1719_v49, %v1722_v52 }
 0x130   :  { %v5577_v45 = vmul.f32 %v5366_v4, %v5540_v44  ;;  %3730 = vmatpush3.msra.mxu0 %v5547_v37  ;;  %3765 = vmatpush3.msra.mxu1 %v5552_v35  ;;  %v1740_v20 = vsel %vm1730_vm4, %v1737_v39, %v1739_v22  ;;  %v1742_v1 = vsel %vm1732_vm3, %v1728_v48, 1326507024  ;;  %v7131_v50 = vor.u32 8388608, %v5419_v58 }
 0x131   :  { %v1383_v49 = vand.u32 2147483647, %v1382_v31  ;;  %v1390_v52 = vsel %vm1305_vm5, %v1389_v9, %v5281_v3  ;;  %v7132_v4 = vand.u32 2139095040, %v5370_v27  ;;  %3731 = vmatprep.mubr.msk.f32.mxu0 %vm4590_vm2, %v7109_v62  ;;  %3766 = vmatprep.mubr.msk.f32.mxu1 %vm4590_vm2, %v7109_v62  ;;  %v1743_v48 = vsel %vm1731_vm0, %v1725_v38, %v1742_v1 }
 0x132   :  { %7130 = vst [vmem:[#allocation41_spill] sm:$0xff] %v5577_v45  ;;  %v1745_v42 = vshll.u32 %v7131_v50, 8  ;;  %3769 = vmatprep.subr.mxu0 %v7109_v62  ;;  %3804 = vmatprep.subr.mxu1 %v7109_v62  ;;  %v1736_v58 = vsel %vm1730_vm4, %v1733_v7, %v1735_v16  ;;  %v1744_v3 = vsel %vm1730_vm4, %v1741_v36, %v1743_v48  ;;  %v1522_v22 = vmul.f32 0.5, %v5192_v19 }
 0x133   :  { %v2489_v44 = vshrl.u32 %v7132_v4, 23  ;;  %v1386_v31 = vmul.f32 %v1385_v53, %v1383_v49  ;;  %3732 = vmatmul.mubr.f32.vlgmr.msra.gmra.mxu0 %v5071_v30  ;;  %3767 = vmatmul.mubr.f32.vlgmr.msra.gmra.mxu1 %v5067_v2  ;;  %v5622_v7 = vmul.f32 %v5618_v54, %v4990_v14  ;;  %v7133_v53 = vand.u32 2147483647, %v4760_v15 }
 0x134   :  { %v5604_v9 = vmul.u32.u64.low %v1745_v42, %v1740_v20  ;;  %v5605_v39 = vmul.u32.u64.high %v1745_v42, %v1740_v20, %v5604_v9  ;;  %v5611_v38 = vmul.u32.u64.low %v1745_v42, %v1744_v3  ;;  %v5612_v1 = vmul.u32.u64.high %v1745_v42, %v1744_v3, %v5611_v38  ;;  %3770 = vmatpush3.msra.mxu0 %v5182_v40  ;;  %3805 = vmatpush3.msra.mxu1 %v5187_v63 }
 0x135   :  { %vm5626_vm6 = vcmp.le.f32.partialorder %v7133_v53, 0.7853982  ;;  %v2882_v2 = vand.u32 2139095040, %v5577_v45  ;;  %v1387_v41 = vxor.u32 2147483648, %v1386_v31  ;;  %3771 = vmatprep.subr.mxu0 %v7109_v62  ;;  %3806 = vmatprep.subr.mxu1 %v7109_v62  ;;  %v1752_v14 = vmul.u32 %v1745_v42, %v1736_v58 }
 0x136   :  { %v1392_v16 = vsel %vm5626_vm6, 0, %v1390_v52  ;;  %v3409_v36 = vadd.s32 4294967169, %v2489_v44  ;;  %3772 = vmatpush3.msra.mxu0 %v5202_v17  ;;  %3807 = vmatpush3.msra.mxu1 %v5207_v0  ;;  %v1755_v20 = vadd.s32 1, %v5605_v39  ;;  %v1907_v50 = vmul.f32 %v5241_v11, %v5241_v11 }
 0x137   :  { %v1908_v49 = vmul.f32 %v4810_v5, %v4810_v5  ;;  %v1388_v52 = vsel %vm1305_vm5, %v1387_v41, %v1386_v31  ;;  %v5647_v4 = vadd.f32 1.0, %v1522_v22  ;;  %v5650_v42 = vmul.f32 0.5, %v4760_v15  ;;  %3773 = vmatprep.subr.mxu0 %v7109_v62  ;;  %3808 = vmatprep.subr.mxu1 %v7109_v62 }
 0x138   :  { %vm1754_vm8 = vc.u32 %v5612_v1, %v5604_v9  ;;  %v1391_v44 = vsel %vm5626_vm6, %v4760_v15, %v1388_v52  ;;  %v1500_v48 = vadd.s32 3, %v1392_v16  ;;  %3774 = vmatpush3.msra.mxu0 %v5223_v21  ;;  %3809 = vmatpush3.msra.mxu1 %v5228_v26  ;;  %v2103_v3 = vsel %vm2102_vm7, %v5336_v43, 0 }
 0x139   :  { %v1756_v58 = vsel %vm1754_vm8, %v1755_v20, %v5605_v39  ;;  %4372 = vcosq.f32 %v1391_v44  ;;  %v5665_v31 = vshrl.u32 %v2882_v2, 23  ;;  %3775 = vmatprep.subr.mxu0 %v7109_v62  ;;  %3810 = vmatprep.subr.mxu1 %v7109_v62  ;;  %v2105_v38 = vand.u32 31, %v2103_v3 }
 0x13a   :  { %v1757_v22 = vadd.s32 %v1756_v58, %v1752_v14  ;;  %4374 = vsinq.f32 %v1391_v44  ;;  %v5669_v53 = vand.u32 3, %v1392_v16  ;;  %v5671_v30 = vadd.s32 1, %v3409_v36  ;;  %3776 = vmatpush3.msra.mxu0 %v5250_v8  ;;  %3811 = vmatpush3.msra.mxu1 %v5255_v18 }
 0x13b   :  { %v5675_v39 = vadd.f32 %v1908_v49, %v1907_v50  ;;  %v5679_v43 = vmul.f32 %v5573_v34, %v5361_v55  ;;  %3777 = vmatprep.subr.mxu0 %v7109_v62  ;;  %3812 = vmatprep.subr.mxu1 %v7109_v62  ;;  %v2106_v16 = vsub.s32 32, %v2105_v38  ;;  %v5684_v14 = vand.u32 3, %v1500_v48 }
 0x13c   :  { %v1758_v2 = vadd.s32 536870912, %v1757_v22  ;;  %3778 = vmatpush3.msra.mxu0 %v5274_v32  ;;  %3813 = vmatpush3.msra.mxu1 %v5279_v29  ;;  %v2111_v36 = vshll.u32 %v7113_v6, %v2105_v38  ;;  %v2114_v20 = vshll.u32 %v7116_v56, %v2105_v38  ;;  %v2120_v55 = vshll.u32 %v7125_v46, %v2105_v38  ;;  %v5717_v29 = vpop.eup %4370 }
 0x13d   :  { %7136 = vst [vmem:[#allocation42_spill] sm:$0xff] %v5675_v39  ;;  %3779 = vmatprep.subr.mxu0 %v7109_v62  ;;  %3814 = vmatprep.subr.mxu1 %v7109_v62  ;;  %v5695_v49 = vshrl.u32 %v2103_v3, 5  ;;  %v2112_v52 = vshrl.u32 %v7116_v56, %v2106_v16  ;;  %v2117_v44 = vshll.u32 %v7120_v25, %v2105_v38  ;;  %vm1910_vm9 = vcmp.lt.f32.partialorder %v5675_v39, 1e-06 }
 0x13e   :  { %v5693_v50 = vshrl.u32 %v1758_v2, 30  ;;  %3780 = vmatpush3.msra.mxu0 %v5296_v23  ;;  %3815 = vmatpush3.msra.mxu1 %v5304_v61  ;;  %v2115_v48 = vshrl.u32 %v7120_v25, %v2106_v16  ;;  %v2118_v58 = vshrl.u32 %v7125_v46, %v2106_v16  ;;  %v2121_v41 = vshrl.u32 %v7128_v57, %v2106_v16 }
 0x13f   :  { %vm1398_vm10 = vcmp.eq.s32.totalorder %v5669_v53, 0  ;;  %3781 = vmatprep.subr.mxu0 %v7109_v62  ;;  %3816 = vmatprep.subr.mxu1 %v7109_v62  ;;  %v7137_v2 = vand.u32 2147483647, %v5009_v10  ;;  %v2108_v61 = vshll.u32 %v7119_v47, %v2105_v38  ;;  %v2109_v23 = vshrl.u32 %v7113_v6, %v2106_v16 }
 0x140   :  { %v1760_v3 = vshll.u32 %v5693_v50, 30  ;;  %vm1397_vm11 = vcmp.lt.s32.totalorder %v5669_v53, 2  ;;  %v1520_v46 = vsub.f32 2.0, %v5679_v43  ;;  %3782 = vmatpush3.msra.mxu0 %v5313_v60  ;;  %3817 = vmatpush3.msra.mxu1 %v5329_v28  ;;  %v2113_v57 = vor.u32 %v2112_v52, %v2111_v36  ;;  %v7138_v43 = vld [vmem:[#allocation24_spill] sm:$0xff]  ;;  %v7140_v52 = vld [vmem:[#allocation26_spill] sm:$0xff] }
 0x141   :  { %v2098_v45 = vand.u32 8388607, %v7137_v2  ;;  %v2116_v25 = vor.u32 %v2115_v48, %v2114_v20  ;;  %v2122_v56 = vor.u32 %v2121_v41, %v2120_v55  ;;  %3783 = vmatprep.subr.mxu0 %v7109_v62  ;;  %3818 = vmatprep.subr.mxu1 %v7109_v62  ;;  %v2119_v2 = vor.u32 %v2118_v58, %v2117_v44  ;;  %v7139_v41 = vld [vmem:[#allocation25_spill] sm:$0xff]  ;;  %v7141_v44 = vld [vmem:[#allocation27_spill] sm:$0xff] }
 0x142   :  { %v5722_v38 = vsub.s32 %v1757_v22, %v1760_v3  ;;  %vm2123_vm13 = vcmp.lt.s32.totalorder %v5695_v49, 1  ;;  %vm2126_vm1 = vcmp.lt.s32.totalorder %v5695_v49, 4  ;;  %vm1401_vm5 = vcmp.eq.s32.totalorder %v5669_v53, 2  ;;  %3784 = vmatpush3.msra.mxu0 %v7138_v43  ;;  %3819 = vmatpush3.msra.mxu1 %v7139_v41  ;;  %v7145_v43 = vld [vmem:[#allocation31_spill] sm:$0xff] }
 0x143   :  { %vm1502_vm15 = vcmp.lt.s32.totalorder %v5684_v14, 2  ;;  %vm1503_vm0 = vcmp.eq.s32.totalorder %v5684_v14, 0  ;;  %v5734_v22 = vsel %vm1910_vm9, 1.0, %v5675_v39  ;;  %3785 = vmatprep.subr.mxu0 %v7109_v62  ;;  %3820 = vmatprep.subr.mxu1 %v7109_v62  ;;  %v2099_v20 = vor.u32 8388608, %v2098_v45  ;;  %v7142_v39 = vld [vmem:[#allocation28_spill] sm:$0xff] }
 0x144   :  { %v1763_v36 = vsub.s32 0, %v5722_v38  ;;  %v2107_v55 = vshrl.u32 %v7119_v47, %v2106_v16  ;;  %vm2125_vm3 = vcmp.lt.s32.totalorder %v5695_v49, 3  ;;  %3786 = vmatpush3.msra.mxu0 %v7140_v52  ;;  %3821 = vmatpush3.msra.mxu1 %v7141_v44  ;;  %v2110_v48 = vor.u32 %v2109_v23, %v2108_v61  ;;  %v7143_v44 = vld [vmem:[#allocation29_spill] sm:$0xff] }
 0x145   :  { %vm2124_vm4 = vcmp.lt.s32.totalorder %v5695_v49, 2  ;;  %v2135_v58 = vsel %vm2123_vm13, %v2113_v57, %v2116_v25  ;;  %v2136_v3 = vsel %vm2126_vm1, %v2122_v56, 1326507024  ;;  %vm1506_vm6 = vcmp.eq.s32.totalorder %v5684_v14, 2  ;;  %3787 = vmatprep.subr.mxu0 %v7109_v62  ;;  %3822 = vmatprep.subr.mxu1 %v7109_v62 }
 0x146   :  { %v5750_v45 = vmul.f32 %v5573_v34, %v1520_v46  ;;  %v3392_v16 = vmin.u32 %v1763_v36, %v5722_v38  ;;  %v2132_v23 = vsel %vm2126_vm1, %v2119_v2, 920167782  ;;  %v4373_v61 = vpop.eup %4372  ;;  %3788 = vmatpush3.msra.mxu0 %v7142_v39  ;;  %3823 = vmatpush3.msra.mxu1 %v7143_v44  ;;  %v1753_v56 = vadd.s32 %v5604_v9, %v5612_v1  ;;  %v7144_v1 = vld [vmem:[#allocation30_spill] sm:$0xff] }
 0x147   :  { %4376 = vrcp.f32 %v5734_v22  ;;  %v2128_v46 = vsel %vm2126_vm1, %v2116_v25, 2102212464  ;;  %v2137_v34 = vsel %vm2125_vm3, %v2119_v2, %v2136_v3  ;;  %v4375_v36 = vpop.eup %4374  ;;  %v1402_v52 = vxor.u32 2147483648, %v4373_v61  ;;  %3789 = vmatprep.subr.mxu0 %v7109_v62  ;;  %3824 = vmatprep.subr.mxu1 %v7109_v62 }
 0x148   :  { %v1765_v41 = vclz %v3392_v16  ;;  %v2138_v44 = vsel %vm2124_vm4, %v2135_v58, %v2137_v34  ;;  %v5770_v39 = vshll.u32 %v2099_v20, 8  ;;  %v1399_v9 = vxor.u32 2147483648, %v4375_v36  ;;  %3790 = vmatpush3.msra.mxu0 %v7144_v1  ;;  %3825 = vmatpush3.msra.mxu1 %v7145_v43  ;;  %v7147_v34 = vld [vmem:[#allocation33_spill] sm:$0xff] }
 0x149   :  { %v2127_v2 = vsel %vm2123_vm13, %v2107_v55, %v2110_v48  ;;  %v2131_v3 = vsel %vm2123_vm13, %v2110_v48, %v2113_v57  ;;  %v2133_v16 = vsel %vm2125_vm3, %v2116_v25, %v2132_v23  ;;  %v1403_v28 = vsel %vm1401_vm5, %v1402_v52, %v4375_v36  ;;  %3791 = vmatprep.subr.mxu0 %v7109_v62  ;;  %v7146_v23 = vld [vmem:[#allocation32_spill] sm:$0xff] }
 0x14a   :  { %v1508_v20 = vsel %vm1506_vm6, %v1402_v52, %v4375_v36  ;;  %v3393_v58 = vadd.s32 4294967294, %v1765_v41  ;;  %3826 = vmatprep.subr.mxu1 %v7109_v62  ;;  %v2129_v55 = vsel %vm2125_vm3, %v2113_v57, %v2128_v46  ;;  %v1400_v48 = vsel %vm1398_vm10, %v4373_v61, %v1399_v9  ;;  %3792 = vmatpush3.msra.mxu0 %v7146_v23 }
 0x14b   :  { %v1505_v25 = vsel %vm1503_vm0, %v4373_v61, %v1399_v9  ;;  %3827 = vmatpush3.msra.mxu1 %v7147_v34  ;;  %v5795_v52 = vmul.u32.u64.low %v5770_v39, %v2138_v44  ;;  %v5796_v41 = vmul.u32.u64.high %v5770_v39, %v2138_v44, %v5795_v52  ;;  %v1404_v36 = vsel %vm1397_vm11, %v1400_v48, %v1403_v28  ;;  %3793 = vmatprep.subr.mxu0 %v7109_v62 }
 0x14c   :  { %v1509_v57 = vsel %vm1502_vm15, %v1505_v25, %v1508_v20  ;;  %vm1699_vm7 = vcmp.lt.s32.totalorder %v4810_v5, 0  ;;  %vm3394_vm8 = vcmp.lt.s32.totalorder %v3393_v58, 0  ;;  %3828 = vmatprep.subr.mxu1 %v7109_v62  ;;  %v2134_v61 = vsel %vm2124_vm4, %v2131_v3, %v2133_v16  ;;  %3794 = vmatpush3.msra.mxu0 %v5482_v12 }
 0x14d   :  { %v1405_v44 = vsel %vm1395_vm12, nan, %v1404_v36  ;;  %v1510_v53 = vsel %vm1395_vm12, nan, %v1509_v57  ;;  %v1768_v28 = vsel %vm3394_vm8, 0, %v3393_v58  ;;  %v1783_v14 = vsub.s32 4, %v5693_v50  ;;  %3829 = vmatpush3.msra.mxu1 %v5487_v33  ;;  %3795 = vmatprep.subr.mxu0 %v7109_v62 }
 0x14e   :  { %v1406_v46 = vmul.f32 %v5717_v29, %v1405_v44  ;;  %v1511_v9 = vmul.f32 %v5717_v29, %v1510_v53  ;;  %v1769_v20 = vsub.s32 32, %v1768_v28  ;;  %v2130_v3 = vsel %vm2124_vm4, %v2127_v2, %v2129_v55  ;;  %3830 = vmatprep.subr.mxu1 %v7109_v62  ;;  %3796 = vmatpush3.msra.mxu0 %v5502_v59  ;;  %v7149_v59 = vld [vmem:[#allocation39_spill] sm:$0xff] }
 0x14f   :  { %v1770_v16 = vshll.u32 %v5722_v38, %v1768_v28  ;;  %v1773_v58 = vsub.s32 4294967266, %v1768_v28  ;;  %v5822_v48 = vmul.u32.u64.low %v5770_v39, %v2134_v61  ;;  %v5823_v25 = vmul.u32.u64.high %v5770_v39, %v2134_v61, %v5822_v48  ;;  %3831 = vmatpush3.msra.mxu1 %v5507_v24  ;;  %3797 = vmatprep.subr.mxu0 %v7109_v62  ;;  %v7148_v61 = vld [vmem:[#allocation38_spill] sm:$0xff] }
 0x150   :  { %v3390_v29 = vadd.f32 -1.0, %v1406_v46  ;;  %v1525_v49 = vmul.f32 %v1511_v9, %v4760_v15  ;;  %v1530_v2 = vmul.f32 %v1511_v9, %v5192_v19  ;;  %v5831_v55 = vmul.f32 %v1406_v46, %v5511_v13  ;;  %3832 = vmatprep.subr.mxu1 %v7109_v62  ;;  %3798 = vmatpush3.msra.mxu0 %v7148_v61 }
 0x151   :  { %v1542_v38 = vmul.f32 %v1511_v9, %v5513_v51  ;;  %v1545_v52 = vmul.f32 %v1511_v9, %v5511_v13  ;;  %v1546_v36 = vmul.f32 %v1406_v46, %v5513_v51  ;;  %v1771_v57 = vshrl.u32 %v1753_v56, %v1769_v20  ;;  %3833 = vmatpush3.msra.mxu1 %v7149_v59 }
 0x152   :  { %v1524_v44 = vmul.f32 %v3390_v29, %v5192_v19  ;;  %v1531_v53 = vmul.f32 %v3390_v29, %v4760_v15  ;;  %v1774_v28 = vadd.s32 127, %v1773_v58  ;;  %v2146_v24 = vmul.u32 %v5770_v39, %v2130_v3  ;;  %3799 = vmatprep.subr.mxu0 %v7109_v62  ;;  %3834 = vmatprep.subr.mxu1 %v7109_v62 }
 0x153   :  { %v1543_v33 = vsub.f32 %v5831_v55, %v1542_v38  ;;  %v1547_v12 = vadd.f32 %v1546_v36, %v1545_v52  ;;  %v1772_v9 = vor.u32 %v1771_v57, %v1770_v16  ;;  %vm2148_vm10 = vc.u32 %v5796_v41, %v5822_v48  ;;  %3800 = vmatpush3.msra.mxu0 %v5547_v37  ;;  %v7151_v55 = vld [vmem:[#allocation15_spill] sm:$0xff] }
 0x154   :  { %v5848_v56 = vpop.eup %4376  ;;  %v1526_v19 = vadd.f32 %v1525_v49, %v1524_v44  ;;  %v1532_v15 = vsub.f32 %v1530_v2, %v1531_v53  ;;  %v1775_v46 = vshll.u32 %v1774_v28, 23  ;;  %v2149_v39 = vadd.s32 1, %v5823_v25  ;;  %3801 = vmatprep.mubr.msk.f32.mxu0 %vm4590_vm2, %v7109_v62  ;;  %3835 = vmatpush3.msra.mxu1 %v5552_v35 }
 0x155   :  { %v1779_v20 = vcvt.s32.f32 %v1772_v9  ;;  %v1784_v3 = vsel %vm1699_vm7, %v1783_v14, %v5693_v50  ;;  %v2301_v16 = vmul.f32 %v5622_v7, %v5622_v7  ;;  %v2302_v58 = vmul.f32 %v5009_v10, %v5009_v10  ;;  %3836 = vmatprep.mubr.msk.f32.mxu1 %vm4590_vm2, %v7109_v62  ;;  %v7150_v14 = vld [vmem:[#allocation16_spill] sm:$0xff]  ;;  %3839 = vmatprep.subr.mxu0 %v7109_v62 }
 0x156   :  { %v1527_v29 = vmul.f32 %v1526_v19, %v5750_v45  ;;  %v1533_v49 = vmul.f32 %v1532_v15, %v5750_v45  ;;  %v1776_v2 = vor.u32 4788187, %v1775_v46  ;;  %v2150_v50 = vsel %vm2148_vm10, %v2149_v39, %v5823_v25  ;;  %3802 = vmatmul.mubr.f32.vlgmr.msra.gmra.mxu0 %v7150_v14  ;;  %3837 = vmatmul.mubr.f32.vlgmr.msra.gmra.mxu1 %v7151_v55 }
 0x157   :  { %v1695_v38 = vmul.f32 1.442695, %v5241_v11  ;;  %v2089_v52 = vmul.f32 1.442695, %v5622_v7  ;;  %v3418_v36 = vadd.s32 4294967169, %v5665_v31  ;;  %v2151_v57 = vadd.s32 %v2150_v50, %v2146_v24  ;;  %3874 = vmatprep.subr.mxu1 %v7109_v62  ;;  %3840 = vmatpush3.msra.mxu0 %v5182_v40  ;;  %v7156_v24 = vld [vmem:[#allocation17_spill] sm:$0xff] }
 0x158   :  { %v1528_v44 = vsel %vm1516_vm14, %v5647_v4, %v1527_v29  ;;  %v1534_v25 = vsel %vm1516_vm14, %v5650_v42, %v1533_v49  ;;  %v7153_v53 = vand.u32 2147483647, %v4810_v5  ;;  %v1777_v31 = vand.u32 2147483647, %v1776_v2  ;;  %3875 = vmatpush3.msra.mxu1 %v5187_v63  ;;  %3841 = vmatprep.subr.mxu0 %v7109_v62 }
 0x159   :  { %v1539_v9 = vmul.f32 %v7156_v24, %v1528_v44  ;;  %v1540_v19 = vmul.f32 %v7156_v24, %v1534_v25  ;;  %v2152_v15 = vadd.s32 536870912, %v2151_v57  ;;  %3876 = vmatprep.subr.mxu1 %v7109_v62  ;;  %v5897_v46 = vadd.f32 %v2302_v58, %v2301_v16  ;;  %3842 = vmatpush3.msra.mxu0 %v5202_v17  ;;  %v7157_v17 = vld [vmem:[#allocation22_spill] sm:$0xff] }
 0x15a   :  { %vm5885_vm11 = vcmp.le.f32.partialorder %v7153_v53, 0.7853982  ;;  %v1780_v42 = vmul.f32 %v1779_v20, %v1777_v31  ;;  %vm2496_vm14 = vcmp.gt.s32.totalorder %v5671_v30, 0  ;;  %3877 = vmatpush3.msra.mxu1 %v5207_v0  ;;  %3843 = vmatprep.subr.mxu0 %v7109_v62  ;;  %4378 = vpow2.f32 %v1695_v38 }
 0x15b   :  { %v1786_v4 = vsel %vm5885_vm11, 0, %v1784_v3  ;;  %v5902_v40 = vadd.f32 %v1543_v33, %v1539_v9  ;;  %v5904_v63 = vadd.f32 %v1547_v12, %v1540_v19  ;;  %v5906_v39 = vshrl.u32 %v2152_v15, 30  ;;  %3878 = vmatprep.subr.mxu1 %v7109_v62  ;;  %3844 = vmatpush3.msra.mxu0 %v5223_v21  ;;  %v7161_v9 = vld [vmem:[#allocation20_spill] sm:$0xff]  ;;  %v7162_v19 = vld [vmem:[#allocation21_spill] sm:$0xff] }
 0x15c   :  { %v2497_v3 = vsel %vm2496_vm14, %v5671_v30, 0  ;;  %v1781_v20 = vxor.u32 2147483648, %v1780_v42  ;;  %v1894_v16 = vadd.s32 3, %v1786_v4  ;;  %3879 = vmatpush3.msra.mxu1 %v5228_v26  ;;  %4380 = vpow2.f32 %v2089_v52  ;;  %3845 = vmatprep.subr.mxu0 %v7109_v62  ;;  %v7158_v52 = vld [vmem:[#allocation18_spill] sm:$0xff] }
 0x15d   :  { %v2499_v58 = vand.u32 31, %v2497_v3  ;;  %v5915_v0 = vmul.f32 %v5618_v54, %v7157_v17  ;;  %v5917_v12 = vadd.s32 1, %v3418_v36  ;;  %v2154_v33 = vshll.u32 %v5906_v39, 30  ;;  %3880 = vmatprep.subr.mxu1 %v7109_v62  ;;  %3846 = vmatpush3.msra.mxu0 %v5250_v8 }
 0x15e   :  { %v1782_v30 = vsel %vm1699_vm7, %v1781_v20, %v1780_v42  ;;  %v5925_v21 = vmul.f32 0.5, %v5241_v11  ;;  %vm2304_vm12 = vcmp.lt.f32.partialorder %v5897_v46, 1e-06  ;;  %3881 = vmatpush3.msra.mxu1 %v5255_v18  ;;  %v5933_v29 = vand.u32 3, %v1786_v4  ;;  %3847 = vmatprep.subr.mxu0 %v7109_v62 }
 0x15f   :  { %v2500_v26 = vsub.s32 32, %v2499_v58  ;;  %v1785_v54 = vsel %vm5885_vm11, %v4810_v5, %v1782_v30  ;;  %v5935_v49 = vsub.s32 %v2151_v57, %v2154_v33  ;;  %v7080_v2 = vand.u32 2147483647, %v5370_v27  ;;  %3882 = vmatprep.subr.mxu1 %v7109_v62  ;;  %3848 = vmatpush3.msra.mxu0 %v5274_v32 }
 0x160   :  { %4382 = vcosq.f32 %v1785_v54  ;;  %v5939_v50 = vand.u32 3, %v1894_v16  ;;  %v2502_v14 = vshll.u32 %v7119_v47, %v2499_v58  ;;  %v5949_v55 = vsel %vm2304_vm12, 1.0, %v5897_v46  ;;  %3883 = vmatpush3.msra.mxu1 %v7158_v52  ;;  %3849 = vmatprep.subr.mxu0 %v7109_v62 }
 0x161   :  { %v2503_v8 = vshrl.u32 %v7113_v6, %v2500_v26  ;;  %4384 = vsinq.f32 %v1785_v54  ;;  %v2157_v18 = vsub.s32 0, %v5935_v49  ;;  %v2505_v38 = vshll.u32 %v7113_v6, %v2499_v58  ;;  %3884 = vmatprep.subr.mxu1 %v7109_v62  ;;  %3850 = vmatpush3.msra.mxu0 %v7161_v9 }
 0x162   :  { %v5954_v36 = vshrl.u32 %v2497_v3, 5  ;;  %v7159_v57 = vmov 2131351028   ;;  %v7160_v44 = vmov 2102212464   ;;  %v5961_v53 = vmul.f32 0.5, %v4810_v5  ;;  %3885 = vmatpush3.msra.mxu1 %v7162_v19  ;;  %3851 = vmatprep.subr.mxu0 %v7109_v62 }
 0x163   :  { %v2506_v45 = vshrl.u32 %v7159_v57, %v2500_v26  ;;  %v2508_v32 = vshll.u32 %v7159_v57, %v2499_v58  ;;  %v2509_v25 = vshrl.u32 %v7160_v44, %v2500_v26  ;;  %v3401_v28 = vmin.u32 %v2157_v18, %v5935_v49  ;;  %3886 = vmatprep.subr.mxu1 %v7109_v62 }
 0x164   :  { %v5966_v31 = vand.u32 8388607, %v7080_v2  ;;  %v2511_v24 = vshll.u32 %v7160_v44, %v2499_v58  ;;  %v5973_v4 = vmul.f32 %v5848_v56, %v5734_v22  ;;  %4386 = vrcp.f32 %v5949_v55  ;;  %3852 = vmatpush3.msra.mxu0 %v5313_v60  ;;  %v7165_v22 = vld [vmem:[#allocation23_spill] sm:$0xff]  ;;  %3871 = vmatprep.mubr.msk.f32.mxu0 %vm4590_vm2, %v7109_v62  ;;  %v6434_v2 = vld [vmem:[%s7009_s3 + $0x20] sm:$0xff] }
 0x165   :  { %v2504_v15 = vor.u32 %v2503_v8, %v2502_v14  ;;  %v7163_v42 = vmov 920167782   ;;  %vm1795_vm13 = vcmp.eq.s32.totalorder %v5933_v29, 2  ;;  %v2159_v20 = vclz %v3401_v28  ;;  %3887 = vmatpush3.msra.mxu1 %v7165_v22  ;;  %3853 = vmatprep.subr.mxu0 %v7109_v62  ;;  %v7169_v28 = vld [vmem:[#allocation27_spill] sm:$0xff] }
 0x166   :  { %v2512_v3 = vshrl.u32 %v7163_v42, %v2500_v26  ;;  %v2507_v16 = vor.u32 %v2506_v45, %v2505_v38  ;;  %v2514_v17 = vshll.u32 %v7163_v42, %v2499_v58  ;;  %v7164_v33 = vmov 1326507024   ;;  %3888 = vmatprep.subr.mxu1 %v7109_v62  ;;  %v7166_v38 = vld [vmem:[#allocation24_spill] sm:$0xff]  ;;  %3906 = vmatprep.mubr.msk.f32.mxu1 %vm4590_vm2, %v7109_v62 }
 0x167   :  { %v2515_v30 = vshrl.u32 %v7164_v33, %v2500_v26  ;;  %vm1792_vm1 = vcmp.eq.s32.totalorder %v5933_v29, 0  ;;  %vm1897_vm5 = vcmp.eq.s32.totalorder %v5939_v50, 0  ;;  %vm1900_vm15 = vcmp.eq.s32.totalorder %v5939_v50, 2  ;;  %3854 = vmatpush3.msra.mxu0 %v7166_v38  ;;  %v7170_v38 = vld [vmem:[#allocation28_spill] sm:$0xff] }
 0x168   :  { %v2501_v54 = vshrl.u32 %v7119_v47, %v2500_v26  ;;  %v2510_v14 = vor.u32 %v2509_v25, %v2508_v32  ;;  %vm2517_vm0 = vcmp.lt.s32.totalorder %v5954_v36, 1  ;;  %vm1791_vm3 = vcmp.lt.s32.totalorder %v5933_v29, 2  ;;  %v7167_v26 = vld [vmem:[#allocation25_spill] sm:$0xff]  ;;  %3855 = vmatprep.subr.mxu0 %v7109_v62  ;;  %v7168_v25 = vld [vmem:[#allocation26_spill] sm:$0xff] }
 0x169   :  { %vm1896_vm4 = vcmp.lt.s32.totalorder %v5939_v50, 2  ;;  %v2147_v60 = vadd.s32 %v5822_v48, %v5796_v41  ;;  %v3402_v58 = vadd.s32 4294967294, %v2159_v20  ;;  %v2493_v8 = vor.u32 8388608, %v5966_v31  ;;  %3889 = vmatpush3.msra.mxu1 %v7167_v26  ;;  %v6004_v41 = vpop.eup %4378  ;;  %3856 = vmatpush3.msra.mxu0 %v7168_v25 }
 0x16a   :  { %v2513_v18 = vor.u32 %v2512_v3, %v2511_v24  ;;  %vm1789_vm6 = vweird.f32 %v4810_v5  ;;  %v2516_v52 = vor.u32 %v2515_v30, %v2514_v17  ;;  %vm2518_vm7 = vcmp.lt.s32.totalorder %v5954_v36, 2  ;;  %3890 = vmatprep.subr.mxu1 %v7109_v62  ;;  %v6015_v31 = vpop.eup %4380  ;;  %3857 = vmatprep.subr.mxu0 %v7109_v62 }
 0x16b   :  { %vm2519_vm8 = vcmp.lt.s32.totalorder %v5954_v36, 3  ;;  %vm2520_vm10 = vcmp.lt.s32.totalorder %v5954_v36, 4  ;;  %vm2093_vm11 = vcmp.lt.s32.totalorder %v5009_v10, 0  ;;  %vm3403_vm14 = vcmp.lt.s32.totalorder %v3402_v58, 0  ;;  %3891 = vmatpush3.msra.mxu1 %v7169_v28  ;;  %3858 = vmatpush3.msra.mxu0 %v7170_v38 }
 0x16c   :  { %v2522_v48 = vsel %vm2520_vm10, %v2510_v14, 2102212464  ;;  %v2525_v45 = vsel %vm2517_vm0, %v2504_v15, %v2507_v16  ;;  %v2526_v32 = vsel %vm2520_vm10, %v2513_v18, 920167782  ;;  %v1914_v24 = vsub.f32 2.0, %v5973_v4  ;;  %3892 = vmatprep.subr.mxu1 %v7109_v62  ;;  %v7171_v4 = vld [vmem:[#allocation29_spill] sm:$0xff]  ;;  %3859 = vmatprep.subr.mxu0 %v7109_v62 }
 0x16d   :  { %v2162_v9 = vsel %vm3403_vm14, 0, %v3402_v58  ;;  %v2521_v19 = vsel %vm2517_vm0, %v2501_v54, %v2504_v15  ;;  %v2527_v3 = vsel %vm2519_vm8, %v2510_v14, %v2526_v32  ;;  %v2523_v22 = vsel %vm2519_vm8, %v2507_v16, %v2522_v48  ;;  %3893 = vmatpush3.msra.mxu1 %v7171_v4  ;;  %v4383_v32 = vpop.eup %4382  ;;  %3860 = vmatpush3.msra.mxu0 %v7144_v1  ;;  %v6154_v54 = vld [vmem:[%s7010_s4 + $0x78] sm:$0xff] }
 0x16e   :  { %v2163_v20 = vsub.s32 32, %v2162_v9  ;;  %v2164_v17 = vshll.u32 %v5935_v49, %v2162_v9  ;;  %v2167_v30 = vsub.s32 4294967266, %v2162_v9  ;;  %v7172_v15 = vand.u32 2147483647, %v5009_v10  ;;  %3894 = vmatprep.subr.mxu1 %v7109_v62  ;;  %3861 = vmatprep.subr.mxu0 %v7109_v62 }
 0x16f   :  { %v2528_v58 = vsel %vm2518_vm7, %v2525_v45, %v2527_v3  ;;  %v2529_v49 = vsel %vm2517_vm0, %v2507_v16, %v2510_v14  ;;  %v2530_v26 = vsel %vm2520_vm10, %v2516_v52, 1326507024  ;;  %v6041_v48 = vshll.u32 %v2493_v8, 8  ;;  %3895 = vmatpush3.msra.mxu1 %v7145_v43  ;;  %v4385_v16 = vpop.eup %4384  ;;  %3862 = vmatpush3.msra.mxu0 %v7146_v23 }
 0x170   :  { %vm6031_vm14 = vcmp.le.f32.partialorder %v7172_v15, 0.7853982  ;;  %v2165_v25 = vshrl.u32 %v2147_v60, %v2163_v20  ;;  %v2168_v28 = vadd.s32 127, %v2167_v30  ;;  %v2177_v9 = vsub.s32 4, %v5906_v39  ;;  %3896 = vmatprep.subr.mxu1 %v7109_v62  ;;  %3863 = vmatprep.subr.mxu0 %v7109_v62  ;;  %v7176_v15 = vld [vmem:[#allocation35_spill] sm:$0xff] }
 0x171   :  { %v2531_v45 = vsel %vm2519_vm8, %v2513_v18, %v2530_v26  ;;  %v1796_v14 = vxor.u32 2147483648, %v4383_v32  ;;  %v6053_v52 = vmul.u32.u64.low %v6041_v48, %v2528_v58  ;;  %v6054_v3 = vmul.u32.u64.high %v6041_v48, %v2528_v58, %v6053_v52  ;;  %3897 = vmatpush3.msra.mxu1 %v7147_v34  ;;  %v6073_v36 = vpop.eup %4386 }
 0x172   :  { %v2532_v8 = vsel %vm2518_vm7, %v2529_v49, %v2531_v45  ;;  %v1793_v60 = vxor.u32 2147483648, %v4385_v16  ;;  %v2166_v18 = vor.u32 %v2165_v25, %v2164_v17  ;;  %v2169_v20 = vshll.u32 %v2168_v28, 23  ;;  %3898 = vmatprep.subr.mxu1 %v7109_v62  ;;  %v7177_v45 = vld [vmem:[#allocation36_spill] sm:$0xff] }
 0x173   :  { %v2524_v43 = vsel %vm2518_vm7, %v2521_v19, %v2523_v22  ;;  %v1797_v1 = vsel %vm1795_vm13, %v1796_v14, %v4385_v16  ;;  %v1902_v30 = vsel %vm1900_vm15, %v1796_v14, %v4385_v16  ;;  %v7175_v22 = vld [vmem:[#allocation34_spill] sm:$0xff]  ;;  %3899 = vmatpush3.msra.mxu1 %v7176_v15  ;;  %v2178_v26 = vsel %vm2093_vm11, %v2177_v9, %v5906_v39  ;;  %v7178_v16 = vld [vmem:[#allocation37_spill] sm:$0xff] }
 0x174   :  { %v6068_v38 = vmul.u32.u64.low %v6041_v48, %v2532_v8  ;;  %v6069_v4 = vmul.u32.u64.high %v6041_v48, %v2532_v8, %v6068_v38  ;;  %v1794_v23 = vsel %vm1792_vm1, %v4383_v32, %v1793_v60  ;;  %v1899_v34 = vsel %vm1897_vm5, %v4383_v32, %v1793_v60  ;;  %3864 = vmatpush3.msra.mxu0 %v7175_v22  ;;  %3900 = vmatprep.subr.mxu1 %v7109_v62  ;;  %v7179_v15 = vld [vmem:[#allocation41_spill] sm:$0xff] }
 0x175   :  { %v2170_v19 = vor.u32 4788187, %v2169_v20  ;;  %v2173_v17 = vcvt.s32.f32 %v2166_v18  ;;  %v1798_v58 = vsel %vm1791_vm3, %v1794_v23, %v1797_v1  ;;  %v1903_v49 = vsel %vm1896_vm4, %v1899_v34, %v1902_v30  ;;  %3865 = vmatprep.subr.mxu0 %v7109_v62  ;;  %3901 = vmatpush3.msra.mxu1 %v7178_v16 }
 0x176   :  { %v2543_v25 = vadd.s32 1, %v6054_v3  ;;  %v1799_v32 = vsel %vm1789_vm6, nan, %v1798_v58  ;;  %v1904_v29 = vsel %vm1789_vm6, nan, %v1903_v49  ;;  %v1915_v28 = vmul.f32 %v5848_v56, %v1914_v24  ;;  %3866 = vmatpush3.msra.mxu0 %v7177_v45  ;;  %3902 = vmatprep.subr.mxu1 %v7109_v62 }
 0x177   :  { %v2171_v50 = vand.u32 2147483647, %v2170_v19  ;;  %v1800_v39 = vmul.f32 %v6004_v41, %v1799_v32  ;;  %v1905_v9 = vmul.f32 %v6004_v41, %v1904_v29  ;;  %v2540_v14 = vmul.u32 %v6041_v48, %v2524_v43  ;;  %3867 = vmatprep.subr.mxu0 %v7109_v62  ;;  %3903 = vmatpush3.msra.mxu1 %v7149_v59 }
 0x178   :  { %vm2542_vm13 = vc.u32 %v6069_v4, %v6053_v52  ;;  %v2180_v56 = vsel %vm6031_vm14, 0, %v2178_v26  ;;  %v6108_v24 = vmul.f32 %v6073_v36, %v5949_v55  ;;  %3868 = vmatpush3.msra.mxu0 %v7148_v61  ;;  %3904 = vmatprep.subr.mxu1 %v7109_v62  ;;  %v1917_v1 = vadd.f32 1.0, %v5925_v21 }
 0x179   :  { %v2174_v8 = vmul.f32 %v2173_v17, %v2171_v50  ;;  %v2544_v60 = vsel %vm2542_vm13, %v2543_v25, %v6054_v3  ;;  %v3399_v41 = vadd.f32 -1.0, %v1800_v39  ;;  %v1919_v48 = vmul.f32 %v1905_v9, %v4810_v5  ;;  %3869 = vmatprep.subr.mxu0 %v7109_v62  ;;  %3905 = vmatpush3.msra.mxu1 %v5552_v35  ;;  %v6162_v25 = vld [vmem:[%s7009_s3 + $0x78] sm:$0xff] }
 0x17a   :  { %v1924_v18 = vmul.f32 %v1905_v9, %v5241_v11  ;;  %v6116_v20 = vmul.f32 %v1800_v39, %v5902_v40  ;;  %v6121_v55 = vmul.f32 %v1905_v9, %v5904_v63  ;;  %v1939_v3 = vmul.f32 %v1905_v9, %v5902_v40  ;;  %3870 = vmatpush3.msra.mxu0 %v5547_v37 }
 0x17b   :  { %v1940_v43 = vmul.f32 %v1800_v39, %v5904_v63  ;;  %v2175_v61 = vxor.u32 2147483648, %v2174_v8  ;;  %v1918_v30 = vmul.f32 %v3399_v41, %v5241_v11  ;;  %v1925_v59 = vmul.f32 %v3399_v41, %v4810_v5  ;;  %3872 = vmatmul.mubr.f32.vlgmr.msra.gmra.mxu0 %v5513_v51  ;;  %3907 = vmatmul.mubr.f32.vlgmr.msra.gmra.mxu1 %v5511_v13  ;;  %v1931_v13 = vpop.permute.xlu1 %1930 }
 0x17c   :  { %v2545_v38 = vadd.s32 %v2544_v60, %v2540_v14  ;;  %v1937_v23 = vsub.f32 %v6116_v20, %v6121_v55  ;;  %v2288_v37 = vadd.s32 3, %v2180_v56  ;;  %3909 = vmatprep.subr.mxu0 %v7109_v62  ;;  %v2695_v17 = vmul.f32 %v5915_v0, %v5915_v0  ;;  %3944 = vmatprep.subr.mxu1 %v7109_v62  ;;  %v6210_v55 = vld [vmem:[%s7009_s3 + $0x68] sm:$0xff] }
 0x17d   :  { %v1941_v34 = vadd.f32 %v1940_v43, %v1939_v3  ;;  %v2176_v19 = vsel %vm2093_vm11, %v2175_v61, %v2174_v8  ;;  %v1920_v5 = vadd.f32 %v1919_v48, %v1918_v30  ;;  %v1926_v11 = vsub.f32 %v1924_v18, %v1925_v59  ;;  %3910 = vmatpush3.msra.mxu0 %v6154_v54  ;;  %v6189_v8 = vld [vmem:[%s7009_s3 + $0x70] sm:$0xff] }
 0x17e   :  { %v2179_v21 = vsel %vm6031_vm14, %v5009_v10, %v2176_v19  ;;  %v2546_v35 = vadd.s32 536870912, %v2545_v38  ;;  %v2696_v22 = vmul.f32 %v5370_v27, %v5370_v27  ;;  %v7079_v51 = vand.u32 2147483647, %v7179_v15  ;;  %3945 = vmatpush3.msra.mxu1 %v6162_v25  ;;  %3911 = vmatprep.subr.mxu0 %v7109_v62 }
 0x17f   :  { %4388 = vcosq.f32 %v2179_v21  ;;  %v1921_v58 = vmul.f32 %v1920_v5, %v1915_v28  ;;  %v1927_v49 = vmul.f32 %v1926_v11, %v1915_v28  ;;  %v6166_v32 = vand.u32 3, %v2180_v56  ;;  %3946 = vmatprep.subr.mxu1 %v7109_v62  ;;  %v6176_v28 = vld [vmem:[%s7010_s4 + $0x70] sm:$0xff]  ;;  %v6255_v11 = vld [vmem:[%s7010_s4 + $0x58] sm:$0xff]  ;;  %3941 = vmatprep.mubr.msk.f32.mxu0 %vm4590_vm2, %v7109_v62 }
 0x180   :  { %4390 = vsinq.f32 %v2179_v21  ;;  %v6157_v26 = vshrl.u32 %v2546_v35, 30  ;;  %v6168_v29 = vand.u32 3, %v2288_v37  ;;  %v2310_v50 = vmul.f32 0.5, %v5622_v7  ;;  %3912 = vmatpush3.msra.mxu0 %v6176_v28  ;;  %3947 = vmatpush3.msra.mxu1 %v6189_v8 }
 0x181   :  { %vm2890_vm1 = vcmp.gt.s32.totalorder %v5917_v12, 0  ;;  %v1922_v16 = vsel %vm1910_vm9, %v1917_v1, %v1921_v58  ;;  %v1928_v39 = vsel %vm1910_vm9, %v5961_v53, %v1927_v49  ;;  %v2308_v9 = vsub.f32 2.0, %v6108_v24  ;;  %3913 = vmatprep.subr.mxu0 %v7109_v62  ;;  %3948 = vmatprep.subr.mxu1 %v7109_v62  ;;  %v6200_v53 = vld [vmem:[%s7010_s4 + $0x68] sm:$0xff]  ;;  %v6227_v1 = vld [vmem:[%s7010_s4 + $0x60] sm:$0xff] }
 0x182   :  { %v2548_v14 = vshll.u32 %v6157_v26, 30  ;;  %v1933_v56 = vmul.f32 %v1931_v13, %v1922_v16  ;;  %v1934_v60 = vmul.f32 %v1931_v13, %v1928_v39  ;;  %v6193_v41 = vadd.f32 %v2696_v22, %v2695_v17  ;;  %3914 = vmatpush3.msra.mxu0 %v6200_v53  ;;  %3949 = vmatpush3.msra.mxu1 %v6210_v55 }
 0x183   :  { %v2891_v48 = vsel %vm2890_vm1, %v5917_v12, 0  ;;  %v2886_v18 = vand.u32 8388607, %v7079_v51  ;;  %3915 = vmatprep.subr.mxu0 %v7109_v62  ;;  %v6218_v43 = vadd.f32 1.0, %v2310_v50  ;;  %v6221_v61 = vmul.f32 0.5, %v5009_v10  ;;  %3950 = vmatprep.subr.mxu1 %v7109_v62  ;;  %v6276_v50 = vld [vmem:[%s7010_s4 + $0x50] sm:$0xff] }
 0x184   :  { %7181 = vst [vmem:[#allocation30_spill] sm:$0xff] %v6193_v41  ;;  %v6203_v24 = vsub.s32 %v2545_v38, %v2548_v14  ;;  %v2893_v20 = vand.u32 31, %v2891_v48  ;;  %v6214_v12 = vadd.f32 %v1937_v23, %v1933_v56  ;;  %v6216_v3 = vadd.f32 %v1941_v34, %v1934_v60  ;;  %3916 = vmatpush3.msra.mxu0 %v6227_v1  ;;  %v6237_v38 = vld [vmem:[%s7009_s3 + $0x60] sm:$0xff]  ;;  %v6312_v60 = vld [vmem:[%s7009_s3 + $0x48] sm:$0xff] }
 0x185   :  { %vm2185_vm9 = vcmp.lt.s32.totalorder %v6166_v32, 2  ;;  %vm2186_vm5 = vcmp.eq.s32.totalorder %v6166_v32, 0  ;;  %vm2189_vm15 = vcmp.eq.s32.totalorder %v6166_v32, 2  ;;  %3951 = vmatpush3.msra.mxu1 %v6237_v38  ;;  %3917 = vmatprep.subr.mxu0 %v7109_v62  ;;  %vm2183_vm0 = vweird.f32 %v5009_v10  ;;  %v6378_v32 = vld [vmem:[%s7010_s4 + $0x30] sm:$0xff] }
 0x186   :  { %7182 = vst [vmem:[#allocation31_spill] sm:$0xff] %v6214_v12  ;;  %7183 = vst [vmem:[#allocation32_spill] sm:$0xff] %v6216_v3  ;;  %v2551_v30 = vsub.s32 0, %v6203_v24  ;;  %v2894_v59 = vsub.s32 32, %v2893_v20  ;;  %vm2290_vm3 = vcmp.lt.s32.totalorder %v6168_v29, 2  ;;  %vm2291_vm4 = vcmp.eq.s32.totalorder %v6168_v29, 0  ;;  %3952 = vmatprep.subr.mxu1 %v7109_v62  ;;  %3918 = vmatpush3.msra.mxu0 %v6255_v11 }
 0x187   :  { %v6245_v23 = vmul.f32 %v6073_v36, %v2308_v9  ;;  %vm2698_vm6 = vcmp.lt.f32.partialorder %v6193_v41, 1e-06  ;;  %v2887_v19 = vor.u32 8388608, %v2886_v18  ;;  %v2896_v37 = vshll.u32 %v7119_v47, %v2893_v20  ;;  %v6261_v36 = vld [vmem:[%s7009_s3 + $0x58] sm:$0xff]  ;;  %3919 = vmatprep.subr.mxu0 %v7109_v62  ;;  %3976 = vmatprep.mubr.msk.f32.mxu1 %vm4590_vm2, %v7109_v62 }
 0x188   :  { %v3410_v34 = vmin.u32 %v2551_v30, %v6203_v24  ;;  %v2899_v5 = vshll.u32 %v7113_v6, %v2893_v20  ;;  %3953 = vmatpush3.msra.mxu1 %v6261_v36  ;;  %vm2294_vm7 = vcmp.eq.s32.totalorder %v6168_v29, 2  ;;  %v2897_v21 = vshrl.u32 %v7113_v6, %v2894_v59  ;;  %3920 = vmatpush3.msra.mxu0 %v6276_v50  ;;  %v6282_v6 = vld [vmem:[%s7009_s3 + $0x50] sm:$0xff] }
 0x189   :  { %v2900_v35 = vshrl.u32 %v7159_v57, %v2894_v59  ;;  %v2902_v17 = vshll.u32 %v7159_v57, %v2893_v20  ;;  %3954 = vmatprep.subr.mxu1 %v7109_v62  ;;  %v2903_v13 = vshrl.u32 %v7160_v44, %v2894_v59  ;;  %v2905_v58 = vshll.u32 %v7160_v44, %v2893_v20  ;;  %v6384_v29 = vld [vmem:[%s7009_s3 + $0x30] sm:$0xff]  ;;  %v6428_v44 = vld [vmem:[%s7010_s4 + $0x20] sm:$0xff] }
 0x18a   :  { %v2553_v22 = vclz %v3410_v34  ;;  %v2906_v49 = vshrl.u32 %v7163_v42, %v2894_v59  ;;  %3955 = vmatpush3.msra.mxu1 %v6282_v6  ;;  %v2541_v57 = vadd.s32 %v6053_v52, %v6069_v4  ;;  %v6291_v45 = vsel %vm2698_vm6, 1.0, %v6193_v41  ;;  %3921 = vmatprep.subr.mxu0 %v7109_v62  ;;  %v6306_v4 = vld [vmem:[%s7010_s4 + $0x48] sm:$0xff] }
 0x18b   :  { %v6293_v16 = vshrl.u32 %v2891_v48, 5  ;;  %3956 = vmatprep.subr.mxu1 %v7109_v62  ;;  %v2895_v14 = vshrl.u32 %v7119_v47, %v2894_v59  ;;  %v6299_v56 = vshll.u32 %v7163_v42, %v2893_v20  ;;  %v6301_v52 = vshll.u32 %v2887_v19, 8  ;;  %3922 = vmatpush3.msra.mxu0 %v6306_v4 }
 0x18c   :  { %v4389_v39 = vpop.eup %4388  ;;  %v3411_v9 = vadd.s32 4294967294, %v2553_v22  ;;  %3957 = vmatpush3.msra.mxu1 %v6312_v60  ;;  %v2898_v42 = vor.u32 %v2897_v21, %v2896_v37  ;;  %v6315_v18 = vor.u32 %v2900_v35, %v2899_v5  ;;  %v6318_v20 = vshrl.u32 %v7164_v33, %v2894_v59  ;;  %3923 = vmatprep.subr.mxu0 %v7109_v62  ;;  %v6329_v22 = vld [vmem:[%s7010_s4 + $0x40] sm:$0xff] }
 0x18d   :  { %v4391_v47 = vpop.eup %4390  ;;  %v2190_v48 = vxor.u32 2147483648, %v4389_v39  ;;  %3958 = vmatprep.subr.mxu1 %v7109_v62  ;;  %v6322_v34 = vor.u32 %v2903_v13, %v2902_v17  ;;  %v6324_v19 = vor.u32 %v2906_v49, %v2905_v58  ;;  %3924 = vmatpush3.msra.mxu0 %v6329_v22  ;;  %v6335_v33 = vld [vmem:[%s7009_s3 + $0x40] sm:$0xff]  ;;  %vm2911_vm10 = vcmp.lt.s32.totalorder %v6293_v16, 1  ;;  %v6353_v58 = vld [vmem:[%s7010_s4 + $0x38] sm:$0xff] }
 0x18e   :  { %v2187_v30 = vxor.u32 2147483648, %v4391_v47  ;;  %vm3412_vm8 = vcmp.lt.s32.totalorder %v3411_v9, 0  ;;  %3959 = vmatpush3.msra.mxu1 %v6335_v33  ;;  %3925 = vmatprep.subr.mxu0 %v7109_v62  ;;  %v6359_v49 = vld [vmem:[%s7009_s3 + $0x38] sm:$0xff]  ;;  %vm2913_vm11 = vcmp.lt.s32.totalorder %v6293_v16, 3  ;;  %vm2914_vm14 = vcmp.lt.s32.totalorder %v6293_v16, 4 }
 0x18f   :  { %v2191_v59 = vsel %vm2189_vm15, %v2190_v48, %v4391_v47  ;;  %v2296_v37 = vsel %vm2294_vm7, %v2190_v48, %v4391_v47  ;;  %v2556_v5 = vsel %vm3412_vm8, 0, %v3411_v9  ;;  %3960 = vmatprep.subr.mxu1 %v7109_v62  ;;  %3926 = vmatpush3.msra.mxu0 %v6353_v58  ;;  %vm2487_vm13 = vcmp.lt.s32.totalorder %v5370_v27, 0 }
 0x190   :  { %v2188_v21 = vsel %vm2186_vm5, %v4389_v39, %v2187_v30  ;;  %v2293_v35 = vsel %vm2291_vm4, %v4389_v39, %v2187_v30  ;;  %v2557_v17 = vsub.s32 32, %v2556_v5  ;;  %v2558_v13 = vshll.u32 %v6203_v24, %v2556_v5  ;;  %3961 = vmatpush3.msra.mxu1 %v6359_v49  ;;  %3927 = vmatprep.subr.mxu0 %v7109_v62 }
 0x191   :  { %v2192_v39 = vsel %vm2185_vm9, %v2188_v21, %v2191_v59  ;;  %v2297_v24 = vsel %vm2290_vm3, %v2293_v35, %v2296_v37  ;;  %v2561_v9 = vsub.s32 4294967266, %v2556_v5  ;;  %3962 = vmatprep.subr.mxu1 %v7109_v62  ;;  %3928 = vmatpush3.msra.mxu0 %v6378_v32  ;;  %v2915_v21 = vsel %vm2911_vm10, %v2895_v14, %v2898_v42 }
 0x192   :  { %v2193_v48 = vsel %vm2183_vm0, nan, %v2192_v39  ;;  %v2298_v30 = vsel %vm2183_vm0, nan, %v2297_v24  ;;  %v2559_v51 = vshrl.u32 %v2541_v57, %v2557_v17  ;;  %3963 = vmatpush3.msra.mxu1 %v6384_v29  ;;  %3929 = vmatprep.subr.mxu0 %v7109_v62  ;;  %v2916_v35 = vsel %vm2914_vm14, %v6322_v34, 2102212464 }
 0x193   :  { %v2194_v59 = vmul.f32 %v6015_v31, %v2193_v48  ;;  %v2299_v57 = vmul.f32 %v6015_v31, %v2298_v30  ;;  %v2562_v37 = vadd.s32 127, %v2561_v9  ;;  %3964 = vmatprep.subr.mxu1 %v7109_v62  ;;  %v2919_v17 = vsel %vm2911_vm10, %v2898_v42, %v6315_v18  ;;  %v6403_v31 = vld [vmem:[%s7010_s4 + $0x28] sm:$0xff] }
 0x194   :  { %v2560_v5 = vor.u32 %v2559_v51, %v2558_v13  ;;  %7184 = vst [vmem:[#allocation33_spill] sm:$0xff] %v6403_v31  ;;  %3930 = vmatpush3.msra.mxu0 %v6403_v31  ;;  %v6409_v51 = vld [vmem:[%s7009_s3 + $0x28] sm:$0xff]  ;;  %vm2912_vm1 = vcmp.lt.s32.totalorder %v6293_v16, 2  ;;  %4392 = vrcp.f32 %v6291_v45  ;;  %vm2577_vm8 = vweird.f32 %v5370_v27 }
 0x195   :  { %7185 = vst [vmem:[#allocation38_spill] sm:$0xff] %v6409_v51  ;;  %3965 = vmatpush3.msra.mxu1 %v6409_v51  ;;  %v3408_v14 = vadd.f32 -1.0, %v2194_v59  ;;  %v2313_v13 = vmul.f32 %v2299_v57, %v5009_v10  ;;  %v2318_v39 = vmul.f32 %v2299_v57, %v5622_v7  ;;  %v6415_v42 = vmul.f32 %v2194_v59, %v6214_v12 }
 0x196   :  { %3931 = vmatprep.subr.mxu0 %v7109_v62  ;;  %3966 = vmatprep.subr.mxu1 %v7109_v62  ;;  %v6421_v24 = vmul.f32 %v2299_v57, %v6216_v3  ;;  %v2333_v9 = vmul.f32 %v2299_v57, %v6214_v12  ;;  %v2334_v48 = vmul.f32 %v2194_v59, %v6216_v3  ;;  %v2563_v30 = vshll.u32 %v2562_v37, 23 }
 0x197   :  { %3932 = vmatpush3.msra.mxu0 %v6428_v44  ;;  %3967 = vmatpush3.msra.mxu1 %v6434_v2  ;;  %v2312_v47 = vmul.f32 %v3408_v14, %v5622_v7  ;;  %v2319_v57 = vmul.f32 %v3408_v14, %v5009_v10  ;;  %v2917_v59 = vsel %vm2913_vm11, %v6315_v18, %v2916_v35  ;;  %v2567_v41 = vcvt.s32.f32 %v2560_v5  ;;  %v6450_v10 = vld [vmem:[%s7010_s4 + $0x18] sm:$0xff] }
 0x198   :  { %3933 = vmatprep.subr.mxu0 %v7109_v62  ;;  %3968 = vmatprep.subr.mxu1 %v7109_v62  ;;  %v2331_v37 = vsub.f32 %v6415_v42, %v6421_v24  ;;  %v2335_v12 = vadd.f32 %v2334_v48, %v2333_v9  ;;  %v2564_v3 = vor.u32 4788187, %v2563_v30  ;;  %v6456_v7 = vld [vmem:[%s7009_s3 + $0x18] sm:$0xff]  ;;  %v2920_v5 = vsel %vm2914_vm14, %v6324_v19, 920167782 }
 0x199   :  { %3934 = vmatpush3.msra.mxu0 %v6450_v10  ;;  %3969 = vmatpush3.msra.mxu1 %v6456_v7  ;;  %v2314_v35 = vadd.f32 %v2313_v13, %v2312_v47  ;;  %v2320_v14 = vsub.f32 %v2318_v39, %v2319_v57  ;;  %v2923_v42 = vsel %vm2911_vm10, %v6315_v18, %v6322_v34  ;;  %v6481_v18 = vld [vmem:[%s7010_s4 + $0x10] sm:$0xff] }
 0x19a   :  { %3935 = vmatprep.subr.mxu0 %v7109_v62  ;;  %3970 = vmatprep.subr.mxu1 %v7109_v62  ;;  %v2565_v24 = vand.u32 2147483647, %v2564_v3  ;;  %v2918_v9 = vsel %vm2912_vm1, %v2915_v21, %v2917_v59  ;;  %v2921_v47 = vsel %vm2913_vm11, %v6322_v34, %v2920_v5  ;;  %v7186_v13 = vor.u32 %v6318_v20, %v6299_v56  ;;  %v6487_v3 = vld [vmem:[%s7009_s3 + $0x10] sm:$0xff]  ;;  %v2325_v34 = vpop.permute.xlu1 %2324 }
 0x19b   :  { %3936 = vmatpush3.msra.mxu0 %v6481_v18  ;;  %3971 = vmatpush3.msra.mxu1 %v6487_v3  ;;  %v2315_v56 = vmul.f32 %v2314_v35, %v6245_v23  ;;  %v2321_v20 = vmul.f32 %v2320_v14, %v6245_v23  ;;  %v2922_v21 = vsel %vm2912_vm1, %v2919_v17, %v2921_v47  ;;  %v6509_v23 = vld [vmem:[%s7010_s4 + $0x8] sm:$0xff] }
 0x19c   :  { %v2924_v39 = vsel %vm2914_vm14, %v7186_v13, 1326507024  ;;  %3937 = vmatprep.subr.mxu0 %v7109_v62  ;;  %v2568_v30 = vmul.f32 %v2567_v41, %v2565_v24  ;;  %v6501_v59 = vmul.u32.u64.low %v6301_v52, %v2922_v21  ;;  %v6502_v5 = vmul.u32.u64.high %v6301_v52, %v2922_v21, %v6501_v59  ;;  %3972 = vmatprep.subr.mxu1 %v7109_v62  ;;  %v6525_v35 = vld [vmem:[%s7009_s3 + $0x8] sm:$0xff]  ;;  %v6539_v24 = vld [vmem:[%s7010_s4] sm:$0xff] }
 0x19d   :  { %v2925_v48 = vsel %vm2913_vm11, %v6324_v19, %v2924_v39  ;;  %3938 = vmatpush3.msra.mxu0 %v6509_v23  ;;  %v2316_v41 = vsel %vm2304_vm12, %v6218_v43, %v2315_v56  ;;  %v2322_v16 = vsel %vm2304_vm12, %v6221_v61, %v2321_v20  ;;  %3973 = vmatpush3.msra.mxu1 %v6525_v35  ;;  %v7187_v43 = vand.u32 2147483647, %v5370_v27  ;;  %v6549_v13 = vld [vmem:[%s7009_s3] sm:$0xff] }
 0x19e   :  { %v2926_v57 = vsel %vm2912_vm1, %v2923_v42, %v2925_v48  ;;  %3939 = vmatprep.subr.mxu0 %v7109_v62  ;;  %v2327_v14 = vmul.f32 %v2325_v34, %v2316_v41  ;;  %v2328_v42 = vmul.f32 %v2325_v34, %v2322_v16  ;;  %v2569_v61 = vxor.u32 2147483648, %v2568_v30  ;;  %3974 = vmatprep.subr.mxu1 %v7109_v62 }
 0x19f   :  { %v6519_v19 = vmul.u32.u64.low %v6301_v52, %v2926_v57  ;;  %v6520_v17 = vmul.u32.u64.high %v6301_v52, %v2926_v57, %v6519_v19  ;;  %vm6531_vm9 = vcmp.le.f32.partialorder %v7187_v43, 0.7853982  ;;  %3940 = vmatpush3.msra.mxu0 %v6539_v24  ;;  %v2934_v47 = vmul.u32 %v6301_v52, %v2918_v9  ;;  %3975 = vmatpush3.msra.mxu1 %v6549_v13 }
 0x1a0   :  { %v6552_v39 = vadd.f32 %v2331_v37, %v2327_v14  ;;  %v6554_v34 = vadd.f32 %v2335_v12, %v2328_v42  ;;  %v2570_v56 = vsel %vm2487_vm13, %v2569_v61, %v2568_v30  ;;  %v2937_v20 = vadd.s32 1, %v6502_v5  ;;  %3942 = vmatmul.mubr.f32.vlgmr.msra.gmra.mxu0 %v5904_v63  ;;  %3977 = vmatmul.mubr.f32.vlgmr.msra.gmra.mxu1 %v5902_v40 }
 0x1a1   :  { %v7190_v52 = vsub.s32 4, %v6157_v26  ;;  %v2573_v12 = vsel %vm6531_vm9, %v5370_v27, %v2570_v56  ;;  %vm2936_vm12 = vc.u32 %v6520_v17, %v6501_v59  ;;  %v2483_v37 = vmul.f32 1.442695, %v5915_v0  ;;  %3979 = vmatprep.subr.mxu0 %v7109_v62  ;;  %4014 = vmatprep.subr.mxu1 %v7109_v62  ;;  %v6602_v19 = vpop.eup %4392 }
 0x1a2   :  { %4394 = vcosq.f32 %v2573_v12  ;;  %v2938_v63 = vsel %vm2936_vm12, %v2937_v20, %v6502_v5  ;;  %3980 = vmatpush3.msra.mxu0 %v6154_v54  ;;  %4015 = vmatpush3.msra.mxu1 %v6162_v25 }
 0x1a3   :  { %v2572_v9 = vsel %vm2487_vm13, %v7190_v52, %v6157_v26  ;;  %4396 = vsinq.f32 %v2573_v12  ;;  %v2939_v26 = vadd.s32 %v2938_v63, %v2934_v47  ;;  %3981 = vmatprep.subr.mxu0 %v7109_v62  ;;  %4016 = vmatprep.subr.mxu1 %v7109_v62  ;;  %v2701_v47 = vmul.f32 %v6602_v19, %v6291_v45  ;;  %v4442_v52 = vld [vmem:[%s7007_s1] ss:$0 sm:$0xff] }
 0x1a4   :  { %v2574_v21 = vsel %vm6531_vm9, 0, %v2572_v9  ;;  %3982 = vmatpush3.msra.mxu0 %v6176_v28  ;;  %4017 = vmatpush3.msra.mxu1 %v6189_v8  ;;  %4398 = vpow2.f32 %v2483_v37  ;;  %v7191_v9 = vld [vmem:[#allocation40_spill] sm:$0xff] }
 0x1a5   :  { %v2940_v40 = vadd.s32 536870912, %v2939_v26  ;;  %3983 = vmatprep.subr.mxu0 %v7109_v62  ;;  %4018 = vmatprep.subr.mxu1 %v7109_v62  ;;  %v2682_v48 = vadd.s32 3, %v2574_v21  ;;  %v2578_v5 = vand.u32 3, %v2574_v21  ;;  %v6624_v12 = vmul.f32 %v4442_v52, %v7191_v9 }
 0x1a6   :  { %3984 = vmatpush3.msra.mxu0 %v6200_v53  ;;  %4019 = vmatpush3.msra.mxu1 %v6210_v55 }
 0x1a7   :  { %v6587_v30 = vshrl.u32 %v2940_v40, 30  ;;  %3985 = vmatprep.subr.mxu0 %v7109_v62  ;;  %4020 = vmatprep.subr.mxu1 %v7109_v62  ;;  %v2683_v41 = vand.u32 3, %v2682_v48  ;;  %vm2583_vm5 = vcmp.eq.s32.totalorder %v2578_v5, 2  ;;  %vm2580_vm0 = vcmp.eq.s32.totalorder %v2578_v5, 0 }
 0x1a8   :  { %3986 = vmatpush3.msra.mxu0 %v6227_v1  ;;  %4021 = vmatpush3.msra.mxu1 %v6237_v38  ;;  %vm2579_vm4 = vcmp.lt.s32.totalorder %v2578_v5, 2 }
 0x1a9   :  { %v2942_v57 = vshll.u32 %v6587_v30, 30  ;;  %3987 = vmatprep.subr.mxu0 %v7109_v62  ;;  %4022 = vmatprep.subr.mxu1 %v7109_v62  ;;  %vm2688_vm15 = vcmp.eq.s32.totalorder %v2683_v41, 2  ;;  %vm2685_vm3 = vcmp.eq.s32.totalorder %v2683_v41, 0  ;;  %vm2684_vm7 = vcmp.lt.s32.totalorder %v2683_v41, 2 }
 0x1aa   :  { %3988 = vmatpush3.msra.mxu0 %v6255_v11  ;;  %4023 = vmatpush3.msra.mxu1 %v6261_v36 }
 0x1ab   :  { %v6598_v16 = vsub.s32 %v2939_v26, %v2942_v57  ;;  %3989 = vmatprep.subr.mxu0 %v7109_v62  ;;  %4024 = vmatprep.subr.mxu1 %v7109_v62 }
 0x1ac   :  { %3990 = vmatpush3.msra.mxu0 %v6276_v50  ;;  %4025 = vmatpush3.msra.mxu1 %v6282_v6 }
 0x1ad   :  { %v2945_v14 = vsub.s32 0, %v6598_v16  ;;  %3991 = vmatprep.subr.mxu0 %v7109_v62  ;;  %4026 = vmatprep.subr.mxu1 %v7109_v62 }
 0x1ae   :  { %3992 = vmatpush3.msra.mxu0 %v6306_v4  ;;  %4027 = vmatpush3.msra.mxu1 %v6312_v60 }
 0x1af   :  { %v4395_v42 = vpop.eup %4394  ;;  %v3419_v43 = vmin.u32 %v2945_v14, %v6598_v16  ;;  %3993 = vmatprep.subr.mxu0 %v7109_v62  ;;  %4028 = vmatprep.subr.mxu1 %v7109_v62  ;;  %v2702_v14 = vsub.f32 2.0, %v2701_v47 }
 0x1b0   :  { %v4397_v46 = vpop.eup %4396  ;;  %v2584_v61 = vxor.u32 2147483648, %v4395_v42  ;;  %3994 = vmatpush3.msra.mxu0 %v6329_v22  ;;  %4029 = vmatpush3.msra.mxu1 %v6335_v33 }
 0x1b1   :  { %v2581_v56 = vxor.u32 2147483648, %v4397_v46  ;;  %v2947_v20 = vclz %v3419_v43  ;;  %3995 = vmatprep.subr.mxu0 %v7109_v62  ;;  %4030 = vmatprep.subr.mxu1 %v7109_v62  ;;  %v4399_v63 = vpop.eup %4398  ;;  %v2704_v43 = vmul.f32 0.5, %v5915_v0 }
 0x1b2   :  { %v2585_v45 = vsel %vm2583_vm5, %v2584_v61, %v4397_v46  ;;  %v2690_v37 = vsel %vm2688_vm15, %v2584_v61, %v4397_v46  ;;  %3996 = vmatpush3.msra.mxu0 %v6353_v58  ;;  %4031 = vmatpush3.msra.mxu1 %v6359_v49  ;;  %v2935_v61 = vadd.s32 %v6501_v59, %v6520_v17 }
 0x1b3   :  { %v2582_v26 = vsel %vm2580_vm0, %v4395_v42, %v2581_v56  ;;  %v2687_v21 = vsel %vm2685_vm3, %v4395_v42, %v2581_v56  ;;  %v3420_v40 = vadd.s32 4294967294, %v2947_v20  ;;  %3997 = vmatprep.subr.mxu0 %v7109_v62  ;;  %4032 = vmatprep.subr.mxu1 %v7109_v62  ;;  %v3089_v56 = vmul.f32 %v6624_v12, %v6624_v12 }
 0x1b4   :  { %v2586_v48 = vsel %vm2579_vm4, %v2582_v26, %v2585_v45  ;;  %v2691_v57 = vsel %vm2684_vm7, %v2687_v21, %v2690_v37  ;;  %3998 = vmatpush3.msra.mxu0 %v6378_v32  ;;  %4033 = vmatpush3.msra.mxu1 %v6384_v29  ;;  %v3090_v59 = vmul.f32 %v7179_v15, %v7179_v15  ;;  %vm2971_vm0 = vweird.f32 %v7179_v15 }
 0x1b5   :  { %v2587_v46 = vsel %vm2577_vm8, nan, %v2586_v48  ;;  %v2692_v42 = vsel %vm2577_vm8, nan, %v2691_v57  ;;  %vm3421_vm10 = vcmp.lt.s32.totalorder %v3420_v40, 0  ;;  %3999 = vmatprep.subr.mxu0 %v7109_v62  ;;  %4034 = vmatprep.subr.mxu1 %v7109_v62  ;;  %v2703_v48 = vmul.f32 %v6602_v19, %v2702_v14 }
 0x1b6   :  { %v2588_v5 = vmul.f32 %v4399_v63, %v2587_v46  ;;  %v2693_v41 = vmul.f32 %v4399_v63, %v2692_v42  ;;  %v2950_v47 = vsel %vm3421_vm10, 0, %v3420_v40  ;;  %4000 = vmatpush3.msra.mxu0 %v6403_v31  ;;  %4035 = vmatpush3.msra.mxu1 %v6409_v51  ;;  %v2711_v19 = vmul.f32 0.5, %v5370_v27 }
 0x1b7   :  { %v2951_v20 = vsub.s32 32, %v2950_v47  ;;  %v2952_v52 = vshll.u32 %v6598_v16, %v2950_v47  ;;  %v2955_v9 = vsub.s32 4294967266, %v2950_v47  ;;  %4001 = vmatprep.subr.mxu0 %v7109_v62  ;;  %4036 = vmatprep.subr.mxu1 %v7109_v62  ;;  %v2705_v47 = vadd.f32 1.0, %v2704_v43  ;;  %v2719_v43 = vpop.permute.xlu0 %2718 }
 0x1b8   :  { %v3417_v17 = vadd.f32 -1.0, %v2588_v5  ;;  %v2707_v45 = vmul.f32 %v2693_v41, %v5370_v27  ;;  %v2712_v37 = vmul.f32 %v2693_v41, %v5915_v0  ;;  %v2723_v63 = vmul.f32 %v2588_v5, %v6552_v39  ;;  %4002 = vmatpush3.msra.mxu0 %v6428_v44  ;;  %4037 = vmatpush3.msra.mxu1 %v6434_v2 }
 0x1b9   :  { %v2724_v16 = vmul.f32 %v2693_v41, %v6554_v34  ;;  %v2727_v26 = vmul.f32 %v2693_v41, %v6552_v39  ;;  %v2728_v21 = vmul.f32 %v2588_v5, %v6554_v34  ;;  %v2953_v40 = vshrl.u32 %v2935_v61, %v2951_v20  ;;  %4003 = vmatprep.subr.mxu0 %v7109_v62 }
 0x1ba   :  { %v2706_v57 = vmul.f32 %v3417_v17, %v5915_v0  ;;  %v2713_v46 = vmul.f32 %v3417_v17, %v5370_v27  ;;  %v2956_v42 = vadd.s32 127, %v2955_v9  ;;  %4038 = vmatprep.subr.mxu1 %v7109_v62  ;;  %4004 = vmatpush3.msra.mxu0 %v6450_v10  ;;  %v6676_v5 = vadd.f32 %v3090_v59, %v3089_v56 }
 0x1bb   :  { %v2725_v51 = vsub.f32 %v2723_v63, %v2724_v16  ;;  %v2729_v31 = vadd.f32 %v2728_v21, %v2727_v26  ;;  %v2954_v41 = vor.u32 %v2953_v40, %v2952_v52  ;;  %4039 = vmatpush3.msra.mxu1 %v6456_v7  ;;  %4005 = vmatprep.subr.mxu0 %v7109_v62  ;;  %v2965_v40 = vsub.s32 4, %v6587_v30 }
 0x1bc   :  { %v2708_v61 = vadd.f32 %v2707_v45, %v2706_v57  ;;  %v2714_v14 = vsub.f32 %v2712_v37, %v2713_v46  ;;  %v2957_v0 = vshll.u32 %v2956_v42, 23  ;;  %4040 = vmatprep.subr.mxu1 %v7109_v62  ;;  %4006 = vmatpush3.msra.mxu0 %v6481_v18  ;;  %vm3092_vm11 = vcmp.lt.f32.partialorder %v6676_v5, 1e-06  ;;  %v7199_v46 = vld [vmem:[#allocation38_spill] sm:$0xff] }
 0x1bd   :  { %v2961_v17 = vcvt.s32.f32 %v2954_v41  ;;  %4041 = vmatpush3.msra.mxu1 %v6487_v3  ;;  %4007 = vmatprep.subr.mxu0 %v7109_v62  ;;  %v7194_v57 = vand.u32 2147483647, %v7179_v15 }
 0x1be   :  { %v2709_v20 = vmul.f32 %v2708_v61, %v2703_v48  ;;  %v2715_v52 = vmul.f32 %v2714_v14, %v2703_v48  ;;  %v2958_v9 = vor.u32 4788187, %v2957_v0  ;;  %4042 = vmatprep.subr.mxu1 %v7109_v62  ;;  %4008 = vmatpush3.msra.mxu0 %v6509_v23  ;;  %v7193_v48 = vld [vmem:[#allocation32_spill] sm:$0xff] }
 0x1bf   :  { %4043 = vmatpush3.msra.mxu1 %v6525_v35  ;;  %4009 = vmatprep.subr.mxu0 %v7109_v62  ;;  %vm6707_vm14 = vcmp.le.f32.partialorder %v7194_v57, 0.7853982 }
 0x1c0   :  { %v2710_v56 = vsel %vm2698_vm6, %v2705_v47, %v2709_v20  ;;  %v2716_v59 = vsel %vm2698_vm6, %v2711_v19, %v2715_v52  ;;  %v2959_v45 = vand.u32 2147483647, %v2958_v9  ;;  %4044 = vmatprep.subr.mxu1 %v7109_v62  ;;  %4010 = vmatpush3.msra.mxu0 %v6539_v24  ;;  %vm2881_vm6 = vcmp.lt.s32.totalorder %v7179_v15, 0 }
 0x1c1   :  { %v2721_v37 = vmul.f32 %v2719_v43, %v2710_v56  ;;  %v2722_v63 = vmul.f32 %v2719_v43, %v2716_v59  ;;  %4011 = vmatprep.mubr.msk.f32.mxu0 %vm4590_vm2, %v7109_v62  ;;  %4045 = vmatpush3.msra.mxu1 %v6549_v13  ;;  %v2966_v41 = vsel %vm2881_vm6, %v2965_v40, %v6587_v30  ;;  %v2877_v19 = vmul.f32 1.442695, %v6624_v12  ;;  %v7198_v40 = vld [vmem:[#allocation33_spill] sm:$0xff] }
 0x1c2   :  { %v2962_v16 = vmul.f32 %v2961_v17, %v2959_v45  ;;  %4046 = vmatprep.mubr.msk.f32.mxu1 %vm4590_vm2, %v7109_v62  ;;  %4012 = vmatmul.mubr.f32.vlgmr.msra.gmra.mxu0 %v7193_v48  ;;  %v2968_v30 = vsel %vm6707_vm14, 0, %v2966_v41 }
 0x1c3   :  { %v6696_v26 = vadd.f32 %v2725_v51, %v2721_v37  ;;  %v6698_v21 = vadd.f32 %v2729_v31, %v2722_v63  ;;  %v6714_v31 = vsel %vm3092_vm11, 1.0, %v6676_v5  ;;  %v7197_v51 = vld [vmem:[#allocation31_spill] sm:$0xff]  ;;  %4049 = vmatprep.subr.mxu0 %v7109_v62  ;;  %4084 = vmatprep.subr.mxu1 %v7109_v62  ;;  %v3076_v14 = vadd.s32 3, %v2968_v30  ;;  %v4453_v5 = vld [vmem:[%s7010_s4 + $0x50] sm:$0xff] }
 0x1c4   :  { %v2963_v42 = vxor.u32 2147483648, %v2962_v16  ;;  %4047 = vmatmul.mubr.f32.vlgmr.msra.gmra.mxu1 %v7197_v51  ;;  %4050 = vmatpush3.msra.mxu0 %v6154_v54  ;;  %4400 = vrcp.f32 %v6714_v31  ;;  %v2972_v0 = vand.u32 3, %v2968_v30 }
 0x1c5   :  { %4085 = vmatpush3.msra.mxu1 %v6162_v25  ;;  %4051 = vmatprep.subr.mxu0 %v7109_v62  ;;  %v3077_v43 = vand.u32 3, %v3076_v14 }
 0x1c6   :  { %v2964_v47 = vsel %vm2881_vm6, %v2963_v42, %v2962_v16  ;;  %4086 = vmatprep.subr.mxu1 %v7109_v62  ;;  %4052 = vmatpush3.msra.mxu0 %v6176_v28  ;;  %vm2977_vm13 = vcmp.eq.s32.totalorder %v2972_v0, 2  ;;  %vm2974_vm9 = vcmp.eq.s32.totalorder %v2972_v0, 0  ;;  %vm2973_vm5 = vcmp.lt.s32.totalorder %v2972_v0, 2 }
 0x1c7   :  { %v2967_v61 = vsel %vm6707_vm14, %v7179_v15, %v2964_v47  ;;  %4087 = vmatpush3.msra.mxu1 %v6189_v8  ;;  %4053 = vmatprep.subr.mxu0 %v7109_v62  ;;  %vm3082_vm1 = vcmp.eq.s32.totalorder %v3077_v43, 2  ;;  %vm3079_vm12 = vcmp.eq.s32.totalorder %v3077_v43, 0  ;;  %vm3078_vm15 = vcmp.lt.s32.totalorder %v3077_v43, 2 }
 0x1c8   :  { %4402 = vcosq.f32 %v2967_v61  ;;  %4088 = vmatprep.subr.mxu1 %v7109_v62  ;;  %4054 = vmatpush3.msra.mxu0 %v6200_v53 }
 0x1c9   :  { %4404 = vsinq.f32 %v2967_v61  ;;  %4089 = vmatpush3.msra.mxu1 %v6210_v55  ;;  %4055 = vmatprep.subr.mxu0 %v7109_v62  ;;  %v3098_v61 = vmul.f32 0.5, %v6624_v12 }
 0x1ca   :  { %4090 = vmatprep.subr.mxu1 %v7109_v62  ;;  %4056 = vmatpush3.msra.mxu0 %v6227_v1  ;;  %4406 = vpow2.f32 %v2877_v19 }
 0x1cb   :  { %4091 = vmatpush3.msra.mxu1 %v6237_v38  ;;  %4057 = vmatprep.subr.mxu0 %v7109_v62 }
 0x1cc   :  { %4092 = vmatprep.subr.mxu1 %v7109_v62  ;;  %4058 = vmatpush3.msra.mxu0 %v6255_v11 }
 0x1cd   :  { %4093 = vmatpush3.msra.mxu1 %v6261_v36  ;;  %4059 = vmatprep.subr.mxu0 %v7109_v62 }
 0x1ce   :  { %4094 = vmatprep.subr.mxu1 %v7109_v62  ;;  %4060 = vmatpush3.msra.mxu0 %v6276_v50 }
 0x1cf   :  { %4095 = vmatpush3.msra.mxu1 %v6282_v6  ;;  %4061 = vmatprep.subr.mxu0 %v7109_v62 }
 0x1d0   :  { %4096 = vmatprep.subr.mxu1 %v7109_v62  ;;  %4062 = vmatpush3.msra.mxu0 %v6306_v4 }
 0x1d1   :  { %4097 = vmatpush3.msra.mxu1 %v6312_v60  ;;  %4063 = vmatprep.subr.mxu0 %v7109_v62  ;;  %v4401_v20 = vpop.eup %4400 }
 0x1d2   :  { %4098 = vmatprep.subr.mxu1 %v7109_v62  ;;  %4064 = vmatpush3.msra.mxu0 %v6329_v22  ;;  %v3095_v45 = vmul.f32 %v4401_v20, %v6714_v31 }
 0x1d3   :  { %4099 = vmatpush3.msra.mxu1 %v6335_v33  ;;  %4065 = vmatprep.subr.mxu0 %v7109_v62 }
 0x1d4   :  { %4100 = vmatprep.subr.mxu1 %v7109_v62  ;;  %4066 = vmatpush3.msra.mxu0 %v6353_v58  ;;  %v3096_v41 = vsub.f32 2.0, %v3095_v45 }
 0x1d5   :  { %v4403_v52 = vpop.eup %4402  ;;  %4101 = vmatpush3.msra.mxu1 %v6359_v49  ;;  %4067 = vmatprep.subr.mxu0 %v7109_v62 }
 0x1d6   :  { %v4405_v9 = vpop.eup %4404  ;;  %v2978_v17 = vxor.u32 2147483648, %v4403_v52  ;;  %4102 = vmatprep.subr.mxu1 %v7109_v62  ;;  %4068 = vmatpush3.msra.mxu0 %v6378_v32 }
 0x1d7   :  { %v2975_v27 = vxor.u32 2147483648, %v4405_v9  ;;  %4103 = vmatpush3.msra.mxu1 %v6384_v29  ;;  %4069 = vmatprep.subr.mxu0 %v7109_v62  ;;  %v4407_v37 = vpop.eup %4406 }
 0x1d8   :  { %v2979_v56 = vsel %vm2977_vm13, %v2978_v17, %v4405_v9  ;;  %v3084_v59 = vsel %vm3082_vm1, %v2978_v17, %v4405_v9  ;;  %4104 = vmatprep.subr.mxu1 %v7109_v62  ;;  %4070 = vmatpush3.msra.mxu0 %v7198_v40  ;;  %v3097_v17 = vmul.f32 %v4401_v20, %v3096_v41  ;;  %v4456_v41 = vld [vmem:[%s7009_s3 + $0x48] sm:$0xff] }
 0x1d9   :  { %v2976_v63 = vsel %vm2974_vm9, %v4403_v52, %v2975_v27  ;;  %v3081_v16 = vsel %vm3079_vm12, %v4403_v52, %v2975_v27  ;;  %4105 = vmatpush3.msra.mxu1 %v7199_v46  ;;  %4071 = vmatprep.subr.mxu0 %v7109_v62 }
 0x1da   :  { %v2980_v48 = vsel %vm2973_vm5, %v2976_v63, %v2979_v56  ;;  %v3085_v57 = vsel %vm3078_vm15, %v3081_v16, %v3084_v59  ;;  %4106 = vmatprep.subr.mxu1 %v7109_v62  ;;  %4072 = vmatpush3.msra.mxu0 %v6428_v44  ;;  %v3105_v16 = vmul.f32 0.5, %v7179_v15 }
 0x1db   :  { %v2981_v42 = vsel %vm2971_vm0, nan, %v2980_v48  ;;  %v3086_v31 = vsel %vm2971_vm0, nan, %v3085_v57  ;;  %4107 = vmatpush3.msra.mxu1 %v6434_v2  ;;  %4073 = vmatprep.subr.mxu0 %v7109_v62 }
 0x1dc   :  { %v2982_v51 = vmul.f32 %v4407_v37, %v2981_v42  ;;  %v3087_v47 = vmul.f32 %v4407_v37, %v3086_v31  ;;  %4108 = vmatprep.subr.mxu1 %v7109_v62  ;;  %4074 = vmatpush3.msra.mxu0 %v6450_v10  ;;  %v3099_v37 = vadd.f32 1.0, %v3098_v61 }
 0x1dd   :  { %4109 = vmatpush3.msra.mxu1 %v6456_v7  ;;  %4075 = vmatprep.subr.mxu0 %v7109_v62 }
 0x1de   :  { %v3426_v19 = vadd.f32 -1.0, %v2982_v51  ;;  %v3101_v30 = vmul.f32 %v3087_v47, %v7179_v15  ;;  %v3106_v14 = vmul.f32 %v3087_v47, %v6624_v12  ;;  %v3117_v0 = vmul.f32 %v2982_v51, %v6696_v26  ;;  %4110 = vmatprep.subr.mxu1 %v7109_v62  ;;  %4076 = vmatpush3.msra.mxu0 %v6481_v18 }
 0x1df   :  { %v3118_v43 = vmul.f32 %v3087_v47, %v6698_v21  ;;  %v3121_v52 = vmul.f32 %v3087_v47, %v6696_v26  ;;  %v3122_v9 = vmul.f32 %v2982_v51, %v6698_v21  ;;  %4111 = vmatpush3.msra.mxu1 %v6487_v3  ;;  %4077 = vmatprep.subr.mxu0 %v7109_v62 }
 0x1e0   :  { %v3100_v27 = vmul.f32 %v3426_v19, %v6624_v12  ;;  %v3107_v56 = vmul.f32 %v3426_v19, %v7179_v15  ;;  %4112 = vmatprep.subr.mxu1 %v7109_v62  ;;  %4078 = vmatpush3.msra.mxu0 %v6509_v23  ;;  %v3113_v12 = vpop.permute.xlu1 %3112 }
 0x1e1   :  { %v3119_v59 = vsub.f32 %v3117_v0, %v3118_v43  ;;  %v3123_v45 = vadd.f32 %v3122_v9, %v3121_v52  ;;  %4113 = vmatpush3.msra.mxu1 %v6525_v35  ;;  %4079 = vmatprep.subr.mxu0 %v7109_v62 }
 0x1e2   :  { %v3102_v63 = vadd.f32 %v3101_v30, %v3100_v27  ;;  %v3108_v48 = vsub.f32 %v3106_v14, %v3107_v56  ;;  %4114 = vmatprep.subr.mxu1 %v7109_v62  ;;  %4080 = vmatpush3.msra.mxu0 %v6539_v24 }
 0x1e3   :  { %4081 = vmatprep.mubr.msk.f32.mxu0 %vm4590_vm2, %v7109_v62  ;;  %4115 = vmatpush3.msra.mxu1 %v6549_v13 }
 0x1e4   :  { %v3103_v20 = vmul.f32 %v3102_v63, %v3097_v17  ;;  %v3109_v57 = vmul.f32 %v3108_v48, %v3097_v17  ;;  %4116 = vmatprep.mubr.msk.f32.mxu1 %vm4590_vm2, %v7109_v62  ;;  %4082 = vmatmul.mubr.f32.vlgmr.msra.gmra.mxu0 %v6554_v34 }
 0x1e5   :  { %4117 = vmatmul.mubr.f32.vlgmr.msra.gmra.mxu1 %v6552_v39  ;;  %4119 = vmatprep.subr.mxu0 %v7109_v62  ;;  %v4452_v39 = vld [vmem:[%s7009_s3 + $0x58] sm:$0xff] }
 0x1e6   :  { %v3104_v15 = vsel %vm3092_vm11, %v3099_v37, %v3103_v20  ;;  %v3110_v42 = vsel %vm3092_vm11, %v3105_v16, %v3109_v57  ;;  %4154 = vmatprep.subr.mxu1 %v7109_v62  ;;  %4120 = vmatpush3.msra.mxu0 %v6154_v54 }
 0x1e7   :  { %v3115_v31 = vmul.f32 %v3113_v12, %v3104_v15  ;;  %v3116_v51 = vmul.f32 %v3113_v12, %v3110_v42  ;;  %4155 = vmatpush3.msra.mxu1 %v6162_v25  ;;  %4121 = vmatprep.subr.mxu0 %v7109_v62 }
 0x1e8   :  { %4156 = vmatprep.subr.mxu1 %v7109_v62  ;;  %4122 = vmatpush3.msra.mxu0 %v6176_v28 }
 0x1e9   :  { %v6825_v34 = vadd.f32 %v3119_v59, %v3115_v31  ;;  %v6827_v47 = vadd.f32 %v3123_v45, %v3116_v51  ;;  %4157 = vmatpush3.msra.mxu1 %v6189_v8  ;;  %4123 = vmatprep.subr.mxu0 %v7109_v62 }
 0x1ea   :  { %4158 = vmatprep.subr.mxu1 %v7109_v62  ;;  %4124 = vmatpush3.msra.mxu0 %v6200_v53 }
 0x1eb   :  { %3308 = vst [vmem:[#allocation8] sm:$0xff] %v6825_v34  ;;  %3309 = vst [vmem:[#allocation10] sm:$0xff] %v6827_v47  ;;  %4159 = vmatpush3.msra.mxu1 %v6210_v55  ;;  %4125 = vmatprep.subr.mxu0 %v7109_v62  ;;  %v4443_v55 = vld [vmem:[%s7010_s4 + $0x78] sm:$0xff] }
 0x1ec   :  { %4160 = vmatprep.subr.mxu1 %v7109_v62  ;;  %4126 = vmatpush3.msra.mxu0 %v6227_v1  ;;  %v4444_v1 = vld [vmem:[%s7009_s3 + $0x78] sm:$0xff] }
 0x1ed   :  { %4161 = vmatpush3.msra.mxu1 %v6237_v38  ;;  %4127 = vmatprep.subr.mxu0 %v7109_v62  ;;  %v4445_v38 = vld [vmem:[%s7010_s4 + $0x70] sm:$0xff] }
 0x1ee   :  { %4162 = vmatprep.subr.mxu1 %v7109_v62  ;;  %4128 = vmatpush3.msra.mxu0 %v6255_v11  ;;  %v4446_v11 = vld [vmem:[%s7009_s3 + $0x70] sm:$0xff] }
 0x1ef   :  { %4163 = vmatpush3.msra.mxu1 %v6261_v36  ;;  %4129 = vmatprep.subr.mxu0 %v7109_v62  ;;  %v4447_v36 = vld [vmem:[%s7010_s4 + $0x68] sm:$0xff] }
 0x1f0   :  { %4164 = vmatprep.subr.mxu1 %v7109_v62  ;;  %4130 = vmatpush3.msra.mxu0 %v6276_v50  ;;  %v4448_v50 = vld [vmem:[%s7009_s3 + $0x68] sm:$0xff] }
 0x1f1   :  { %4165 = vmatpush3.msra.mxu1 %v6282_v6  ;;  %4131 = vmatprep.subr.mxu0 %v7109_v62  ;;  %v4449_v6 = vld [vmem:[%s7010_s4 + $0x60] sm:$0xff] }
 0x1f2   :  { %4166 = vmatprep.subr.mxu1 %v7109_v62  ;;  %4132 = vmatpush3.msra.mxu0 %v6306_v4  ;;  %v4450_v4 = vld [vmem:[%s7009_s3 + $0x60] sm:$0xff] }
 0x1f3   :  { %4167 = vmatpush3.msra.mxu1 %v6312_v60  ;;  %4133 = vmatprep.subr.mxu0 %v7109_v62  ;;  %v433_v54 = vpop.f32.mrf.mxu0  ;;  %v503_v25 = vpop.f32.mrf.mxu1  ;;  %v4451_v60 = vld [vmem:[%s7010_s4 + $0x58] sm:$0xff] }
 0x1f4   :  { %4168 = vmatprep.subr.mxu1 %v7109_v62  ;;  %4134 = vmatpush3.msra.mxu0 %v6329_v22  ;;  %v6865_v28 = vadd.f32 %v503_v25, %v433_v54 }
 0x1f5   :  { %4169 = vmatpush3.msra.mxu1 %v6335_v33  ;;  %4135 = vmatprep.subr.mxu0 %v7109_v62  ;;  %v3733_v8 = vpop.f32.mrf.mxu0  ;;  %v3768_v53 = vpop.f32.mrf.mxu1 }
 0x1f6   :  { %4170 = vmatprep.subr.mxu1 %v7109_v62  ;;  %4136 = vmatpush3.msra.mxu0 %v6353_v58 }
 0x1f7   :  { %4171 = vmatpush3.msra.mxu1 %v6359_v49  ;;  %4137 = vmatprep.subr.mxu0 %v7109_v62 }
 0x1f8   :  { %4172 = vmatprep.subr.mxu1 %v7109_v62  ;;  %4138 = vmatpush3.msra.mxu0 %v6378_v32 }
 0x1f9   :  { %4173 = vmatpush3.msra.mxu1 %v6384_v29  ;;  %4139 = vmatprep.subr.mxu0 %v7109_v62 }
 0x1fa   :  { %4174 = vmatprep.subr.mxu1 %v7109_v62  ;;  %4140 = vmatpush3.msra.mxu0 %v7198_v40 }
 0x1fb   :  { %4175 = vmatpush3.msra.mxu1 %v7199_v46  ;;  %4141 = vmatprep.subr.mxu0 %v7109_v62 }
 0x1fc   :  { %4176 = vmatprep.subr.mxu1 %v7109_v62  ;;  %4142 = vmatpush3.msra.mxu0 %v6428_v44 }
 0x1fd   :  { %4177 = vmatpush3.msra.mxu1 %v6434_v2  ;;  %4143 = vmatprep.subr.mxu0 %v7109_v62 }
 0x1fe   :  { %4178 = vmatprep.subr.mxu1 %v7109_v62  ;;  %4144 = vmatpush3.msra.mxu0 %v6450_v10 }
 0x1ff   :  { %4179 = vmatpush3.msra.mxu1 %v6456_v7  ;;  %4145 = vmatprep.subr.mxu0 %v7109_v62 }
 0x200   :  { %4180 = vmatprep.subr.mxu1 %v7109_v62  ;;  %4146 = vmatpush3.msra.mxu0 %v6481_v18 }
 0x201   :  { %4181 = vmatpush3.msra.mxu1 %v6487_v3  ;;  %4147 = vmatprep.subr.mxu0 %v7109_v62 }
 0x202   :  { %4182 = vmatprep.subr.mxu1 %v7109_v62  ;;  %4148 = vmatpush3.msra.mxu0 %v6509_v23 }
 0x203   :  { %4183 = vmatpush3.msra.mxu1 %v6525_v35  ;;  %4149 = vmatprep.subr.mxu0 %v7109_v62 }
 0x204   :  { %4184 = vmatprep.subr.mxu1 %v7109_v62  ;;  %4150 = vmatpush3.msra.mxu0 %v6539_v24 }
 0x205   :  { %4151 = vmatprep.mubr.msk.f32.mxu0 %vm4590_vm2, %v7109_v62  ;;  %4185 = vmatpush3.msra.mxu1 %v6549_v13 }
 0x206   :  { %4186 = vmatprep.mubr.msk.f32.mxu1 %vm4590_vm2, %v7109_v62  ;;  %4152 = vmatmul.mubr.f32.vlgmr.msra.gmra.mxu0 %v6698_v21  ;;  %v4455_v21 = vld [vmem:[%s7010_s4 + $0x48] sm:$0xff]  ;;  %s4592_s4 = smov 32  }
 0x207   :  { %4187 = vmatmul.mubr.f32.vlgmr.msra.gmra.mxu1 %v6696_v26  ;;  %4189 = vmatprep.subr.mxu0 %v7109_v62  ;;  %v4454_v26 = vld [vmem:[%s7009_s3 + $0x50] sm:$0xff]  ;;  %s4591_s3 = smov 16  }
 0x208   :  { %4224 = vmatprep.subr.mxu1 %v7109_v62  ;;  %4190 = vmatpush3.msra.mxu0 %v4443_v55 }
 0x209   :  { %4225 = vmatpush3.msra.mxu1 %v4444_v1  ;;  %4191 = vmatprep.subr.mxu0 %v7109_v62 }
 0x20a   :  { %4226 = vmatprep.subr.mxu1 %v7109_v62  ;;  %4192 = vmatpush3.msra.mxu0 %v4445_v38 }
 0x20b   :  { %4227 = vmatpush3.msra.mxu1 %v4446_v11  ;;  %4193 = vmatprep.subr.mxu0 %v7109_v62 }
 0x20c   :  { %4228 = vmatprep.subr.mxu1 %v7109_v62  ;;  %4194 = vmatpush3.msra.mxu0 %v4447_v36 }
 0x20d   :  { %4229 = vmatpush3.msra.mxu1 %v4448_v50  ;;  %4195 = vmatprep.subr.mxu0 %v7109_v62 }
 0x20e   :  { %4230 = vmatprep.subr.mxu1 %v7109_v62  ;;  %4196 = vmatpush3.msra.mxu0 %v4449_v6 }
 0x20f   :  { %4231 = vmatpush3.msra.mxu1 %v4450_v4  ;;  %4197 = vmatprep.subr.mxu0 %v7109_v62 }
 0x210   :  { %4232 = vmatprep.subr.mxu1 %v7109_v62  ;;  %4198 = vmatpush3.msra.mxu0 %v4451_v60 }
 0x211   :  { %4233 = vmatpush3.msra.mxu1 %v4452_v39  ;;  %4199 = vmatprep.subr.mxu0 %v7109_v62 }
 0x212   :  { %4234 = vmatprep.subr.mxu1 %v7109_v62  ;;  %4200 = vmatpush3.msra.mxu0 %v4453_v5 }
 0x213   :  { %4235 = vmatpush3.msra.mxu1 %v4454_v26  ;;  %4201 = vmatprep.subr.mxu0 %v7109_v62 }
 0x214   :  { %4236 = vmatprep.subr.mxu1 %v7109_v62  ;;  %4202 = vmatpush3.msra.mxu0 %v4455_v21 }
 0x215   :  { %4237 = vmatpush3.msra.mxu1 %v4456_v41  ;;  %4203 = vmatprep.subr.mxu0 %v7109_v62 }
 0x216   :  { %4238 = vmatprep.subr.mxu1 %v7109_v62  ;;  %4204 = vmatpush3.msra.mxu0 %v6329_v22  ;;  %v827_v61 = vpop.f32.mrf.mxu0  ;;  %v897_v19 = vpop.f32.mrf.mxu1 }
 0x217   :  { %4239 = vmatpush3.msra.mxu1 %v6335_v33  ;;  %4205 = vmatprep.subr.mxu0 %v7109_v62 }
 0x218   :  { %4240 = vmatprep.subr.mxu1 %v7109_v62  ;;  %4206 = vmatpush3.msra.mxu0 %v6353_v58  ;;  %v3803_v22 = vpop.f32.mrf.mxu0  ;;  %v3838_v33 = vpop.f32.mrf.mxu1 }
 0x219   :  { %4241 = vmatpush3.msra.mxu1 %v6359_v49  ;;  %4207 = vmatprep.subr.mxu0 %v7109_v62 }
 0x21a   :  { %4242 = vmatprep.subr.mxu1 %v7109_v62  ;;  %4208 = vmatpush3.msra.mxu0 %v6378_v32 }
 0x21b   :  { %4243 = vmatpush3.msra.mxu1 %v6384_v29  ;;  %4209 = vmatprep.subr.mxu0 %v7109_v62 }
 0x21c   :  { %4244 = vmatprep.subr.mxu1 %v7109_v62  ;;  %4210 = vmatpush3.msra.mxu0 %v7198_v40 }
 0x21d   :  { %4245 = vmatpush3.msra.mxu1 %v7199_v46  ;;  %4211 = vmatprep.subr.mxu0 %v7109_v62 }
 0x21e   :  { %4246 = vmatprep.subr.mxu1 %v7109_v62  ;;  %4212 = vmatpush3.msra.mxu0 %v6428_v44 }
 0x21f   :  { %4247 = vmatpush3.msra.mxu1 %v6434_v2  ;;  %4213 = vmatprep.subr.mxu0 %v7109_v62  ;;  %v898_v2 = vadd.f32 %v897_v19, %v827_v61 }
 0x220   :  { %4248 = vmatprep.subr.mxu1 %v7109_v62  ;;  %4214 = vmatpush3.msra.mxu0 %v6450_v10 }
 0x221   :  { %4249 = vmatpush3.msra.mxu1 %v6456_v7  ;;  %4215 = vmatprep.subr.mxu0 %v7109_v62 }
 0x222   :  { %4250 = vmatprep.subr.mxu1 %v7109_v62  ;;  %4216 = vmatpush3.msra.mxu0 %v6481_v18 }
 0x223   :  { %4251 = vmatpush3.msra.mxu1 %v6487_v3  ;;  %4217 = vmatprep.subr.mxu0 %v7109_v62 }
 0x224   :  { %4252 = vmatprep.subr.mxu1 %v7109_v62  ;;  %4218 = vmatpush3.msra.mxu0 %v6509_v23 }
 0x225   :  { %4253 = vmatpush3.msra.mxu1 %v6525_v35  ;;  %4219 = vmatprep.subr.mxu0 %v7109_v62 }
 0x226   :  { %4254 = vmatprep.subr.mxu1 %v7109_v62  ;;  %4220 = vmatpush3.msra.mxu0 %v6539_v24 }
 0x227   :  { %4221 = vmatprep.mubr.msk.f32.mxu0 %vm4590_vm2, %v7109_v62  ;;  %4255 = vmatpush3.msra.mxu1 %v6549_v13 }
 0x228   :  { %4256 = vmatprep.mubr.msk.f32.mxu1 %vm4590_vm2, %v7109_v62  ;;  %4222 = vmatmul.mubr.f32.vlgmr.msra.gmra.mxu0 %v6827_v47 }
 0x229   :  { %4257 = vmatmul.mubr.f32.vlgmr.msra.gmra.mxu1 %v6825_v34  ;;  %3266 = vrot.lane.b32.xlu1 %v898_v2, %s4591_s3 }
 0x23b   :  { %v1221_v44 = vpop.f32.mrf.mxu0  ;;  %v1291_v58 = vpop.f32.mrf.mxu1 }
 0x23c   :  { %v1292_v49 = vadd.f32 %v1291_v58, %v1221_v44 }
 0x23d   :  { %v3873_v32 = vpop.f32.mrf.mxu0  ;;  %v3908_v29 = vpop.f32.mrf.mxu1 }
 0x23e   :  { %3270 = vrot.lane.b32.xlu0 %v1292_v49, %s4592_s4 }
 0x260   :  { %v1615_v10 = vpop.f32.mrf.mxu0  ;;  %v1685_v7 = vpop.f32.mrf.mxu1 }
 0x261   :  { %v1686_v18 = vadd.f32 %v1685_v7, %v1615_v10 }
 0x262   :  { %v3943_v3 = vpop.f32.mrf.mxu0  ;;  %v3978_v23 = vpop.f32.mrf.mxu1 }
 0x263   :  { %3274 = vrot.lane.b32.xlu1 %v1686_v18, %s4593_s11 }
 0x282   :  { %v2009_v62 = vpop.f32.mrf.mxu0 }
 0x284   :  { %v2079_v35 = vpop.f32.mrf.mxu1  ;;  %v4013_v13 = vpop.f32.mrf.mxu0 }
 0x285   :  { %v2080_v24 = vadd.f32 %v2079_v35, %v2009_v62 }
 0x286   :  { %v4048_v40 = vpop.f32.mrf.mxu1 }
 0x287   :  { %3278 = vrot.lane.b32.xlu0 %v2080_v24, %s4594_s12 }
 0x2a4   :  { %v2403_v46 = vpop.f32.mrf.mxu0 }
 0x2a5   :  { %v2473_v30 = vpop.f32.mrf.mxu1 }
 0x2a6   :  { %v2474_v14 = vadd.f32 %v2473_v30, %v2403_v46  ;;  %v4083_v0 = vpop.f32.mrf.mxu0 }
 0x2a7   :  { %v4118_v43 = vpop.f32.mrf.mxu1 }
 0x2a8   :  { %3282 = vrot.lane.b32.xlu1 %v2474_v14, %s4595_s13 }
 0x2c6   :  { %v2797_v52 = vpop.f32.mrf.mxu0 }
 0x2c7   :  { %v2867_v9 = vpop.f32.mrf.mxu1 }
 0x2c8   :  { %v2868_v17 = vadd.f32 %v2867_v9, %v2797_v52  ;;  %v4153_v27 = vpop.f32.mrf.mxu0 }
 0x2c9   :  { %v4188_v56 = vpop.f32.mrf.mxu1 }
 0x2ca   :  { %3286 = vrot.lane.b32.xlu0 %v2868_v17, %s4596_s14 }
 0x2cb   :  { %4508 = shalt.err (!%p4505_p0)
}
 0x2cc   :  { %3329 = dma.vmem_to_hbm [thread:$0]  %s3327_s16, 128, %s7014_s8, [#allocation9]  }
 0x2cd   :  { %s4598_s19 = smov [#allocation10]  }
 0x2ce   :  { %s3336_s0 = sshll.u32 %s4598_s19, 4  ;;  %s3337_s0 = int_to_ptr.vmem [resolvable:$true] %s3336_s0 }
 0x2cf   :  { %s4517_s6 = scalar_lea.vmem %s3337_s0, 128  ;;  %p4522_p2 = scmp.lt.s32.totalorder %s3337_s0, %s3337_s0 }
 0x2d0   :  { %p4518_p1 = scmp.ne.s32.totalorder %s3337_s0, %s4517_s6  ;;  %p4523_p3 = scmp.lt.s32.totalorder %s4517_s6, %s4517_s6 }
 0x2d2   :  { %p4524_p4 = por %p4523_p3, %p4522_p2 }
 0x2d4   :  { %p4525_p5 = pnand %p4524_p4, %p4518_p1 }
 0x2d6   :  { %4528 = shalt.err (!%p4525_p5)
}
 0x2d7   :  { %3339 = dma.vmem_to_hbm [thread:$0]  %s3337_s0, 128, %s7015_s9, [#allocation9]   ;;  %v3267_v48 = vpop.permute.xlu1 %3266  ;;  %v3271_v12 = vpop.permute.xlu0 %3270  ;;  %vm3293_vm2 = vcmask 130048   ;;  %vm3295_vm3 = vcmask 261120   ;;  %vm3297_vm4 = vcmask 392192   ;;  %vm3299_vm7 = vcmask 523264  }
 0x2d8   :  { %s4599_s8 = smov 112   ;;  %v3294_v15 = vsel %vm3293_vm2, %v6865_v28, %v3267_v48  ;;  %vm3301_vm8 = vcmask 654336   ;;  %vm3303_vm10 = vcmask 785408   ;;  %s4600_s9 = smov [#allocation7]   ;;  %vm3305_vm11 = vcmask 916480  }
 0x2d9   :  { %v3296_v42 = vsel %vm3295_vm3, %v3294_v15, %v3271_v12  ;;  %s3316_s22 = sshll.u32 %s4600_s9, 4  ;;  %s3317_s22 = int_to_ptr.vmem [resolvable:$true] %s3316_s22 }
 0x2da   :  { %s4537_s23 = scalar_lea.vmem %s3317_s22, 128  ;;  %p4542_p7 = scmp.lt.s32.totalorder %s3317_s22, %s3317_s22 }
 0x2db   :  { %v3275_v20 = vpop.permute.xlu1 %3274  ;;  %p4538_p6 = scmp.ne.s32.totalorder %s3317_s22, %s4537_s23  ;;  %p4543_p8 = scmp.lt.s32.totalorder %s4537_s23, %s4537_s23 }
 0x2dc   :  { %v3298_v51 = vsel %vm3297_vm4, %v3296_v42, %v3275_v20 }
 0x2dd   :  { %p4544_p9 = por %p4543_p8, %p4542_p7 }
 0x2df   :  { %p4545_p10 = pnand %p4544_p9, %p4538_p6 }
 0x2e8   :  { %v3191_v59 = vpop.f32.mrf.mxu0 }
 0x2e9   :  { %v3261_v45 = vpop.f32.mrf.mxu1 }
 0x2ea   :  { %v3262_v37 = vadd.f32 %v3261_v45, %v3191_v59  ;;  %v4223_v63 = vpop.f32.mrf.mxu0 }
 0x2eb   :  { %v4258_v16 = vpop.f32.mrf.mxu1 }
 0x2ec   :  { %3290 = vrot.lane.b32.xlu1 %v3262_v37, %s4599_s8 }
 0x2f9   :  { %v3279_v57 = vpop.permute.xlu0 %3278 }
 0x2fa   :  { %v3300_v47 = vsel %vm3299_vm7, %v3298_v51, %v3279_v57 }
 0x31a   :  { %v3283_v31 = vpop.permute.xlu1 %3282 }
 0x31b   :  { %v3302_v54 = vsel %vm3301_vm8, %v3300_v47, %v3283_v31 }
 0x33c   :  { %v3287_v34 = vpop.permute.xlu0 %3286 }
 0x33d   :  { %v3304_v25 = vsel %vm3303_vm10, %v3302_v54, %v3287_v34 }
 0x35e   :  { %v3291_v8 = vpop.permute.xlu1 %3290 }
 0x35f   :  { %v3306_v53 = vsel %vm3305_vm11, %v3304_v25, %v3291_v8 }
 0x360   :  { %3307 = vst [vmem:[#allocation7] sm:$0xff] %v3306_v53 }
 0x361   :  { %4548 = shalt.err (!%p4545_p10)
}
 0x362   :  { %3319 = dma.vmem_to_hbm [thread:$0]  %s3317_s22, 128, %s7013_s7, [#allocation4]  }
 0x363   :  { %4561 = dma.done.wait [#allocation4], 128  }
 0x364   :  { %4562 = vsyncadd [#allocation4], 4294967168 }
 0x365   :  { %4563 = dma.done.wait [#allocation9], 256  }
 0x366   :  { %4564 = vsyncadd [#allocation9], 4294967040 }
 0x367   :  { %3349 = vsyncpa [#allocation3], 1 }
 0x368   :  { %3350 = vsyncpa [#allocation6], 1 }
 0x369   :  { %3351 = vsyncpa [#allocation4], 1 }
 0x36a   :  { %3352 = vsyncpa [#allocation9], 1 }

</bundles_post_ra>
